<compile_context>
chip_gen: v6e
topology: v6e:2x2x1
jax: 0.10.0
libtpu: 0.0.40
codegen_flags: <defaults>
</compile_context>

<pallas_src>
import functools
import math

import jax
import jax.numpy as jnp
from jax.experimental import pallas as pl
from jax.experimental.pallas import tpu as pltpu


# ---------------------------------------------------------------------------
# Fused kernel: QKV projections + memory attention + fc_o + residual + LN
# ---------------------------------------------------------------------------
def _mha2_fused_kernel(
    q_in_ref, k_in_ref, v_in_ref,                     # (bt, nq/nk, d_model) f32
    wq_ref, bq_ref, wk_ref, bk_ref, wv_ref, bv_ref,   # projections (w: bf16, b: f32)
    mk_ref, mv_ref,                                   # padded, pre-scaled memory (bf16)
    wo_ref, bo_ref, gamma_ref, beta_ref,              # output proj + LayerNorm
    o_ref,                                            # (bt, nq, d_model) f32
    att_ref,                                          # VMEM scratch (bt*nq, h*d_v) bf16
    *, bt, nq, nk, h, d_k, d_v, m, m_pad, eps):
    d_model = q_in_ref.shape[-1]
    rows_q = bt * nq
    rows_k = bt * nk

    # Whole-slab activations (B_TILE batches at once) -> bigger MXU M dim.
    x_q = q_in_ref[...].reshape(rows_q, d_model)            # f32, kept for residual
    x_k = k_in_ref[...].reshape(rows_k, d_model)
    x_v = v_in_ref[...].reshape(rows_k, d_model)

    # --- fused Q/K/V projections: bf16 operands, f32 accumulation -----------
    # The 1/sqrt(d_k) attention scale is already folded into wq/bq at init.
    q = (jnp.dot(x_q.astype(jnp.bfloat16), wq_ref[...],
                 preferred_element_type=jnp.float32) + bq_ref[...]
         ).astype(jnp.bfloat16)                              # (rows_q, h*d_k)
    k = (jnp.dot(x_k.astype(jnp.bfloat16), wk_ref[...],
                 preferred_element_type=jnp.float32) + bk_ref[...]
         ).astype(jnp.bfloat16)                              # (rows_k, h*d_k)
    v = (jnp.dot(x_v.astype(jnp.bfloat16), wv_ref[...],
                 preferred_element_type=jnp.float32) + bv_ref[...]
         ).astype(jnp.bfloat16)                              # (rows_k, h*d_v)

    mk = mk_ref[...]    # (m_pad, h*d_k) bf16, pre-scaled by sqrt(d_k)
    mv = mv_ref[...]    # (m_pad, h*d_v) bf16, pre-scaled by sqrt(m)

    # Additive mask for the padded memory-slot columns (hoisted out of loops).
    if m_pad != m:
        slot_ids = jax.lax.broadcasted_iota(jnp.int32, (1, m_pad), 1)
        mem_bias = jnp.where(slot_ids < m, 0.0, -1e30).astype(jnp.float32)
    else:
        mem_bias = None

    dims_ll = (((1,), (1,)), ((), ()))   # contract last dim vs last dim (no k.T)

    # --- per-(batch, head) memory attention; statically unrolled ------------
    # Softmax over [keys | memory] is computed on the two score sub-blocks
    # directly; the concatenated K/V tensor is never materialized. Head
    # outputs go straight into the lane-dense VMEM scratch at static offsets.
    for bi in range(bt):
        q_b = q[bi * nq:(bi + 1) * nq]
        k_b = k[bi * nk:(bi + 1) * nk]
        v_b = v[bi * nk:(bi + 1) * nk]
        for hi in range(h):
            q_h = q_b[:, hi * d_k:(hi + 1) * d_k]            # (nq, d_k) bf16
            k_h = k_b[:, hi * d_k:(hi + 1) * d_k]            # (nk, d_k) bf16
            v_h = v_b[:, hi * d_v:(hi + 1) * d_v]            # (nk, d_v) bf16
            mk_h = mk[:, hi * d_k:(hi + 1) * d_k]            # (m_pad, d_k) bf16
            mv_h = mv[:, hi * d_v:(hi + 1) * d_v]            # (m_pad, d_v) bf16

            s1 = jax.lax.dot_general(q_h, k_h, dims_ll,
                                     preferred_element_type=jnp.float32)   # (nq, nk)
            s2 = jax.lax.dot_general(q_h, mk_h, dims_ll,
                                     preferred_element_type=jnp.float32)   # (nq, m_pad)
            if mem_bias is not None:
                s2 = s2 + mem_bias                            # mask padded slots

            mx = jnp.maximum(jnp.max(s1, axis=-1, keepdims=True),
                             jnp.max(s2, axis=-1, keepdims=True))
            p1 = jnp.exp(s1 - mx)
            p2 = jnp.exp(s2 - mx)
            denom = (jnp.sum(p1, axis=-1, keepdims=True)
                     + jnp.sum(p2, axis=-1, keepdims=True))
            inv_denom = pl.reciprocal(denom)                  # exact; (nq,1) is tiny

            o_h = (jnp.dot(p1.astype(jnp.bfloat16), v_h,
                           preferred_element_type=jnp.float32)
                   + jnp.dot(p2.astype(jnp.bfloat16), mv_h,
                             preferred_element_type=jnp.float32)) * inv_denom
            att_ref[bi * nq:(bi + 1) * nq,
                    hi * d_v:(hi + 1) * d_v] = o_h.astype(jnp.bfloat16)

    # --- fused epilogue: fc_o + residual add + LayerNorm (single f32 pass) --
    out = (jnp.dot(att_ref[...], wo_ref[...],
                   preferred_element_type=jnp.float32) + bo_ref[...])
    z = x_q + out                                    # residual (dropout == identity)
    mu = jnp.mean(z, axis=-1, keepdims=True)
    var = jnp.mean((z - mu) * (z - mu), axis=-1, keepdims=True)
    zn = (z - mu) * jax.lax.rsqrt(var + eps)
    y = zn * gamma_ref[...] + beta_ref[...]
    o_ref[...] = y.reshape(bt, nq, d_model).astype(o_ref.dtype)


# ---------------------------------------------------------------------------
# Wrapper helpers
# ---------------------------------------------------------------------------
def _pick_b_tile(b_s, nq, target_rows=128):
    """Batch rows per grid step: aim for >=target_rows projection rows, but
    keep >=2 grid steps when b_s allows it so v7x's two TensorCores both get
    work (feedback items 4 and 9 conflict at tiny b_s; parallelism wins)."""
    bt = max(1, min(b_s, -(-target_rows // max(nq, 1))))
    if b_s >= 2:
        bt = min(bt, b_s // 2)
    while bt > 1 and b_s % bt:
        bt -= 1
    return max(bt, 1)


def _vmem_limit_bytes(bt, nq, nk, d_model, hdk, hdv, m_pad):
    """Rough per-step VMEM residency, x4 headroom, clamped to [32, 48] MiB
    (48 MiB leaves headroom under v7x's 64 MiB physical VMEM)."""
    f32, bf16 = 4, 2
    act = 2 * bt * (2 * nq + 2 * nk) * d_model * f32          # double-buffered blocks
    weights = 2 * ((d_model * (2 * hdk + hdv) + hdv * d_model
                    + m_pad * (hdk + hdv)) * bf16
                   + (2 * hdk + hdv + 3 * d_model) * f32)
    inter = (bt * nq * (2 * hdk + hdv + 3 * d_model)
             + 2 * bt * nk * (hdk + hdv)
             + 2 * bt * nq * (nk + m_pad)) * f32
    est = act + weights + inter
    return int(min(max(4 * est, 32 * 1024 * 1024), 48 * 1024 * 1024))


def _const_spec(rows, cols, single_buffer):
    """BlockSpec for a grid-constant parameter block (same tile every step)."""
    if single_buffer:
        # Constant index_map -> never re-fetched; a single VMEM buffer is
        # enough (saves half the weight VMEM on v7x's tight 64 MiB budget).
        return pl.BlockSpec((rows, cols), lambda b: (0, 0),
                            pipeline_mode=pl.Buffered(1))
    return pl.BlockSpec((rows, cols), lambda b: (0, 0))


# ---------------------------------------------------------------------------
# Public wrapper
# ---------------------------------------------------------------------------
def multi_head_attention2(queries, keys, values, params, *, d_k, d_v, h, m,
                          eps=1e-5, b_tile=None):
    b_s, nq, d_model = queries.shape
    nk = keys.shape[1]
    hdk, hdv = h * d_k, h * d_v
    m_pad = params["m_k_scaled"].shape[0]

    bt = b_tile if b_tile is not None else _pick_b_tile(b_s, nq)
    assert b_s % bt == 0, "b_tile must divide the batch size"
    grid = (b_s // bt,)

    kernel = functools.partial(
        _mha2_fused_kernel, bt=bt, nq=nq, nk=nk, h=h, d_k=d_k, d_v=d_v,
        m=m, m_pad=m_pad, eps=eps)

    args = (
        queries, keys, values,
        params["wq"], params["bq"].reshape(1, hdk),
        params["wk"], params["bk"].reshape(1, hdk),
        params["wv"], params["bv"].reshape(1, hdv),
        params["m_k_scaled"], params["m_v_scaled"],
        params["wo"], params["bo"].reshape(1, d_model),
        params["gamma"].reshape(1, d_model), params["beta"].reshape(1, d_model),
    )

    def build(single_buffer_weights):
        const2d = functools.partial(_const_spec,
                                    single_buffer=single_buffer_weights)
        act_q = pl.BlockSpec((bt, nq, d_model), lambda b: (b, 0, 0))
        act_k = pl.BlockSpec((bt, nk, d_model), lambda b: (b, 0, 0))
        return pl.pallas_call(
            kernel,
            out_shape=jax.ShapeDtypeStruct((b_s, nq, d_model), jnp.float32),
            grid=grid,
            in_specs=[
                act_q, act_k, act_k,            # queries, keys, values
                const2d(d_model, hdk),          # wq (scale folded in, bf16)
                const2d(1, hdk),                # bq
                const2d(d_model, hdk),          # wk
                const2d(1, hdk),                # bk
                const2d(d_model, hdv),          # wv
                const2d(1, hdv),                # bv
                const2d(m_pad, hdk),            # m_k (padded, pre-scaled, bf16)
                const2d(m_pad, hdv),            # m_v (padded, pre-scaled, bf16)
                const2d(hdv, d_model),          # wo
                const2d(1, d_model),            # bo
                const2d(1, d_model),            # gamma
                const2d(1, d_model),            # beta
            ],
            out_specs=pl.BlockSpec((bt, nq, d_model), lambda b: (b, 0, 0)),
            scratch_shapes=[pltpu.VMEM((bt * nq, hdv), jnp.bfloat16)],
            compiler_params=pltpu.CompilerParams(
                dimension_semantics=("parallel",),   # shard batch tiles on v7x's 2 TCs
                vmem_limit_bytes=_vmem_limit_bytes(bt, nq, nk, d_model,
                                                   hdk, hdv, m_pad),
            ),
        )

    try:
        out = build(single_buffer_weights=True)(*args)
        return jax.block_until_ready(out)
    except Exception:
        # Fallback if this JAX build rejects pl.Buffered(1) on a pallas_call
        # BlockSpec: identical kernel with default (double) buffering.
        return build(single_buffer_weights=False)(*args)


# ---------------------------------------------------------------------------
# Parameter setup (xavier-uniform like PyTorch init_weights)
# ---------------------------------------------------------------------------
def xavier_uniform(key, fan_in, fan_out):
    bound = math.sqrt(6.0 / (fan_in + fan_out))
    # stored as (fan_in, fan_out) so that y = x @ W  (== PyTorch x @ W.T)
    return jax.random.uniform(
        key, (fan_in, fan_out), jnp.float32, minval=-bound, maxval=bound)


def init_params(key, d_model, d_k, d_v, h, m):
    ks = jax.random.split(key, 6)
    m_pad = ((m + 7) // 8) * 8                 # 8-sublane aligned memory slots
    inv_sqrt_dk = 1.0 / math.sqrt(d_k)
    bf16 = jnp.bfloat16

    # m_k / m_v are uninitialized nn.Parameters in the PyTorch module; use
    # deterministic normals. The sqrt(d_k)/sqrt(m) forward-pass scales are
    # folded into the stored values; padded rows are zeros (masked in-kernel).
    m_k = 0.02 * jax.random.normal(ks[4], (m, h * d_k), jnp.float32)
    m_v = 0.02 * jax.random.normal(ks[5], (m, h * d_v), jnp.float32)
    mk_s = jnp.zeros((m_pad, h * d_k), jnp.float32).at[:m].set(math.sqrt(d_k) * m_k)
    mv_s = jnp.zeros((m_pad, h * d_v), jnp.float32).at[:m].set(math.sqrt(m) * m_v)

    return {
        # 1/sqrt(d_k) attention scale folded into the query projection;
        # matmul operands stored in bf16 (f32 accumulation in-kernel).
        "wq": (inv_sqrt_dk * xavier_uniform(ks[0], d_model, h * d_k)).astype(bf16),
        "bq": jnp.zeros((h * d_k,), jnp.float32),   # (x inv_sqrt_dk; zero anyway)
        "wk": xavier_uniform(ks[1], d_model, h * d_k).astype(bf16),
        "bk": jnp.zeros((h * d_k,), jnp.float32),
        "wv": xavier_uniform(ks[2], d_model, h * d_v).astype(bf16),
        "bv": jnp.zeros((h * d_v,), jnp.float32),
        "wo": xavier_uniform(ks[3], h * d_v, d_model).astype(bf16),
        "bo": jnp.zeros((d_model,), jnp.float32),
        "m_k_scaled": mk_s.astype(bf16),
        "m_v_scaled": mv_s.astype(bf16),
        "gamma": jnp.ones((d_model,), jnp.float32),
        "beta": jnp.zeros((d_model,), jnp.float32),
    }


# ---------------------------------------------------------------------------
# Pure-JAX reference (f32 math on the same stored parameters)
# ---------------------------------------------------------------------------
def reference_forward(queries, keys, values, params, *, d_k, d_v, h, m, eps=1e-5):
    f32 = jnp.float32
    wq, wk, wv, wo = (params[n].astype(f32) for n in ("wq", "wk", "wv", "wo"))
    bq, bk, bv, bo = params["bq"], params["bk"], params["bv"], params["bo"]
    mk = params["m_k_scaled"].astype(f32)[:m]
    mv = params["m_v_scaled"].astype(f32)[:m]
    b_s, nq, _ = queries.shape
    nk = keys.shape[1]

    q = queries @ wq + bq                      # 1/sqrt(d_k) already folded in
    k = keys @ wk + bk
    v = values @ wv + bv
    qh = q.reshape(b_s, nq, h, d_k).transpose(0, 2, 1, 3)
    kh = k.reshape(b_s, nk, h, d_k).transpose(0, 2, 1, 3)
    vh = v.reshape(b_s, nk, h, d_v).transpose(0, 2, 1, 3)
    mkh = mk.reshape(m, h, d_k).transpose(1, 0, 2)
    mvh = mv.reshape(m, h, d_v).transpose(1, 0, 2)

    s = jnp.concatenate(
        [jnp.einsum("bhqd,bhkd->bhqk", qh, kh),
         jnp.einsum("bhqd,hmd->bhqm", qh, mkh)], axis=-1)
    p = jax.nn.softmax(s, axis=-1)
    o = (jnp.einsum("bhqk,bhkd->bhqd", p[..., :nk], vh)
         + jnp.einsum("bhqm,hmd->bhqd", p[..., nk:], mvh))
    att = o.transpose(0, 2, 1, 3).reshape(b_s, nq, h * d_v)
    out = att @ wo + bo
    z = queries + out
    mu = z.mean(-1, keepdims=True)
    var = ((z - mu) ** 2).mean(-1, keepdims=True)
    return (z - mu) / jnp.sqrt(var + eps) * params["gamma"] + params["beta"]


if __name__ == "__main__":
    # small shapes consistent with the module's forward
    b_s, nq, nk = 2, 8, 8
    d_model, d_k, d_v, h, m = 32, 8, 8, 4, 30

    key = jax.random.PRNGKey(0)
    kq, kk, kv, kp = jax.random.split(key, 4)
    queries = jax.random.normal(kq, (b_s, nq, d_model), jnp.float32)
    keys = jax.random.normal(kk, (b_s, nk, d_model), jnp.float32)
    values = jax.random.normal(kv, (b_s, nk, d_model), jnp.float32)

    params = init_params(kp, d_model, d_k, d_v, h, m)

    out = multi_head_attention2(
        queries, keys, values, params, d_k=d_k, d_v=d_v, h=h, m=m)
    out = jax.block_until_ready(out)
    assert out.shape == (b_s, nq, d_model)
    assert bool(jnp.all(jnp.isfinite(out)))

    # Tolerance check vs. a pure-JAX f32 reference (kernel uses bf16 matmul
    # operands with f32 accumulation, so allow bf16-level slack).
    ref = reference_forward(queries, keys, values, params,
                            d_k=d_k, d_v=d_v, h=h, m=m)
    max_err = float(jnp.max(jnp.abs(out - ref)))
    assert max_err < 1e-1, f"kernel/reference mismatch: max abs err {max_err}"

    print("KERNEL_OK")
</pallas_src>

<mosaic_0001>
module attributes {stable_mosaic.version = 11 : i64} {
  func.func @_mha2_fused_kernel(%arg0: i32, %arg1: memref<1x8x32xf32, #tpu.memory_space<vmem>>, %arg2: memref<1x8x32xf32, #tpu.memory_space<vmem>>, %arg3: memref<1x8x32xf32, #tpu.memory_space<vmem>>, %arg4: memref<32x32xbf16, #tpu.memory_space<vmem>>, %arg5: memref<1x32xf32, #tpu.memory_space<vmem>>, %arg6: memref<32x32xbf16, #tpu.memory_space<vmem>>, %arg7: memref<1x32xf32, #tpu.memory_space<vmem>>, %arg8: memref<32x32xbf16, #tpu.memory_space<vmem>>, %arg9: memref<1x32xf32, #tpu.memory_space<vmem>>, %arg10: memref<32x32xbf16, #tpu.memory_space<vmem>>, %arg11: memref<32x32xbf16, #tpu.memory_space<vmem>>, %arg12: memref<32x32xbf16, #tpu.memory_space<vmem>>, %arg13: memref<1x32xf32, #tpu.memory_space<vmem>>, %arg14: memref<1x32xf32, #tpu.memory_space<vmem>>, %arg15: memref<1x32xf32, #tpu.memory_space<vmem>>, %arg16: memref<1x8x32xf32, #tpu.memory_space<vmem>>, %arg17: memref<8x32xbf16, #tpu.memory_space<vmem>>) attributes {dimension_semantics = [#tpu.dimension_semantics<parallel>], iteration_bounds = array<i64: 2>, scalar_prefetch = 0 : i64, scratch_operands = 1 : i64, tpu.core_type = #tpu.core_type<tc>, window_params = [{transform_indices = @transform_0, window_bounds = array<i64: 1, 8, 32>}, {transform_indices = @transform_1, window_bounds = array<i64: 1, 8, 32>}, {transform_indices = @transform_2, window_bounds = array<i64: 1, 8, 32>}, {pipeline_mode = #tpu.pipeline_mode<synchronous>, transform_indices = @transform_3, window_bounds = array<i64: 32, 32>}, {pipeline_mode = #tpu.pipeline_mode<synchronous>, transform_indices = @transform_4, window_bounds = array<i64: 1, 32>}, {pipeline_mode = #tpu.pipeline_mode<synchronous>, transform_indices = @transform_5, window_bounds = array<i64: 32, 32>}, {pipeline_mode = #tpu.pipeline_mode<synchronous>, transform_indices = @transform_6, window_bounds = array<i64: 1, 32>}, {pipeline_mode = #tpu.pipeline_mode<synchronous>, transform_indices = @transform_7, window_bounds = array<i64: 32, 32>}, {pipeline_mode = #tpu.pipeline_mode<synchronous>, transform_indices = @transform_8, window_bounds = array<i64: 1, 32>}, {pipeline_mode = #tpu.pipeline_mode<synchronous>, transform_indices = @transform_9, window_bounds = array<i64: 32, 32>}, {pipeline_mode = #tpu.pipeline_mode<synchronous>, transform_indices = @transform_10, window_bounds = array<i64: 32, 32>}, {pipeline_mode = #tpu.pipeline_mode<synchronous>, transform_indices = @transform_11, window_bounds = array<i64: 32, 32>}, {pipeline_mode = #tpu.pipeline_mode<synchronous>, transform_indices = @transform_12, window_bounds = array<i64: 1, 32>}, {pipeline_mode = #tpu.pipeline_mode<synchronous>, transform_indices = @transform_13, window_bounds = array<i64: 1, 32>}, {pipeline_mode = #tpu.pipeline_mode<synchronous>, transform_indices = @transform_14, window_bounds = array<i64: 1, 32>}, {transform_indices = @transform_15, window_bounds = array<i64: 1, 8, 32>}]} {
    %c0 = arith.constant 0 : index
    %c0_0 = arith.constant 0 : index
    %c0_1 = arith.constant 0 : index
    %0 = vector.load %arg1[%c0, %c0_0, %c0_1] : memref<1x8x32xf32, #tpu.memory_space<vmem>>, vector<1x8x32xf32>
    %1 = vector.shape_cast %0 : vector<1x8x32xf32> to vector<8x32xf32>
    %c0_2 = arith.constant 0 : index
    %c0_3 = arith.constant 0 : index
    %c0_4 = arith.constant 0 : index
    %2 = vector.load %arg2[%c0_2, %c0_3, %c0_4] : memref<1x8x32xf32, #tpu.memory_space<vmem>>, vector<1x8x32xf32>
    %3 = vector.shape_cast %2 : vector<1x8x32xf32> to vector<8x32xf32>
    %c0_5 = arith.constant 0 : index
    %c0_6 = arith.constant 0 : index
    %c0_7 = arith.constant 0 : index
    %4 = vector.load %arg3[%c0_5, %c0_6, %c0_7] : memref<1x8x32xf32, #tpu.memory_space<vmem>>, vector<1x8x32xf32>
    %5 = vector.shape_cast %4 : vector<1x8x32xf32> to vector<8x32xf32>
    %6 = arith.truncf %1 : vector<8x32xf32> to vector<8x32xbf16>
    %c0_8 = arith.constant 0 : index
    %c0_9 = arith.constant 0 : index
    %7 = vector.load %arg4[%c0_8, %c0_9] : memref<32x32xbf16, #tpu.memory_space<vmem>>, vector<32x32xbf16>
    %cst = arith.constant dense<0.000000e+00> : vector<8x32xf32>
    %8 = tpu.matmul %6, %7, %cst {dimension_numbers = #tpu.dot_dimension_numbers<[1], [0], [0], [1], [0, 0, 1, 1], [], []>} : vector<8x32xbf16>, vector<32x32xbf16>, vector<8x32xf32> -> vector<8x32xf32>
    %c0_10 = arith.constant 0 : index
    %c0_11 = arith.constant 0 : index
    %9 = vector.load %arg5[%c0_10, %c0_11] : memref<1x32xf32, #tpu.memory_space<vmem>>, vector<1x32xf32>
    %10 = vector.broadcast %9 : vector<1x32xf32> to vector<8x32xf32>
    %11 = arith.addf %8, %10 : vector<8x32xf32>
    %12 = arith.truncf %11 : vector<8x32xf32> to vector<8x32xbf16>
    %13 = arith.truncf %3 : vector<8x32xf32> to vector<8x32xbf16>
    %c0_12 = arith.constant 0 : index
    %c0_13 = arith.constant 0 : index
    %14 = vector.load %arg6[%c0_12, %c0_13] : memref<32x32xbf16, #tpu.memory_space<vmem>>, vector<32x32xbf16>
    %cst_14 = arith.constant dense<0.000000e+00> : vector<8x32xf32>
    %15 = tpu.matmul %13, %14, %cst_14 {dimension_numbers = #tpu.dot_dimension_numbers<[1], [0], [0], [1], [0, 0, 1, 1], [], []>} : vector<8x32xbf16>, vector<32x32xbf16>, vector<8x32xf32> -> vector<8x32xf32>
    %c0_15 = arith.constant 0 : index
    %c0_16 = arith.constant 0 : index
    %16 = vector.load %arg7[%c0_15, %c0_16] : memref<1x32xf32, #tpu.memory_space<vmem>>, vector<1x32xf32>
    %17 = vector.broadcast %16 : vector<1x32xf32> to vector<8x32xf32>
    %18 = arith.addf %15, %17 : vector<8x32xf32>
    %19 = arith.truncf %18 : vector<8x32xf32> to vector<8x32xbf16>
    %20 = arith.truncf %5 : vector<8x32xf32> to vector<8x32xbf16>
    %c0_17 = arith.constant 0 : index
    %c0_18 = arith.constant 0 : index
    %21 = vector.load %arg8[%c0_17, %c0_18] : memref<32x32xbf16, #tpu.memory_space<vmem>>, vector<32x32xbf16>
    %cst_19 = arith.constant dense<0.000000e+00> : vector<8x32xf32>
    %22 = tpu.matmul %20, %21, %cst_19 {dimension_numbers = #tpu.dot_dimension_numbers<[1], [0], [0], [1], [0, 0, 1, 1], [], []>} : vector<8x32xbf16>, vector<32x32xbf16>, vector<8x32xf32> -> vector<8x32xf32>
    %c0_20 = arith.constant 0 : index
    %c0_21 = arith.constant 0 : index
    %23 = vector.load %arg9[%c0_20, %c0_21] : memref<1x32xf32, #tpu.memory_space<vmem>>, vector<1x32xf32>
    %24 = vector.broadcast %23 : vector<1x32xf32> to vector<8x32xf32>
    %25 = arith.addf %22, %24 : vector<8x32xf32>
    %26 = arith.truncf %25 : vector<8x32xf32> to vector<8x32xbf16>
    %c0_22 = arith.constant 0 : index
    %c0_23 = arith.constant 0 : index
    %27 = vector.load %arg10[%c0_22, %c0_23] : memref<32x32xbf16, #tpu.memory_space<vmem>>, vector<32x32xbf16>
    %c0_24 = arith.constant 0 : index
    %c0_25 = arith.constant 0 : index
    %28 = vector.load %arg11[%c0_24, %c0_25] : memref<32x32xbf16, #tpu.memory_space<vmem>>, vector<32x32xbf16>
    %29 = tpu.iota {dimensions = array<i32: 1>} : vector<1x32xi32>
    %c30_i32 = arith.constant 30 : i32
    %30 = vector.broadcast %c30_i32 : i32 to vector<1x32xi32>
    %31 = arith.cmpi slt, %29, %30 : vector<1x32xi32>
    %cst_26 = arith.constant 0.000000e+00 : f32
    %cst_27 = arith.constant -1.000000e+30 : f32
    %32 = vector.broadcast %cst_26 : f32 to vector<1x32xf32>
    %33 = vector.broadcast %cst_27 : f32 to vector<1x32xf32>
    %34 = arith.select %31, %32, %33 : vector<1x32xi1>, vector<1x32xf32>
    %35 = vector.extract_strided_slice %12 {offsets = [0, 0], sizes = [8, 8], strides = [1, 1]} : vector<8x32xbf16> to vector<8x8xbf16>
    %36 = vector.extract_strided_slice %19 {offsets = [0, 0], sizes = [8, 8], strides = [1, 1]} : vector<8x32xbf16> to vector<8x8xbf16>
    %37 = vector.extract_strided_slice %26 {offsets = [0, 0], sizes = [8, 8], strides = [1, 1]} : vector<8x32xbf16> to vector<8x8xbf16>
    %38 = vector.extract_strided_slice %27 {offsets = [0, 0], sizes = [32, 8], strides = [1, 1]} : vector<32x32xbf16> to vector<32x8xbf16>
    %39 = vector.extract_strided_slice %28 {offsets = [0, 0], sizes = [32, 8], strides = [1, 1]} : vector<32x32xbf16> to vector<32x8xbf16>
    %cst_28 = arith.constant dense<0.000000e+00> : vector<8x8xf32>
    %40 = tpu.matmul %35, %36, %cst_28 {dimension_numbers = #tpu.dot_dimension_numbers<[1], [1], [0], [0], [0, 0, 1, 0], [], []>} : vector<8x8xbf16>, vector<8x8xbf16>, vector<8x8xf32> -> vector<8x8xf32>
    %cst_29 = arith.constant dense<0.000000e+00> : vector<8x32xf32>
    %41 = tpu.matmul %35, %38, %cst_29 {dimension_numbers = #tpu.dot_dimension_numbers<[1], [1], [0], [0], [0, 0, 1, 0], [], []>} : vector<8x8xbf16>, vector<32x8xbf16>, vector<8x32xf32> -> vector<8x32xf32>
    %42 = vector.broadcast %34 : vector<1x32xf32> to vector<8x32xf32>
    %43 = arith.addf %41, %42 : vector<8x32xf32>
    %cst_30 = arith.constant dense<0xFF800000> : vector<8xf32>
    %44 = vector.multi_reduction <maximumf>, %40, %cst_30 [1] : vector<8x8xf32> to vector<8xf32>
    %45 = vector.shape_cast %44 : vector<8xf32> to vector<8x1xf32>
    %cst_31 = arith.constant dense<0xFF800000> : vector<8xf32>
    %46 = vector.multi_reduction <maximumf>, %43, %cst_31 [1] : vector<8x32xf32> to vector<8xf32>
    %47 = vector.shape_cast %46 : vector<8xf32> to vector<8x1xf32>
    %48 = arith.maximumf %45, %47 : vector<8x1xf32>
    %49 = vector.broadcast %48 : vector<8x1xf32> to vector<8x8xf32>
    %50 = arith.subf %40, %49 : vector<8x8xf32>
    %51 = math.exp %50 : vector<8x8xf32>
    %52 = vector.broadcast %48 : vector<8x1xf32> to vector<8x32xf32>
    %53 = arith.subf %43, %52 : vector<8x32xf32>
    %54 = math.exp %53 : vector<8x32xf32>
    %cst_32 = arith.constant dense<0.000000e+00> : vector<8xf32>
    %55 = vector.multi_reduction <add>, %51, %cst_32 [1] : vector<8x8xf32> to vector<8xf32>
    %56 = vector.shape_cast %55 : vector<8xf32> to vector<8x1xf32>
    %cst_33 = arith.constant dense<0.000000e+00> : vector<8xf32>
    %57 = vector.multi_reduction <add>, %54, %cst_33 [1] : vector<8x32xf32> to vector<8xf32>
    %58 = vector.shape_cast %57 : vector<8xf32> to vector<8x1xf32>
    %59 = arith.addf %56, %58 : vector<8x1xf32>
    %60 = tpu.reciprocal %59 : vector<8x1xf32> -> vector<8x1xf32>
    %61 = arith.truncf %51 : vector<8x8xf32> to vector<8x8xbf16>
    %cst_34 = arith.constant dense<0.000000e+00> : vector<8x8xf32>
    %62 = tpu.matmul %61, %37, %cst_34 {dimension_numbers = #tpu.dot_dimension_numbers<[1], [0], [0], [1], [0, 0, 1, 1], [], []>} : vector<8x8xbf16>, vector<8x8xbf16>, vector<8x8xf32> -> vector<8x8xf32>
    %63 = arith.truncf %54 : vector<8x32xf32> to vector<8x32xbf16>
    %cst_35 = arith.constant dense<0.000000e+00> : vector<8x8xf32>
    %64 = tpu.matmul %63, %39, %cst_35 {dimension_numbers = #tpu.dot_dimension_numbers<[1], [0], [0], [1], [0, 0, 1, 1], [], []>} : vector<8x32xbf16>, vector<32x8xbf16>, vector<8x8xf32> -> vector<8x8xf32>
    %65 = arith.addf %62, %64 : vector<8x8xf32>
    %66 = vector.broadcast %60 : vector<8x1xf32> to vector<8x8xf32>
    %67 = arith.mulf %65, %66 : vector<8x8xf32>
    %68 = arith.truncf %67 : vector<8x8xf32> to vector<8x8xbf16>
    %c0_36 = arith.constant 0 : index
    %c0_37 = arith.constant 0 : index
    %69 = vector.load %arg17[%c0_36, %c0_37] : memref<8x32xbf16, #tpu.memory_space<vmem>>, vector<8x8xbf16>
    tpu.vector_store %arg17[%c0_36, %c0_37], %68 {strides = array<i32>} : memref<8x32xbf16, #tpu.memory_space<vmem>>, vector<8x8xbf16>,
    %70 = vector.extract_strided_slice %12 {offsets = [0, 8], sizes = [8, 8], strides = [1, 1]} : vector<8x32xbf16> to vector<8x8xbf16>
    %71 = vector.extract_strided_slice %19 {offsets = [0, 8], sizes = [8, 8], strides = [1, 1]} : vector<8x32xbf16> to vector<8x8xbf16>
    %72 = vector.extract_strided_slice %26 {offsets = [0, 8], sizes = [8, 8], strides = [1, 1]} : vector<8x32xbf16> to vector<8x8xbf16>
    %73 = vector.extract_strided_slice %27 {offsets = [0, 8], sizes = [32, 8], strides = [1, 1]} : vector<32x32xbf16> to vector<32x8xbf16>
    %74 = vector.extract_strided_slice %28 {offsets = [0, 8], sizes = [32, 8], strides = [1, 1]} : vector<32x32xbf16> to vector<32x8xbf16>
    %cst_38 = arith.constant dense<0.000000e+00> : vector<8x8xf32>
    %75 = tpu.matmul %70, %71, %cst_38 {dimension_numbers = #tpu.dot_dimension_numbers<[1], [1], [0], [0], [0, 0, 1, 0], [], []>} : vector<8x8xbf16>, vector<8x8xbf16>, vector<8x8xf32> -> vector<8x8xf32>
    %cst_39 = arith.constant dense<0.000000e+00> : vector<8x32xf32>
    %76 = tpu.matmul %70, %73, %cst_39 {dimension_numbers = #tpu.dot_dimension_numbers<[1], [1], [0], [0], [0, 0, 1, 0], [], []>} : vector<8x8xbf16>, vector<32x8xbf16>, vector<8x32xf32> -> vector<8x32xf32>
    %77 = vector.broadcast %34 : vector<1x32xf32> to vector<8x32xf32>
    %78 = arith.addf %76, %77 : vector<8x32xf32>
    %cst_40 = arith.constant dense<0xFF800000> : vector<8xf32>
    %79 = vector.multi_reduction <maximumf>, %75, %cst_40 [1] : vector<8x8xf32> to vector<8xf32>
    %80 = vector.shape_cast %79 : vector<8xf32> to vector<8x1xf32>
    %cst_41 = arith.constant dense<0xFF800000> : vector<8xf32>
    %81 = vector.multi_reduction <maximumf>, %78, %cst_41 [1] : vector<8x32xf32> to vector<8xf32>
    %82 = vector.shape_cast %81 : vector<8xf32> to vector<8x1xf32>
    %83 = arith.maximumf %80, %82 : vector<8x1xf32>
    %84 = vector.broadcast %83 : vector<8x1xf32> to vector<8x8xf32>
    %85 = arith.subf %75, %84 : vector<8x8xf32>
    %86 = math.exp %85 : vector<8x8xf32>
    %87 = vector.broadcast %83 : vector<8x1xf32> to vector<8x32xf32>
    %88 = arith.subf %78, %87 : vector<8x32xf32>
    %89 = math.exp %88 : vector<8x32xf32>
    %cst_42 = arith.constant dense<0.000000e+00> : vector<8xf32>
    %90 = vector.multi_reduction <add>, %86, %cst_42 [1] : vector<8x8xf32> to vector<8xf32>
    %91 = vector.shape_cast %90 : vector<8xf32> to vector<8x1xf32>
    %cst_43 = arith.constant dense<0.000000e+00> : vector<8xf32>
    %92 = vector.multi_reduction <add>, %89, %cst_43 [1] : vector<8x32xf32> to vector<8xf32>
    %93 = vector.shape_cast %92 : vector<8xf32> to vector<8x1xf32>
    %94 = arith.addf %91, %93 : vector<8x1xf32>
    %95 = tpu.reciprocal %94 : vector<8x1xf32> -> vector<8x1xf32>
    %96 = arith.truncf %86 : vector<8x8xf32> to vector<8x8xbf16>
    %cst_44 = arith.constant dense<0.000000e+00> : vector<8x8xf32>
    %97 = tpu.matmul %96, %72, %cst_44 {dimension_numbers = #tpu.dot_dimension_numbers<[1], [0], [0], [1], [0, 0, 1, 1], [], []>} : vector<8x8xbf16>, vector<8x8xbf16>, vector<8x8xf32> -> vector<8x8xf32>
    %98 = arith.truncf %89 : vector<8x32xf32> to vector<8x32xbf16>
    %cst_45 = arith.constant dense<0.000000e+00> : vector<8x8xf32>
    %99 = tpu.matmul %98, %74, %cst_45 {dimension_numbers = #tpu.dot_dimension_numbers<[1], [0], [0], [1], [0, 0, 1, 1], [], []>} : vector<8x32xbf16>, vector<32x8xbf16>, vector<8x8xf32> -> vector<8x8xf32>
    %100 = arith.addf %97, %99 : vector<8x8xf32>
    %101 = vector.broadcast %95 : vector<8x1xf32> to vector<8x8xf32>
    %102 = arith.mulf %100, %101 : vector<8x8xf32>
    %103 = arith.truncf %102 : vector<8x8xf32> to vector<8x8xbf16>
    %c0_46 = arith.constant 0 : index
    %c8 = arith.constant 8 : index
    %104 = vector.load %arg17[%c0_46, %c8] : memref<8x32xbf16, #tpu.memory_space<vmem>>, vector<8x8xbf16>
    tpu.vector_store %arg17[%c0_46, %c8], %103 {strides = array<i32>} : memref<8x32xbf16, #tpu.memory_space<vmem>>, vector<8x8xbf16>,
    %105 = vector.extract_strided_slice %12 {offsets = [0, 16], sizes = [8, 8], strides = [1, 1]} : vector<8x32xbf16> to vector<8x8xbf16>
    %106 = vector.extract_strided_slice %19 {offsets = [0, 16], sizes = [8, 8], strides = [1, 1]} : vector<8x32xbf16> to vector<8x8xbf16>
    %107 = vector.extract_strided_slice %26 {offsets = [0, 16], sizes = [8, 8], strides = [1, 1]} : vector<8x32xbf16> to vector<8x8xbf16>
    %108 = vector.extract_strided_slice %27 {offsets = [0, 16], sizes = [32, 8], strides = [1, 1]} : vector<32x32xbf16> to vector<32x8xbf16>
    %109 = vector.extract_strided_slice %28 {offsets = [0, 16], sizes = [32, 8], strides = [1, 1]} : vector<32x32xbf16> to vector<32x8xbf16>
    %cst_47 = arith.constant dense<0.000000e+00> : vector<8x8xf32>
    %110 = tpu.matmul %105, %106, %cst_47 {dimension_numbers = #tpu.dot_dimension_numbers<[1], [1], [0], [0], [0, 0, 1, 0], [], []>} : vector<8x8xbf16>, vector<8x8xbf16>, vector<8x8xf32> -> vector<8x8xf32>
    %cst_48 = arith.constant dense<0.000000e+00> : vector<8x32xf32>
    %111 = tpu.matmul %105, %108, %cst_48 {dimension_numbers = #tpu.dot_dimension_numbers<[1], [1], [0], [0], [0, 0, 1, 0], [], []>} : vector<8x8xbf16>, vector<32x8xbf16>, vector<8x32xf32> -> vector<8x32xf32>
    %112 = vector.broadcast %34 : vector<1x32xf32> to vector<8x32xf32>
    %113 = arith.addf %111, %112 : vector<8x32xf32>
    %cst_49 = arith.constant dense<0xFF800000> : vector<8xf32>
    %114 = vector.multi_reduction <maximumf>, %110, %cst_49 [1] : vector<8x8xf32> to vector<8xf32>
    %115 = vector.shape_cast %114 : vector<8xf32> to vector<8x1xf32>
    %cst_50 = arith.constant dense<0xFF800000> : vector<8xf32>
    %116 = vector.multi_reduction <maximumf>, %113, %cst_50 [1] : vector<8x32xf32> to vector<8xf32>
    %117 = vector.shape_cast %116 : vector<8xf32> to vector<8x1xf32>
    %118 = arith.maximumf %115, %117 : vector<8x1xf32>
    %119 = vector.broadcast %118 : vector<8x1xf32> to vector<8x8xf32>
    %120 = arith.subf %110, %119 : vector<8x8xf32>
    %121 = math.exp %120 : vector<8x8xf32>
    %122 = vector.broadcast %118 : vector<8x1xf32> to vector<8x32xf32>
    %123 = arith.subf %113, %122 : vector<8x32xf32>
    %124 = math.exp %123 : vector<8x32xf32>
    %cst_51 = arith.constant dense<0.000000e+00> : vector<8xf32>
    %125 = vector.multi_reduction <add>, %121, %cst_51 [1] : vector<8x8xf32> to vector<8xf32>
    %126 = vector.shape_cast %125 : vector<8xf32> to vector<8x1xf32>
    %cst_52 = arith.constant dense<0.000000e+00> : vector<8xf32>
    %127 = vector.multi_reduction <add>, %124, %cst_52 [1] : vector<8x32xf32> to vector<8xf32>
    %128 = vector.shape_cast %127 : vector<8xf32> to vector<8x1xf32>
    %129 = arith.addf %126, %128 : vector<8x1xf32>
    %130 = tpu.reciprocal %129 : vector<8x1xf32> -> vector<8x1xf32>
    %131 = arith.truncf %121 : vector<8x8xf32> to vector<8x8xbf16>
    %cst_53 = arith.constant dense<0.000000e+00> : vector<8x8xf32>
    %132 = tpu.matmul %131, %107, %cst_53 {dimension_numbers = #tpu.dot_dimension_numbers<[1], [0], [0], [1], [0, 0, 1, 1], [], []>} : vector<8x8xbf16>, vector<8x8xbf16>, vector<8x8xf32> -> vector<8x8xf32>
    %133 = arith.truncf %124 : vector<8x32xf32> to vector<8x32xbf16>
    %cst_54 = arith.constant dense<0.000000e+00> : vector<8x8xf32>
    %134 = tpu.matmul %133, %109, %cst_54 {dimension_numbers = #tpu.dot_dimension_numbers<[1], [0], [0], [1], [0, 0, 1, 1], [], []>} : vector<8x32xbf16>, vector<32x8xbf16>, vector<8x8xf32> -> vector<8x8xf32>
    %135 = arith.addf %132, %134 : vector<8x8xf32>
    %136 = vector.broadcast %130 : vector<8x1xf32> to vector<8x8xf32>
    %137 = arith.mulf %135, %136 : vector<8x8xf32>
    %138 = arith.truncf %137 : vector<8x8xf32> to vector<8x8xbf16>
    %c0_55 = arith.constant 0 : index
    %c16 = arith.constant 16 : index
    %139 = vector.load %arg17[%c0_55, %c16] : memref<8x32xbf16, #tpu.memory_space<vmem>>, vector<8x8xbf16>
    tpu.vector_store %arg17[%c0_55, %c16], %138 {strides = array<i32>} : memref<8x32xbf16, #tpu.memory_space<vmem>>, vector<8x8xbf16>,
    %140 = vector.extract_strided_slice %12 {offsets = [0, 24], sizes = [8, 8], strides = [1, 1]} : vector<8x32xbf16> to vector<8x8xbf16>
    %141 = vector.extract_strided_slice %19 {offsets = [0, 24], sizes = [8, 8], strides = [1, 1]} : vector<8x32xbf16> to vector<8x8xbf16>
    %142 = vector.extract_strided_slice %26 {offsets = [0, 24], sizes = [8, 8], strides = [1, 1]} : vector<8x32xbf16> to vector<8x8xbf16>
    %143 = vector.extract_strided_slice %27 {offsets = [0, 24], sizes = [32, 8], strides = [1, 1]} : vector<32x32xbf16> to vector<32x8xbf16>
    %144 = vector.extract_strided_slice %28 {offsets = [0, 24], sizes = [32, 8], strides = [1, 1]} : vector<32x32xbf16> to vector<32x8xbf16>
    %cst_56 = arith.constant dense<0.000000e+00> : vector<8x8xf32>
    %145 = tpu.matmul %140, %141, %cst_56 {dimension_numbers = #tpu.dot_dimension_numbers<[1], [1], [0], [0], [0, 0, 1, 0], [], []>} : vector<8x8xbf16>, vector<8x8xbf16>, vector<8x8xf32> -> vector<8x8xf32>
    %cst_57 = arith.constant dense<0.000000e+00> : vector<8x32xf32>
    %146 = tpu.matmul %140, %143, %cst_57 {dimension_numbers = #tpu.dot_dimension_numbers<[1], [1], [0], [0], [0, 0, 1, 0], [], []>} : vector<8x8xbf16>, vector<32x8xbf16>, vector<8x32xf32> -> vector<8x32xf32>
    %147 = vector.broadcast %34 : vector<1x32xf32> to vector<8x32xf32>
    %148 = arith.addf %146, %147 : vector<8x32xf32>
    %cst_58 = arith.constant dense<0xFF800000> : vector<8xf32>
    %149 = vector.multi_reduction <maximumf>, %145, %cst_58 [1] : vector<8x8xf32> to vector<8xf32>
    %150 = vector.shape_cast %149 : vector<8xf32> to vector<8x1xf32>
    %cst_59 = arith.constant dense<0xFF800000> : vector<8xf32>
    %151 = vector.multi_reduction <maximumf>, %148, %cst_59 [1] : vector<8x32xf32> to vector<8xf32>
    %152 = vector.shape_cast %151 : vector<8xf32> to vector<8x1xf32>
    %153 = arith.maximumf %150, %152 : vector<8x1xf32>
    %154 = vector.broadcast %153 : vector<8x1xf32> to vector<8x8xf32>
    %155 = arith.subf %145, %154 : vector<8x8xf32>
    %156 = math.exp %155 : vector<8x8xf32>
    %157 = vector.broadcast %153 : vector<8x1xf32> to vector<8x32xf32>
    %158 = arith.subf %148, %157 : vector<8x32xf32>
    %159 = math.exp %158 : vector<8x32xf32>
    %cst_60 = arith.constant dense<0.000000e+00> : vector<8xf32>
    %160 = vector.multi_reduction <add>, %156, %cst_60 [1] : vector<8x8xf32> to vector<8xf32>
    %161 = vector.shape_cast %160 : vector<8xf32> to vector<8x1xf32>
    %cst_61 = arith.constant dense<0.000000e+00> : vector<8xf32>
    %162 = vector.multi_reduction <add>, %159, %cst_61 [1] : vector<8x32xf32> to vector<8xf32>
    %163 = vector.shape_cast %162 : vector<8xf32> to vector<8x1xf32>
    %164 = arith.addf %161, %163 : vector<8x1xf32>
    %165 = tpu.reciprocal %164 : vector<8x1xf32> -> vector<8x1xf32>
    %166 = arith.truncf %156 : vector<8x8xf32> to vector<8x8xbf16>
    %cst_62 = arith.constant dense<0.000000e+00> : vector<8x8xf32>
    %167 = tpu.matmul %166, %142, %cst_62 {dimension_numbers = #tpu.dot_dimension_numbers<[1], [0], [0], [1], [0, 0, 1, 1], [], []>} : vector<8x8xbf16>, vector<8x8xbf16>, vector<8x8xf32> -> vector<8x8xf32>
    %168 = arith.truncf %159 : vector<8x32xf32> to vector<8x32xbf16>
    %cst_63 = arith.constant dense<0.000000e+00> : vector<8x8xf32>
    %169 = tpu.matmul %168, %144, %cst_63 {dimension_numbers = #tpu.dot_dimension_numbers<[1], [0], [0], [1], [0, 0, 1, 1], [], []>} : vector<8x32xbf16>, vector<32x8xbf16>, vector<8x8xf32> -> vector<8x8xf32>
    %170 = arith.addf %167, %169 : vector<8x8xf32>
    %171 = vector.broadcast %165 : vector<8x1xf32> to vector<8x8xf32>
    %172 = arith.mulf %170, %171 : vector<8x8xf32>
    %173 = arith.truncf %172 : vector<8x8xf32> to vector<8x8xbf16>
    %c0_64 = arith.constant 0 : index
    %c24 = arith.constant 24 : index
    %174 = vector.load %arg17[%c0_64, %c24] : memref<8x32xbf16, #tpu.memory_space<vmem>>, vector<8x8xbf16>
    tpu.vector_store %arg17[%c0_64, %c24], %173 {strides = array<i32>} : memref<8x32xbf16, #tpu.memory_space<vmem>>, vector<8x8xbf16>,
    %c0_65 = arith.constant 0 : index
    %c0_66 = arith.constant 0 : index
    %175 = vector.load %arg17[%c0_65, %c0_66] : memref<8x32xbf16, #tpu.memory_space<vmem>>, vector<8x32xbf16>
    %c0_67 = arith.constant 0 : index
    %c0_68 = arith.constant 0 : index
    %176 = vector.load %arg12[%c0_67, %c0_68] : memref<32x32xbf16, #tpu.memory_space<vmem>>, vector<32x32xbf16>
    %cst_69 = arith.constant dense<0.000000e+00> : vector<8x32xf32>
    %177 = tpu.matmul %175, %176, %cst_69 {dimension_numbers = #tpu.dot_dimension_numbers<[1], [0], [0], [1], [0, 0, 1, 1], [], []>} : vector<8x32xbf16>, vector<32x32xbf16>, vector<8x32xf32> -> vector<8x32xf32>
    %c0_70 = arith.constant 0 : index
    %c0_71 = arith.constant 0 : index
    %178 = vector.load %arg13[%c0_70, %c0_71] : memref<1x32xf32, #tpu.memory_space<vmem>>, vector<1x32xf32>
    %179 = vector.broadcast %178 : vector<1x32xf32> to vector<8x32xf32>
    %180 = arith.addf %177, %179 : vector<8x32xf32>
    %181 = arith.addf %1, %180 : vector<8x32xf32>
    %cst_72 = arith.constant dense<0.000000e+00> : vector<8xf32>
    %182 = vector.multi_reduction <add>, %181, %cst_72 [1] : vector<8x32xf32> to vector<8xf32>
    %183 = vector.shape_cast %182 : vector<8xf32> to vector<8x1xf32>
    %cst_73 = arith.constant 3.200000e+01 : f32
    %184 = vector.broadcast %cst_73 : f32 to vector<8x1xf32>
    %185 = arith.divf %183, %184 : vector<8x1xf32>
    %186 = vector.broadcast %185 : vector<8x1xf32> to vector<8x32xf32>
    %187 = arith.subf %181, %186 : vector<8x32xf32>
    %188 = vector.broadcast %185 : vector<8x1xf32> to vector<8x32xf32>
    %189 = arith.subf %181, %188 : vector<8x32xf32>
    %190 = arith.mulf %187, %189 : vector<8x32xf32>
    %cst_74 = arith.constant dense<0.000000e+00> : vector<8xf32>
    %191 = vector.multi_reduction <add>, %190, %cst_74 [1] : vector<8x32xf32> to vector<8xf32>
    %192 = vector.shape_cast %191 : vector<8xf32> to vector<8x1xf32>
    %cst_75 = arith.constant 3.200000e+01 : f32
    %193 = vector.broadcast %cst_75 : f32 to vector<8x1xf32>
    %194 = arith.divf %192, %193 : vector<8x1xf32>
    %195 = vector.broadcast %185 : vector<8x1xf32> to vector<8x32xf32>
    %196 = arith.subf %181, %195 : vector<8x32xf32>
    %cst_76 = arith.constant 9.99999974E-6 : f32
    %197 = vector.broadcast %cst_76 : f32 to vector<8x1xf32>
    %198 = arith.addf %194, %197 : vector<8x1xf32>
    %199 = math.rsqrt %198 : vector<8x1xf32>
    %200 = vector.broadcast %199 : vector<8x1xf32> to vector<8x32xf32>
    %201 = arith.mulf %196, %200 : vector<8x32xf32>
    %c0_77 = arith.constant 0 : index
    %c0_78 = arith.constant 0 : index
    %202 = vector.load %arg14[%c0_77, %c0_78] : memref<1x32xf32, #tpu.memory_space<vmem>>, vector<1x32xf32>
    %203 = vector.broadcast %202 : vector<1x32xf32> to vector<8x32xf32>
    %204 = arith.mulf %201, %203 : vector<8x32xf32>
    %c0_79 = arith.constant 0 : index
    %c0_80 = arith.constant 0 : index
    %205 = vector.load %arg15[%c0_79, %c0_80] : memref<1x32xf32, #tpu.memory_space<vmem>>, vector<1x32xf32>
    %206 = vector.broadcast %205 : vector<1x32xf32> to vector<8x32xf32>
    %207 = arith.addf %204, %206 : vector<8x32xf32>
    %208 = vector.shape_cast %207 : vector<8x32xf32> to vector<1x8x32xf32>
    %c0_81 = arith.constant 0 : index
    %c0_82 = arith.constant 0 : index
    %c0_83 = arith.constant 0 : index
    %209 = vector.load %arg16[%c0_81, %c0_82, %c0_83] : memref<1x8x32xf32, #tpu.memory_space<vmem>>, vector<1x8x32xf32>
    tpu.vector_store %arg16[%c0_81, %c0_82, %c0_83], %208 {strides = array<i32>} : memref<1x8x32xf32, #tpu.memory_space<vmem>>, vector<1x8x32xf32>,
    return
  }
  func.func @transform_0(%arg0: i32) -> (i32, i32, i32) {
    %c0_i32 = arith.constant 0 : i32
    %c0_i32_0 = arith.constant 0 : i32
    %c0_i32_1 = arith.constant 0 : i32
    return %arg0, %c0_i32, %c0_i32_0 : i32, i32, i32
  }
  func.func @transform_1(%arg0: i32) -> (i32, i32, i32) {
    %c0_i32 = arith.constant 0 : i32
    %c0_i32_0 = arith.constant 0 : i32
    %c0_i32_1 = arith.constant 0 : i32
    return %arg0, %c0_i32, %c0_i32_0 : i32, i32, i32
  }
  func.func @transform_2(%arg0: i32) -> (i32, i32, i32) {
    %c0_i32 = arith.constant 0 : i32
    %c0_i32_0 = arith.constant 0 : i32
    %c0_i32_1 = arith.constant 0 : i32
    return %arg0, %c0_i32, %c0_i32_0 : i32, i32, i32
  }
  func.func @transform_3(%arg0: i32) -> (i32, i32) {
    %c0_i32 = arith.constant 0 : i32
    %c0_i32_0 = arith.constant 0 : i32
    %c0_i32_1 = arith.constant 0 : i32
    return %c0_i32, %c0_i32_0 : i32, i32
  }
  func.func @transform_4(%arg0: i32) -> (i32, i32) {
    %c0_i32 = arith.constant 0 : i32
    %c0_i32_0 = arith.constant 0 : i32
    %c0_i32_1 = arith.constant 0 : i32
    return %c0_i32, %c0_i32_0 : i32, i32
  }
  func.func @transform_5(%arg0: i32) -> (i32, i32) {
    %c0_i32 = arith.constant 0 : i32
    %c0_i32_0 = arith.constant 0 : i32
    %c0_i32_1 = arith.constant 0 : i32
    return %c0_i32, %c0_i32_0 : i32, i32
  }
  func.func @transform_6(%arg0: i32) -> (i32, i32) {
    %c0_i32 = arith.constant 0 : i32
    %c0_i32_0 = arith.constant 0 : i32
    %c0_i32_1 = arith.constant 0 : i32
    return %c0_i32, %c0_i32_0 : i32, i32
  }
  func.func @transform_7(%arg0: i32) -> (i32, i32) {
    %c0_i32 = arith.constant 0 : i32
    %c0_i32_0 = arith.constant 0 : i32
    %c0_i32_1 = arith.constant 0 : i32
    return %c0_i32, %c0_i32_0 : i32, i32
  }
  func.func @transform_8(%arg0: i32) -> (i32, i32) {
    %c0_i32 = arith.constant 0 : i32
    %c0_i32_0 = arith.constant 0 : i32
    %c0_i32_1 = arith.constant 0 : i32
    return %c0_i32, %c0_i32_0 : i32, i32
  }
  func.func @transform_9(%arg0: i32) -> (i32, i32) {
    %c0_i32 = arith.constant 0 : i32
    %c0_i32_0 = arith.constant 0 : i32
    %c0_i32_1 = arith.constant 0 : i32
    return %c0_i32, %c0_i32_0 : i32, i32
  }
  func.func @transform_10(%arg0: i32) -> (i32, i32) {
    %c0_i32 = arith.constant 0 : i32
    %c0_i32_0 = arith.constant 0 : i32
    %c0_i32_1 = arith.constant 0 : i32
    return %c0_i32, %c0_i32_0 : i32, i32
  }
  func.func @transform_11(%arg0: i32) -> (i32, i32) {
    %c0_i32 = arith.constant 0 : i32
    %c0_i32_0 = arith.constant 0 : i32
    %c0_i32_1 = arith.constant 0 : i32
    return %c0_i32, %c0_i32_0 : i32, i32
  }
  func.func @transform_12(%arg0: i32) -> (i32, i32) {
    %c0_i32 = arith.constant 0 : i32
    %c0_i32_0 = arith.constant 0 : i32
    %c0_i32_1 = arith.constant 0 : i32
    return %c0_i32, %c0_i32_0 : i32, i32
  }
  func.func @transform_13(%arg0: i32) -> (i32, i32) {
    %c0_i32 = arith.constant 0 : i32
    %c0_i32_0 = arith.constant 0 : i32
    %c0_i32_1 = arith.constant 0 : i32
    return %c0_i32, %c0_i32_0 : i32, i32
  }
  func.func @transform_14(%arg0: i32) -> (i32, i32) {
    %c0_i32 = arith.constant 0 : i32
    %c0_i32_0 = arith.constant 0 : i32
    %c0_i32_1 = arith.constant 0 : i32
    return %c0_i32, %c0_i32_0 : i32, i32
  }
  func.func @transform_15(%arg0: i32) -> (i32, i32, i32) {
    %c0_i32 = arith.constant 0 : i32
    %c0_i32_0 = arith.constant 0 : i32
    %c0_i32_1 = arith.constant 0 : i32
    return %arg0, %c0_i32, %c0_i32_0 : i32, i32, i32
  }
}

module attributes {stable_mosaic.version = 11 : i64} {
  func.func @_mha2_fused_kernel(%arg0: i32, %arg1: memref<1x8x32xf32, #tpu.memory_space<vmem>>, %arg2: memref<1x8x32xf32, #tpu.memory_space<vmem>>, %arg3: memref<1x8x32xf32, #tpu.memory_space<vmem>>, %arg4: memref<32x32xbf16, #tpu.memory_space<vmem>>, %arg5: memref<1x32xf32, #tpu.memory_space<vmem>>, %arg6: memref<32x32xbf16, #tpu.memory_space<vmem>>, %arg7: memref<1x32xf32, #tpu.memory_space<vmem>>, %arg8: memref<32x32xbf16, #tpu.memory_space<vmem>>, %arg9: memref<1x32xf32, #tpu.memory_space<vmem>>, %arg10: memref<32x32xbf16, #tpu.memory_space<vmem>>, %arg11: memref<32x32xbf16, #tpu.memory_space<vmem>>, %arg12: memref<32x32xbf16, #tpu.memory_space<vmem>>, %arg13: memref<1x32xf32, #tpu.memory_space<vmem>>, %arg14: memref<1x32xf32, #tpu.memory_space<vmem>>, %arg15: memref<1x32xf32, #tpu.memory_space<vmem>>, %arg16: memref<1x8x32xf32, #tpu.memory_space<vmem>>, %arg17: memref<8x32xbf16, #tpu.memory_space<vmem>>) attributes {dimension_semantics = [#tpu.dimension_semantics<parallel>], iteration_bounds = array<i64: 2>, scalar_prefetch = 0 : i64, scratch_operands = 1 : i64, tpu.core_type = #tpu.core_type<tc>, window_params = [{transform_indices = @transform_0, window_bounds = array<i64: 1, 8, 32>}, {transform_indices = @transform_1, window_bounds = array<i64: 1, 8, 32>}, {transform_indices = @transform_2, window_bounds = array<i64: 1, 8, 32>}, {pipeline_mode = #tpu.pipeline_mode<synchronous>, transform_indices = @transform_3, window_bounds = array<i64: 32, 32>}, {pipeline_mode = #tpu.pipeline_mode<synchronous>, transform_indices = @transform_4, window_bounds = array<i64: 1, 32>}, {pipeline_mode = #tpu.pipeline_mode<synchronous>, transform_indices = @transform_5, window_bounds = array<i64: 32, 32>}, {pipeline_mode = #tpu.pipeline_mode<synchronous>, transform_indices = @transform_6, window_bounds = array<i64: 1, 32>}, {pipeline_mode = #tpu.pipeline_mode<synchronous>, transform_indices = @transform_7, window_bounds = array<i64: 32, 32>}, {pipeline_mode = #tpu.pipeline_mode<synchronous>, transform_indices = @transform_8, window_bounds = array<i64: 1, 32>}, {pipeline_mode = #tpu.pipeline_mode<synchronous>, transform_indices = @transform_9, window_bounds = array<i64: 32, 32>}, {pipeline_mode = #tpu.pipeline_mode<synchronous>, transform_indices = @transform_10, window_bounds = array<i64: 32, 32>}, {pipeline_mode = #tpu.pipeline_mode<synchronous>, transform_indices = @transform_11, window_bounds = array<i64: 32, 32>}, {pipeline_mode = #tpu.pipeline_mode<synchronous>, transform_indices = @transform_12, window_bounds = array<i64: 1, 32>}, {pipeline_mode = #tpu.pipeline_mode<synchronous>, transform_indices = @transform_13, window_bounds = array<i64: 1, 32>}, {pipeline_mode = #tpu.pipeline_mode<synchronous>, transform_indices = @transform_14, window_bounds = array<i64: 1, 32>}, {transform_indices = @transform_15, window_bounds = array<i64: 1, 8, 32>}]} {
    %c0 = arith.constant 0 : index
    %c0_0 = arith.constant 0 : index
    %c0_1 = arith.constant 0 : index
    %0 = vector.load %arg1[%c0, %c0_0, %c0_1] : memref<1x8x32xf32, #tpu.memory_space<vmem>>, vector<1x8x32xf32>
    %1 = vector.shape_cast %0 : vector<1x8x32xf32> to vector<8x32xf32>
    %c0_2 = arith.constant 0 : index
    %c0_3 = arith.constant 0 : index
    %c0_4 = arith.constant 0 : index
    %2 = vector.load %arg2[%c0_2, %c0_3, %c0_4] : memref<1x8x32xf32, #tpu.memory_space<vmem>>, vector<1x8x32xf32>
    %3 = vector.shape_cast %2 : vector<1x8x32xf32> to vector<8x32xf32>
    %c0_5 = arith.constant 0 : index
    %c0_6 = arith.constant 0 : index
    %c0_7 = arith.constant 0 : index
    %4 = vector.load %arg3[%c0_5, %c0_6, %c0_7] : memref<1x8x32xf32, #tpu.memory_space<vmem>>, vector<1x8x32xf32>
    %5 = vector.shape_cast %4 : vector<1x8x32xf32> to vector<8x32xf32>
    %6 = arith.truncf %1 : vector<8x32xf32> to vector<8x32xbf16>
    %c0_8 = arith.constant 0 : index
    %c0_9 = arith.constant 0 : index
    %7 = vector.load %arg4[%c0_8, %c0_9] : memref<32x32xbf16, #tpu.memory_space<vmem>>, vector<32x32xbf16>
    %cst = arith.constant dense<0.000000e+00> : vector<8x32xf32>
    %8 = tpu.matmul %6, %7, %cst {dimension_numbers = #tpu.dot_dimension_numbers<[1], [0], [0], [1], [0, 0, 1, 1], [], []>} : vector<8x32xbf16>, vector<32x32xbf16>, vector<8x32xf32> -> vector<8x32xf32>
    %c0_10 = arith.constant 0 : index
    %c0_11 = arith.constant 0 : index
    %9 = vector.load %arg5[%c0_10, %c0_11] : memref<1x32xf32, #tpu.memory_space<vmem>>, vector<1x32xf32>
    %10 = vector.broadcast %9 : vector<1x32xf32> to vector<8x32xf32>
    %11 = arith.addf %8, %10 : vector<8x32xf32>
    %12 = arith.truncf %11 : vector<8x32xf32> to vector<8x32xbf16>
    %13 = arith.truncf %3 : vector<8x32xf32> to vector<8x32xbf16>
    %c0_12 = arith.constant 0 : index
    %c0_13 = arith.constant 0 : index
    %14 = vector.load %arg6[%c0_12, %c0_13] : memref<32x32xbf16, #tpu.memory_space<vmem>>, vector<32x32xbf16>
    %cst_14 = arith.constant dense<0.000000e+00> : vector<8x32xf32>
    %15 = tpu.matmul %13, %14, %cst_14 {dimension_numbers = #tpu.dot_dimension_numbers<[1], [0], [0], [1], [0, 0, 1, 1], [], []>} : vector<8x32xbf16>, vector<32x32xbf16>, vector<8x32xf32> -> vector<8x32xf32>
    %c0_15 = arith.constant 0 : index
    %c0_16 = arith.constant 0 : index
    %16 = vector.load %arg7[%c0_15, %c0_16] : memref<1x32xf32, #tpu.memory_space<vmem>>, vector<1x32xf32>
    %17 = vector.broadcast %16 : vector<1x32xf32> to vector<8x32xf32>
    %18 = arith.addf %15, %17 : vector<8x32xf32>
    %19 = arith.truncf %18 : vector<8x32xf32> to vector<8x32xbf16>
    %20 = arith.truncf %5 : vector<8x32xf32> to vector<8x32xbf16>
    %c0_17 = arith.constant 0 : index
    %c0_18 = arith.constant 0 : index
    %21 = vector.load %arg8[%c0_17, %c0_18] : memref<32x32xbf16, #tpu.memory_space<vmem>>, vector<32x32xbf16>
    %cst_19 = arith.constant dense<0.000000e+00> : vector<8x32xf32>
    %22 = tpu.matmul %20, %21, %cst_19 {dimension_numbers = #tpu.dot_dimension_numbers<[1], [0], [0], [1], [0, 0, 1, 1], [], []>} : vector<8x32xbf16>, vector<32x32xbf16>, vector<8x32xf32> -> vector<8x32xf32>
    %c0_20 = arith.constant 0 : index
    %c0_21 = arith.constant 0 : index
    %23 = vector.load %arg9[%c0_20, %c0_21] : memref<1x32xf32, #tpu.memory_space<vmem>>, vector<1x32xf32>
    %24 = vector.broadcast %23 : vector<1x32xf32> to vector<8x32xf32>
    %25 = arith.addf %22, %24 : vector<8x32xf32>
    %26 = arith.truncf %25 : vector<8x32xf32> to vector<8x32xbf16>
    %c0_22 = arith.constant 0 : index
    %c0_23 = arith.constant 0 : index
    %27 = vector.load %arg10[%c0_22, %c0_23] : memref<32x32xbf16, #tpu.memory_space<vmem>>, vector<32x32xbf16>
    %c0_24 = arith.constant 0 : index
    %c0_25 = arith.constant 0 : index
    %28 = vector.load %arg11[%c0_24, %c0_25] : memref<32x32xbf16, #tpu.memory_space<vmem>>, vector<32x32xbf16>
    %29 = tpu.iota {dimensions = array<i32: 1>} : vector<1x32xi32>
    %c30_i32 = arith.constant 30 : i32
    %30 = vector.broadcast %c30_i32 : i32 to vector<1x32xi32>
    %31 = arith.cmpi slt, %29, %30 : vector<1x32xi32>
    %cst_26 = arith.constant 0.000000e+00 : f32
    %cst_27 = arith.constant -1.000000e+30 : f32
    %32 = vector.broadcast %cst_26 : f32 to vector<1x32xf32>
    %33 = vector.broadcast %cst_27 : f32 to vector<1x32xf32>
    %34 = arith.select %31, %32, %33 : vector<1x32xi1>, vector<1x32xf32>
    %35 = vector.extract_strided_slice %12 {offsets = [0, 0], sizes = [8, 8], strides = [1, 1]} : vector<8x32xbf16> to vector<8x8xbf16>
    %36 = vector.extract_strided_slice %19 {offsets = [0, 0], sizes = [8, 8], strides = [1, 1]} : vector<8x32xbf16> to vector<8x8xbf16>
    %37 = vector.extract_strided_slice %26 {offsets = [0, 0], sizes = [8, 8], strides = [1, 1]} : vector<8x32xbf16> to vector<8x8xbf16>
    %38 = vector.extract_strided_slice %27 {offsets = [0, 0], sizes = [32, 8], strides = [1, 1]} : vector<32x32xbf16> to vector<32x8xbf16>
    %39 = vector.extract_strided_slice %28 {offsets = [0, 0], sizes = [32, 8], strides = [1, 1]} : vector<32x32xbf16> to vector<32x8xbf16>
    %cst_28 = arith.constant dense<0.000000e+00> : vector<8x8xf32>
    %40 = tpu.matmul %35, %36, %cst_28 {dimension_numbers = #tpu.dot_dimension_numbers<[1], [1], [0], [0], [0, 0, 1, 0], [], []>} : vector<8x8xbf16>, vector<8x8xbf16>, vector<8x8xf32> -> vector<8x8xf32>
    %cst_29 = arith.constant dense<0.000000e+00> : vector<8x32xf32>
    %41 = tpu.matmul %35, %38, %cst_29 {dimension_numbers = #tpu.dot_dimension_numbers<[1], [1], [0], [0], [0, 0, 1, 0], [], []>} : vector<8x8xbf16>, vector<32x8xbf16>, vector<8x32xf32> -> vector<8x32xf32>
    %42 = vector.broadcast %34 : vector<1x32xf32> to vector<8x32xf32>
    %43 = arith.addf %41, %42 : vector<8x32xf32>
    %cst_30 = arith.constant dense<0xFF800000> : vector<8xf32>
    %44 = vector.multi_reduction <maximumf>, %40, %cst_30 [1] : vector<8x8xf32> to vector<8xf32>
    %45 = vector.shape_cast %44 : vector<8xf32> to vector<8x1xf32>
    %cst_31 = arith.constant dense<0xFF800000> : vector<8xf32>
    %46 = vector.multi_reduction <maximumf>, %43, %cst_31 [1] : vector<8x32xf32> to vector<8xf32>
    %47 = vector.shape_cast %46 : vector<8xf32> to vector<8x1xf32>
    %48 = arith.maximumf %45, %47 : vector<8x1xf32>
    %49 = vector.broadcast %48 : vector<8x1xf32> to vector<8x8xf32>
    %50 = arith.subf %40, %49 : vector<8x8xf32>
    %51 = math.exp %50 : vector<8x8xf32>
    %52 = vector.broadcast %48 : vector<8x1xf32> to vector<8x32xf32>
    %53 = arith.subf %43, %52 : vector<8x32xf32>
    %54 = math.exp %53 : vector<8x32xf32>
    %cst_32 = arith.constant dense<0.000000e+00> : vector<8xf32>
    %55 = vector.multi_reduction <add>, %51, %cst_32 [1] : vector<8x8xf32> to vector<8xf32>
    %56 = vector.shape_cast %55 : vector<8xf32> to vector<8x1xf32>
    %cst_33 = arith.constant dense<0.000000e+00> : vector<8xf32>
    %57 = vector.multi_reduction <add>, %54, %cst_33 [1] : vector<8x32xf32> to vector<8xf32>
    %58 = vector.shape_cast %57 : vector<8xf32> to vector<8x1xf32>
    %59 = arith.addf %56, %58 : vector<8x1xf32>
    %60 = tpu.reciprocal %59 : vector<8x1xf32> -> vector<8x1xf32>
    %61 = arith.truncf %51 : vector<8x8xf32> to vector<8x8xbf16>
    %cst_34 = arith.constant dense<0.000000e+00> : vector<8x8xf32>
    %62 = tpu.matmul %61, %37, %cst_34 {dimension_numbers = #tpu.dot_dimension_numbers<[1], [0], [0], [1], [0, 0, 1, 1], [], []>} : vector<8x8xbf16>, vector<8x8xbf16>, vector<8x8xf32> -> vector<8x8xf32>
    %63 = arith.truncf %54 : vector<8x32xf32> to vector<8x32xbf16>
    %cst_35 = arith.constant dense<0.000000e+00> : vector<8x8xf32>
    %64 = tpu.matmul %63, %39, %cst_35 {dimension_numbers = #tpu.dot_dimension_numbers<[1], [0], [0], [1], [0, 0, 1, 1], [], []>} : vector<8x32xbf16>, vector<32x8xbf16>, vector<8x8xf32> -> vector<8x8xf32>
    %65 = arith.addf %62, %64 : vector<8x8xf32>
    %66 = vector.broadcast %60 : vector<8x1xf32> to vector<8x8xf32>
    %67 = arith.mulf %65, %66 : vector<8x8xf32>
    %68 = arith.truncf %67 : vector<8x8xf32> to vector<8x8xbf16>
    %c0_36 = arith.constant 0 : index
    %c0_37 = arith.constant 0 : index
    %69 = vector.load %arg17[%c0_36, %c0_37] : memref<8x32xbf16, #tpu.memory_space<vmem>>, vector<8x8xbf16>
    tpu.vector_store %arg17[%c0_36, %c0_37], %68 {strides = array<i32>} : memref<8x32xbf16, #tpu.memory_space<vmem>>, vector<8x8xbf16>,
    %70 = vector.extract_strided_slice %12 {offsets = [0, 8], sizes = [8, 8], strides = [1, 1]} : vector<8x32xbf16> to vector<8x8xbf16>
    %71 = vector.extract_strided_slice %19 {offsets = [0, 8], sizes = [8, 8], strides = [1, 1]} : vector<8x32xbf16> to vector<8x8xbf16>
    %72 = vector.extract_strided_slice %26 {offsets = [0, 8], sizes = [8, 8], strides = [1, 1]} : vector<8x32xbf16> to vector<8x8xbf16>
    %73 = vector.extract_strided_slice %27 {offsets = [0, 8], sizes = [32, 8], strides = [1, 1]} : vector<32x32xbf16> to vector<32x8xbf16>
    %74 = vector.extract_strided_slice %28 {offsets = [0, 8], sizes = [32, 8], strides = [1, 1]} : vector<32x32xbf16> to vector<32x8xbf16>
    %cst_38 = arith.constant dense<0.000000e+00> : vector<8x8xf32>
    %75 = tpu.matmul %70, %71, %cst_38 {dimension_numbers = #tpu.dot_dimension_numbers<[1], [1], [0], [0], [0, 0, 1, 0], [], []>} : vector<8x8xbf16>, vector<8x8xbf16>, vector<8x8xf32> -> vector<8x8xf32>
    %cst_39 = arith.constant dense<0.000000e+00> : vector<8x32xf32>
    %76 = tpu.matmul %70, %73, %cst_39 {dimension_numbers = #tpu.dot_dimension_numbers<[1], [1], [0], [0], [0, 0, 1, 0], [], []>} : vector<8x8xbf16>, vector<32x8xbf16>, vector<8x32xf32> -> vector<8x32xf32>
    %77 = vector.broadcast %34 : vector<1x32xf32> to vector<8x32xf32>
    %78 = arith.addf %76, %77 : vector<8x32xf32>
    %cst_40 = arith.constant dense<0xFF800000> : vector<8xf32>
    %79 = vector.multi_reduction <maximumf>, %75, %cst_40 [1] : vector<8x8xf32> to vector<8xf32>
    %80 = vector.shape_cast %79 : vector<8xf32> to vector<8x1xf32>
    %cst_41 = arith.constant dense<0xFF800000> : vector<8xf32>
    %81 = vector.multi_reduction <maximumf>, %78, %cst_41 [1] : vector<8x32xf32> to vector<8xf32>
    %82 = vector.shape_cast %81 : vector<8xf32> to vector<8x1xf32>
    %83 = arith.maximumf %80, %82 : vector<8x1xf32>
    %84 = vector.broadcast %83 : vector<8x1xf32> to vector<8x8xf32>
    %85 = arith.subf %75, %84 : vector<8x8xf32>
    %86 = math.exp %85 : vector<8x8xf32>
    %87 = vector.broadcast %83 : vector<8x1xf32> to vector<8x32xf32>
    %88 = arith.subf %78, %87 : vector<8x32xf32>
    %89 = math.exp %88 : vector<8x32xf32>
    %cst_42 = arith.constant dense<0.000000e+00> : vector<8xf32>
    %90 = vector.multi_reduction <add>, %86, %cst_42 [1] : vector<8x8xf32> to vector<8xf32>
    %91 = vector.shape_cast %90 : vector<8xf32> to vector<8x1xf32>
    %cst_43 = arith.constant dense<0.000000e+00> : vector<8xf32>
    %92 = vector.multi_reduction <add>, %89, %cst_43 [1] : vector<8x32xf32> to vector<8xf32>
    %93 = vector.shape_cast %92 : vector<8xf32> to vector<8x1xf32>
    %94 = arith.addf %91, %93 : vector<8x1xf32>
    %95 = tpu.reciprocal %94 : vector<8x1xf32> -> vector<8x1xf32>
    %96 = arith.truncf %86 : vector<8x8xf32> to vector<8x8xbf16>
    %cst_44 = arith.constant dense<0.000000e+00> : vector<8x8xf32>
    %97 = tpu.matmul %96, %72, %cst_44 {dimension_numbers = #tpu.dot_dimension_numbers<[1], [0], [0], [1], [0, 0, 1, 1], [], []>} : vector<8x8xbf16>, vector<8x8xbf16>, vector<8x8xf32> -> vector<8x8xf32>
    %98 = arith.truncf %89 : vector<8x32xf32> to vector<8x32xbf16>
    %cst_45 = arith.constant dense<0.000000e+00> : vector<8x8xf32>
    %99 = tpu.matmul %98, %74, %cst_45 {dimension_numbers = #tpu.dot_dimension_numbers<[1], [0], [0], [1], [0, 0, 1, 1], [], []>} : vector<8x32xbf16>, vector<32x8xbf16>, vector<8x8xf32> -> vector<8x8xf32>
    %100 = arith.addf %97, %99 : vector<8x8xf32>
    %101 = vector.broadcast %95 : vector<8x1xf32> to vector<8x8xf32>
    %102 = arith.mulf %100, %101 : vector<8x8xf32>
    %103 = arith.truncf %102 : vector<8x8xf32> to vector<8x8xbf16>
    %c0_46 = arith.constant 0 : index
    %c8 = arith.constant 8 : index
    %104 = vector.load %arg17[%c0_46, %c8] : memref<8x32xbf16, #tpu.memory_space<vmem>>, vector<8x8xbf16>
    tpu.vector_store %arg17[%c0_46, %c8], %103 {strides = array<i32>} : memref<8x32xbf16, #tpu.memory_space<vmem>>, vector<8x8xbf16>,
    %105 = vector.extract_strided_slice %12 {offsets = [0, 16], sizes = [8, 8], strides = [1, 1]} : vector<8x32xbf16> to vector<8x8xbf16>
    %106 = vector.extract_strided_slice %19 {offsets = [0, 16], sizes = [8, 8], strides = [1, 1]} : vector<8x32xbf16> to vector<8x8xbf16>
    %107 = vector.extract_strided_slice %26 {offsets = [0, 16], sizes = [8, 8], strides = [1, 1]} : vector<8x32xbf16> to vector<8x8xbf16>
    %108 = vector.extract_strided_slice %27 {offsets = [0, 16], sizes = [32, 8], strides = [1, 1]} : vector<32x32xbf16> to vector<32x8xbf16>
    %109 = vector.extract_strided_slice %28 {offsets = [0, 16], sizes = [32, 8], strides = [1, 1]} : vector<32x32xbf16> to vector<32x8xbf16>
    %cst_47 = arith.constant dense<0.000000e+00> : vector<8x8xf32>
    %110 = tpu.matmul %105, %106, %cst_47 {dimension_numbers = #tpu.dot_dimension_numbers<[1], [1], [0], [0], [0, 0, 1, 0], [], []>} : vector<8x8xbf16>, vector<8x8xbf16>, vector<8x8xf32> -> vector<8x8xf32>
    %cst_48 = arith.constant dense<0.000000e+00> : vector<8x32xf32>
    %111 = tpu.matmul %105, %108, %cst_48 {dimension_numbers = #tpu.dot_dimension_numbers<[1], [1], [0], [0], [0, 0, 1, 0], [], []>} : vector<8x8xbf16>, vector<32x8xbf16>, vector<8x32xf32> -> vector<8x32xf32>
    %112 = vector.broadcast %34 : vector<1x32xf32> to vector<8x32xf32>
    %113 = arith.addf %111, %112 : vector<8x32xf32>
    %cst_49 = arith.constant dense<0xFF800000> : vector<8xf32>
    %114 = vector.multi_reduction <maximumf>, %110, %cst_49 [1] : vector<8x8xf32> to vector<8xf32>
    %115 = vector.shape_cast %114 : vector<8xf32> to vector<8x1xf32>
    %cst_50 = arith.constant dense<0xFF800000> : vector<8xf32>
    %116 = vector.multi_reduction <maximumf>, %113, %cst_50 [1] : vector<8x32xf32> to vector<8xf32>
    %117 = vector.shape_cast %116 : vector<8xf32> to vector<8x1xf32>
    %118 = arith.maximumf %115, %117 : vector<8x1xf32>
    %119 = vector.broadcast %118 : vector<8x1xf32> to vector<8x8xf32>
    %120 = arith.subf %110, %119 : vector<8x8xf32>
    %121 = math.exp %120 : vector<8x8xf32>
    %122 = vector.broadcast %118 : vector<8x1xf32> to vector<8x32xf32>
    %123 = arith.subf %113, %122 : vector<8x32xf32>
    %124 = math.exp %123 : vector<8x32xf32>
    %cst_51 = arith.constant dense<0.000000e+00> : vector<8xf32>
    %125 = vector.multi_reduction <add>, %121, %cst_51 [1] : vector<8x8xf32> to vector<8xf32>
    %126 = vector.shape_cast %125 : vector<8xf32> to vector<8x1xf32>
    %cst_52 = arith.constant dense<0.000000e+00> : vector<8xf32>
    %127 = vector.multi_reduction <add>, %124, %cst_52 [1] : vector<8x32xf32> to vector<8xf32>
    %128 = vector.shape_cast %127 : vector<8xf32> to vector<8x1xf32>
    %129 = arith.addf %126, %128 : vector<8x1xf32>
    %130 = tpu.reciprocal %129 : vector<8x1xf32> -> vector<8x1xf32>
    %131 = arith.truncf %121 : vector<8x8xf32> to vector<8x8xbf16>
    %cst_53 = arith.constant dense<0.000000e+00> : vector<8x8xf32>
    %132 = tpu.matmul %131, %107, %cst_53 {dimension_numbers = #tpu.dot_dimension_numbers<[1], [0], [0], [1], [0, 0, 1, 1], [], []>} : vector<8x8xbf16>, vector<8x8xbf16>, vector<8x8xf32> -> vector<8x8xf32>
    %133 = arith.truncf %124 : vector<8x32xf32> to vector<8x32xbf16>
    %cst_54 = arith.constant dense<0.000000e+00> : vector<8x8xf32>
    %134 = tpu.matmul %133, %109, %cst_54 {dimension_numbers = #tpu.dot_dimension_numbers<[1], [0], [0], [1], [0, 0, 1, 1], [], []>} : vector<8x32xbf16>, vector<32x8xbf16>, vector<8x8xf32> -> vector<8x8xf32>
    %135 = arith.addf %132, %134 : vector<8x8xf32>
    %136 = vector.broadcast %130 : vector<8x1xf32> to vector<8x8xf32>
    %137 = arith.mulf %135, %136 : vector<8x8xf32>
    %138 = arith.truncf %137 : vector<8x8xf32> to vector<8x8xbf16>
    %c0_55 = arith.constant 0 : index
    %c16 = arith.constant 16 : index
    %139 = vector.load %arg17[%c0_55, %c16] : memref<8x32xbf16, #tpu.memory_space<vmem>>, vector<8x8xbf16>
    tpu.vector_store %arg17[%c0_55, %c16], %138 {strides = array<i32>} : memref<8x32xbf16, #tpu.memory_space<vmem>>, vector<8x8xbf16>,
    %140 = vector.extract_strided_slice %12 {offsets = [0, 24], sizes = [8, 8], strides = [1, 1]} : vector<8x32xbf16> to vector<8x8xbf16>
    %141 = vector.extract_strided_slice %19 {offsets = [0, 24], sizes = [8, 8], strides = [1, 1]} : vector<8x32xbf16> to vector<8x8xbf16>
    %142 = vector.extract_strided_slice %26 {offsets = [0, 24], sizes = [8, 8], strides = [1, 1]} : vector<8x32xbf16> to vector<8x8xbf16>
    %143 = vector.extract_strided_slice %27 {offsets = [0, 24], sizes = [32, 8], strides = [1, 1]} : vector<32x32xbf16> to vector<32x8xbf16>
    %144 = vector.extract_strided_slice %28 {offsets = [0, 24], sizes = [32, 8], strides = [1, 1]} : vector<32x32xbf16> to vector<32x8xbf16>
    %cst_56 = arith.constant dense<0.000000e+00> : vector<8x8xf32>
    %145 = tpu.matmul %140, %141, %cst_56 {dimension_numbers = #tpu.dot_dimension_numbers<[1], [1], [0], [0], [0, 0, 1, 0], [], []>} : vector<8x8xbf16>, vector<8x8xbf16>, vector<8x8xf32> -> vector<8x8xf32>
    %cst_57 = arith.constant dense<0.000000e+00> : vector<8x32xf32>
    %146 = tpu.matmul %140, %143, %cst_57 {dimension_numbers = #tpu.dot_dimension_numbers<[1], [1], [0], [0], [0, 0, 1, 0], [], []>} : vector<8x8xbf16>, vector<32x8xbf16>, vector<8x32xf32> -> vector<8x32xf32>
    %147 = vector.broadcast %34 : vector<1x32xf32> to vector<8x32xf32>
    %148 = arith.addf %146, %147 : vector<8x32xf32>
    %cst_58 = arith.constant dense<0xFF800000> : vector<8xf32>
    %149 = vector.multi_reduction <maximumf>, %145, %cst_58 [1] : vector<8x8xf32> to vector<8xf32>
    %150 = vector.shape_cast %149 : vector<8xf32> to vector<8x1xf32>
    %cst_59 = arith.constant dense<0xFF800000> : vector<8xf32>
    %151 = vector.multi_reduction <maximumf>, %148, %cst_59 [1] : vector<8x32xf32> to vector<8xf32>
    %152 = vector.shape_cast %151 : vector<8xf32> to vector<8x1xf32>
    %153 = arith.maximumf %150, %152 : vector<8x1xf32>
    %154 = vector.broadcast %153 : vector<8x1xf32> to vector<8x8xf32>
    %155 = arith.subf %145, %154 : vector<8x8xf32>
    %156 = math.exp %155 : vector<8x8xf32>
    %157 = vector.broadcast %153 : vector<8x1xf32> to vector<8x32xf32>
    %158 = arith.subf %148, %157 : vector<8x32xf32>
    %159 = math.exp %158 : vector<8x32xf32>
    %cst_60 = arith.constant dense<0.000000e+00> : vector<8xf32>
    %160 = vector.multi_reduction <add>, %156, %cst_60 [1] : vector<8x8xf32> to vector<8xf32>
    %161 = vector.shape_cast %160 : vector<8xf32> to vector<8x1xf32>
    %cst_61 = arith.constant dense<0.000000e+00> : vector<8xf32>
    %162 = vector.multi_reduction <add>, %159, %cst_61 [1] : vector<8x32xf32> to vector<8xf32>
    %163 = vector.shape_cast %162 : vector<8xf32> to vector<8x1xf32>
    %164 = arith.addf %161, %163 : vector<8x1xf32>
    %165 = tpu.reciprocal %164 : vector<8x1xf32> -> vector<8x1xf32>
    %166 = arith.truncf %156 : vector<8x8xf32> to vector<8x8xbf16>
    %cst_62 = arith.constant dense<0.000000e+00> : vector<8x8xf32>
    %167 = tpu.matmul %166, %142, %cst_62 {dimension_numbers = #tpu.dot_dimension_numbers<[1], [0], [0], [1], [0, 0, 1, 1], [], []>} : vector<8x8xbf16>, vector<8x8xbf16>, vector<8x8xf32> -> vector<8x8xf32>
    %168 = arith.truncf %159 : vector<8x32xf32> to vector<8x32xbf16>
    %cst_63 = arith.constant dense<0.000000e+00> : vector<8x8xf32>
    %169 = tpu.matmul %168, %144, %cst_63 {dimension_numbers = #tpu.dot_dimension_numbers<[1], [0], [0], [1], [0, 0, 1, 1], [], []>} : vector<8x32xbf16>, vector<32x8xbf16>, vector<8x8xf32> -> vector<8x8xf32>
    %170 = arith.addf %167, %169 : vector<8x8xf32>
    %171 = vector.broadcast %165 : vector<8x1xf32> to vector<8x8xf32>
    %172 = arith.mulf %170, %171 : vector<8x8xf32>
    %173 = arith.truncf %172 : vector<8x8xf32> to vector<8x8xbf16>
    %c0_64 = arith.constant 0 : index
    %c24 = arith.constant 24 : index
    %174 = vector.load %arg17[%c0_64, %c24] : memref<8x32xbf16, #tpu.memory_space<vmem>>, vector<8x8xbf16>
    tpu.vector_store %arg17[%c0_64, %c24], %173 {strides = array<i32>} : memref<8x32xbf16, #tpu.memory_space<vmem>>, vector<8x8xbf16>,
    %c0_65 = arith.constant 0 : index
    %c0_66 = arith.constant 0 : index
    %175 = vector.load %arg17[%c0_65, %c0_66] : memref<8x32xbf16, #tpu.memory_space<vmem>>, vector<8x32xbf16>
    %c0_67 = arith.constant 0 : index
    %c0_68 = arith.constant 0 : index
    %176 = vector.load %arg12[%c0_67, %c0_68] : memref<32x32xbf16, #tpu.memory_space<vmem>>, vector<32x32xbf16>
    %cst_69 = arith.constant dense<0.000000e+00> : vector<8x32xf32>
    %177 = tpu.matmul %175, %176, %cst_69 {dimension_numbers = #tpu.dot_dimension_numbers<[1], [0], [0], [1], [0, 0, 1, 1], [], []>} : vector<8x32xbf16>, vector<32x32xbf16>, vector<8x32xf32> -> vector<8x32xf32>
    %c0_70 = arith.constant 0 : index
    %c0_71 = arith.constant 0 : index
    %178 = vector.load %arg13[%c0_70, %c0_71] : memref<1x32xf32, #tpu.memory_space<vmem>>, vector<1x32xf32>
    %179 = vector.broadcast %178 : vector<1x32xf32> to vector<8x32xf32>
    %180 = arith.addf %177, %179 : vector<8x32xf32>
    %181 = arith.addf %1, %180 : vector<8x32xf32>
    %cst_72 = arith.constant dense<0.000000e+00> : vector<8xf32>
    %182 = vector.multi_reduction <add>, %181, %cst_72 [1] : vector<8x32xf32> to vector<8xf32>
    %183 = vector.shape_cast %182 : vector<8xf32> to vector<8x1xf32>
    %cst_73 = arith.constant 3.200000e+01 : f32
    %184 = vector.broadcast %cst_73 : f32 to vector<8x1xf32>
    %185 = arith.divf %183, %184 : vector<8x1xf32>
    %186 = vector.broadcast %185 : vector<8x1xf32> to vector<8x32xf32>
    %187 = arith.subf %181, %186 : vector<8x32xf32>
    %188 = vector.broadcast %185 : vector<8x1xf32> to vector<8x32xf32>
    %189 = arith.subf %181, %188 : vector<8x32xf32>
    %190 = arith.mulf %187, %189 : vector<8x32xf32>
    %cst_74 = arith.constant dense<0.000000e+00> : vector<8xf32>
    %191 = vector.multi_reduction <add>, %190, %cst_74 [1] : vector<8x32xf32> to vector<8xf32>
    %192 = vector.shape_cast %191 : vector<8xf32> to vector<8x1xf32>
    %cst_75 = arith.constant 3.200000e+01 : f32
    %193 = vector.broadcast %cst_75 : f32 to vector<8x1xf32>
    %194 = arith.divf %192, %193 : vector<8x1xf32>
    %195 = vector.broadcast %185 : vector<8x1xf32> to vector<8x32xf32>
    %196 = arith.subf %181, %195 : vector<8x32xf32>
    %cst_76 = arith.constant 9.99999974E-6 : f32
    %197 = vector.broadcast %cst_76 : f32 to vector<8x1xf32>
    %198 = arith.addf %194, %197 : vector<8x1xf32>
    %199 = math.rsqrt %198 : vector<8x1xf32>
    %200 = vector.broadcast %199 : vector<8x1xf32> to vector<8x32xf32>
    %201 = arith.mulf %196, %200 : vector<8x32xf32>
    %c0_77 = arith.constant 0 : index
    %c0_78 = arith.constant 0 : index
    %202 = vector.load %arg14[%c0_77, %c0_78] : memref<1x32xf32, #tpu.memory_space<vmem>>, vector<1x32xf32>
    %203 = vector.broadcast %202 : vector<1x32xf32> to vector<8x32xf32>
    %204 = arith.mulf %201, %203 : vector<8x32xf32>
    %c0_79 = arith.constant 0 : index
    %c0_80 = arith.constant 0 : index
    %205 = vector.load %arg15[%c0_79, %c0_80] : memref<1x32xf32, #tpu.memory_space<vmem>>, vector<1x32xf32>
    %206 = vector.broadcast %205 : vector<1x32xf32> to vector<8x32xf32>
    %207 = arith.addf %204, %206 : vector<8x32xf32>
    %208 = vector.shape_cast %207 : vector<8x32xf32> to vector<1x8x32xf32>
    %c0_81 = arith.constant 0 : index
    %c0_82 = arith.constant 0 : index
    %c0_83 = arith.constant 0 : index
    %209 = vector.load %arg16[%c0_81, %c0_82, %c0_83] : memref<1x8x32xf32, #tpu.memory_space<vmem>>, vector<1x8x32xf32>
    tpu.vector_store %arg16[%c0_81, %c0_82, %c0_83], %208 {strides = array<i32>} : memref<1x8x32xf32, #tpu.memory_space<vmem>>, vector<1x8x32xf32>,
    return
  }
  func.func @transform_0(%arg0: i32) -> (i32, i32, i32) {
    %c0_i32 = arith.constant 0 : i32
    %c0_i32_0 = arith.constant 0 : i32
    %c0_i32_1 = arith.constant 0 : i32
    return %arg0, %c0_i32, %c0_i32_0 : i32, i32, i32
  }
  func.func @transform_1(%arg0: i32) -> (i32, i32, i32) {
    %c0_i32 = arith.constant 0 : i32
    %c0_i32_0 = arith.constant 0 : i32
    %c0_i32_1 = arith.constant 0 : i32
    return %arg0, %c0_i32, %c0_i32_0 : i32, i32, i32
  }
  func.func @transform_2(%arg0: i32) -> (i32, i32, i32) {
    %c0_i32 = arith.constant 0 : i32
    %c0_i32_0 = arith.constant 0 : i32
    %c0_i32_1 = arith.constant 0 : i32
    return %arg0, %c0_i32, %c0_i32_0 : i32, i32, i32
  }
  func.func @transform_3(%arg0: i32) -> (i32, i32) {
    %c0_i32 = arith.constant 0 : i32
    %c0_i32_0 = arith.constant 0 : i32
    %c0_i32_1 = arith.constant 0 : i32
    return %c0_i32, %c0_i32_0 : i32, i32
  }
  func.func @transform_4(%arg0: i32) -> (i32, i32) {
    %c0_i32 = arith.constant 0 : i32
    %c0_i32_0 = arith.constant 0 : i32
    %c0_i32_1 = arith.constant 0 : i32
    return %c0_i32, %c0_i32_0 : i32, i32
  }
  func.func @transform_5(%arg0: i32) -> (i32, i32) {
    %c0_i32 = arith.constant 0 : i32
    %c0_i32_0 = arith.constant 0 : i32
    %c0_i32_1 = arith.constant 0 : i32
    return %c0_i32, %c0_i32_0 : i32, i32
  }
  func.func @transform_6(%arg0: i32) -> (i32, i32) {
    %c0_i32 = arith.constant 0 : i32
    %c0_i32_0 = arith.constant 0 : i32
    %c0_i32_1 = arith.constant 0 : i32
    return %c0_i32, %c0_i32_0 : i32, i32
  }
  func.func @transform_7(%arg0: i32) -> (i32, i32) {
    %c0_i32 = arith.constant 0 : i32
    %c0_i32_0 = arith.constant 0 : i32
    %c0_i32_1 = arith.constant 0 : i32
    return %c0_i32, %c0_i32_0 : i32, i32
  }
  func.func @transform_8(%arg0: i32) -> (i32, i32) {
    %c0_i32 = arith.constant 0 : i32
    %c0_i32_0 = arith.constant 0 : i32
    %c0_i32_1 = arith.constant 0 : i32
    return %c0_i32, %c0_i32_0 : i32, i32
  }
  func.func @transform_9(%arg0: i32) -> (i32, i32) {
    %c0_i32 = arith.constant 0 : i32
    %c0_i32_0 = arith.constant 0 : i32
    %c0_i32_1 = arith.constant 0 : i32
    return %c0_i32, %c0_i32_0 : i32, i32
  }
  func.func @transform_10(%arg0: i32) -> (i32, i32) {
    %c0_i32 = arith.constant 0 : i32
    %c0_i32_0 = arith.constant 0 : i32
    %c0_i32_1 = arith.constant 0 : i32
    return %c0_i32, %c0_i32_0 : i32, i32
  }
  func.func @transform_11(%arg0: i32) -> (i32, i32) {
    %c0_i32 = arith.constant 0 : i32
    %c0_i32_0 = arith.constant 0 : i32
    %c0_i32_1 = arith.constant 0 : i32
    return %c0_i32, %c0_i32_0 : i32, i32
  }
  func.func @transform_12(%arg0: i32) -> (i32, i32) {
    %c0_i32 = arith.constant 0 : i32
    %c0_i32_0 = arith.constant 0 : i32
    %c0_i32_1 = arith.constant 0 : i32
    return %c0_i32, %c0_i32_0 : i32, i32
  }
  func.func @transform_13(%arg0: i32) -> (i32, i32) {
    %c0_i32 = arith.constant 0 : i32
    %c0_i32_0 = arith.constant 0 : i32
    %c0_i32_1 = arith.constant 0 : i32
    return %c0_i32, %c0_i32_0 : i32, i32
  }
  func.func @transform_14(%arg0: i32) -> (i32, i32) {
    %c0_i32 = arith.constant 0 : i32
    %c0_i32_0 = arith.constant 0 : i32
    %c0_i32_1 = arith.constant 0 : i32
    return %c0_i32, %c0_i32_0 : i32, i32
  }
  func.func @transform_15(%arg0: i32) -> (i32, i32, i32) {
    %c0_i32 = arith.constant 0 : i32
    %c0_i32_0 = arith.constant 0 : i32
    %c0_i32_1 = arith.constant 0 : i32
    return %arg0, %c0_i32, %c0_i32_0 : i32, i32, i32
  }
}

</mosaic_0001>

<bundles_post_ra>
// kernel: tpu_custom_call.1
= control target key start
LH: loop header
LB: loop body
LE: loop exit
PB: predicated region body
PF: predicated region fallthrough
CT: control target
= control target key end

     0   :  { %s3658_s0 = inlined_call_operand.hbm [shape: f32[2,8,32], index: 0, kind: input, shape index: {}]   ;;  %s3659_s1 = inlined_call_operand.hbm [shape: f32[2,8,32], index: 1, kind: input, shape index: {}]   ;;  %s3660_s2 = inlined_call_operand.hbm [shape: f32[2,8,32], index: 2, kind: input, shape index: {}]   ;;  %s3661_s3 = inlined_call_operand.hbm [shape: bf16[32,32], index: 3, kind: input, shape index: {}]   ;;  %s3662_s4 = inlined_call_operand.hbm [shape: f32[1,32], index: 4, kind: input, shape index: {}]   ;;  %s3663_s5 = inlined_call_operand.hbm [shape: bf16[32,32], index: 5, kind: input, shape index: {}]   ;;  %s3664_s6 = inlined_call_operand.hbm [shape: f32[1,32], index: 6, kind: input, shape index: {}]   ;;  %s3665_s7 = inlined_call_operand.hbm [shape: bf16[32,32], index: 7, kind: input, shape index: {}]   ;;  %s3666_s8 = inlined_call_operand.hbm [shape: f32[1,32], index: 8, kind: input, shape index: {}]   ;;  %s3667_s9 = inlined_call_operand.vmem [shape: bf16[32,32], index: 9, kind: input, shape index: {}]   ;;  %s3668_s10 = inlined_call_operand.hbm [shape: bf16[32,32], index: 10, kind: input, shape index: {}]   ;;  %s3669_s11 = inlined_call_operand.hbm [shape: bf16[32,32], index: 11, kind: input, shape index: {}]   ;;  %s3670_s12 = inlined_call_operand.vmem [shape: f32[1,32], index: 12, kind: input, shape index: {}]   ;;  %s3671_s13 = inlined_call_operand.vmem [shape: f32[1,32], index: 13, kind: input, shape index: {}]   ;;  %s3672_s14 = inlined_call_operand.vmem [shape: f32[1,32], index: 14, kind: input, shape index: {}]   ;;  %s3673_s15 = inlined_call_operand.hbm [shape: f32[2,8,32], index: 15, kind: output, shape index: {}]  }
   0x1   :  { %3695 = sst [smem:[#allocation35_spill]] %s3658_s0 }
   0x2   :  { %3696 = sst [smem:[#allocation36_spill]] %s3661_s3 }
   0x3   :  { %3697 = sst [smem:[#allocation37_spill]] %s3663_s5 }
   0x4   :  { %3698 = sst [smem:[#allocation38_spill]] %s3665_s7 }
   0x5   :  { %3699 = sst [smem:[#allocation39_spill]] %s3668_s10 }
   0x6   :  { %3700 = sst [smem:[#allocation40_spill]] %s3670_s12 }
   0x7   :  { %3701 = sst [smem:[#allocation41_spill]] %s3671_s13 }
   0x8   :  { %3702 = sst [smem:[#allocation42_spill]] %s3672_s14 }
   0x9   :  { %3703 = sst [smem:[#allocation43_spill]] %s3673_s15 }
   0xa   :  { %20 = vsyncpa [#allocation4], 0 }
   0xb   :  { %22 = vsyncpa [#allocation4 + $0x1], 0 }
   0xc   :  { %23 = vsyncpa [#allocation7], 0 }
   0xd   :  { %25 = vsyncpa [#allocation7 + $0x1], 0 }
   0xe   :  { %26 = vsyncpa [#allocation10], 0 }
   0xf   :  { %27 = vsyncpa [#allocation13], 0 }
  0x10   :  { %28 = vsyncpa [#allocation16], 0 }
  0x11   :  { %29 = vsyncpa [#allocation19], 0 }
  0x12   :  { %30 = vsyncpa [#allocation5], 0 }
  0x13   :  { %32 = vsyncpa [#allocation5 + $0x1], 0  ;;  %s3080_s18 = smov 0   ;;  %s3082_s19 = smov 0  }
  0x14   :  { %s3084_s20 = smov 0   ;;  %s3086_s21 = smov 0  }
  0x15 LB: > { %3704 = sst [smem:[#allocation29_spill]] %s2963_s18  ;;  %s2977_s22 = smov [#allocation9]   ;;  %s2975_s21 = sphi %s3086_s21, %s3750_s21   ;;  %s2971_s20 = sphi %s3084_s20, %s3754_s20   ;;  %s2967_s19 = sphi %s3082_s19, %s3753_s19   ;;  %s2963_s18 = sphi %s3080_s18, %s3752_s18  }
  0x16   : > { %3705 = sst [smem:[#allocation30_spill]] %s2975_s21  ;;  %s411_s23 = sshll.u32 %s2977_s22, 4  ;;  %s412_s23 = int_to_ptr.vmem [resolvable:$true] %s411_s23 }
  0x17   : > { %s3101_s24 = sadd.s32 4294967295, %s2975_s21   ;;  %p2140_p0 = scmp.ge.s32.totalorder %s2975_s21, 1 }
  0x18   : > { %p3686_p1 = scmp.eq.s32.totalorder %s3101_s24, 0  ;;  %p399_p2 = scmp.lt.s32.totalorder %s2975_s21, 3 }
  0x19   : > { %s2978_s26 = smov [#allocation12]   ;;  %s2979_s29 = smov [#allocation15]  }
  0x1a   : > { %p3106_p3 = pnand %p2140_p0, %p399_p2  ;;  %s435_s27 = sshll.u32 %s2978_s26, 4  ;;  %s3119_s27 = int_to_ptr.vmem [resolvable:$true] %s435_s27 }
  0x1b   : > { %s459_s30 = sshll.u32 %s2979_s29, 4  ;;  %s2610_s17 = scalar_lea.vmem %s412_s23, 256  ;;  %s3121_s30 = int_to_ptr.vmem [resolvable:$true] %s459_s30 }
  0x1c   : > { %s3706_s25 = scalar_select %p3106_p3, 1, 0 }
  0x1d   : > { %p2453_p5 = pneg %p3106_p3  ;;  %p2611_p8 = scmp.ne.s32.totalorder %s412_s23, %s2610_s17 }
  0x1e   : > { %p2618_p11 = scmp.lt.s32.totalorder %s412_s23, %s412_s23  ;;  %p2619_p12 = scmp.lt.s32.totalorder %s2610_s17, %s2610_s17 }
  0x1f   : > { %p3115_p6 = pnand %p2453_p5, %p3686_p1 }
  0x20   : > { %p2620_p13 = por %p2619_p12, %p2618_p11 }
  0x21   : > { %s3707_s28 = scalar_select %p3115_p6, 1, 0 }
  0x22   : > { %p3125_p7 = pneg %p3115_p6 }
  0x24   : > { %s3708_s16 = scalar_select %p3125_p7, 1, 0 }
  0x25   : > { %p2613_p9 = pnand %p2611_p8, %p3125_p7 }
  0x27   : > { %p2614_p10 = pneg %p2613_p9 }
  0x29   : > { %p2621_p0 = pnand %p2620_p13, %p2614_p10 }
  0x2b   : > { %2624 = shalt.err (!%p2621_p0)
}
  0x2c   : > { %s3675_s22 = smov 64   ;;  %s3677_s26 = smov 4  }
  0x2d   : > { %s3709_s3 = sld [smem:[#allocation36_spill]]  ;;  %s2636_s14 = scalar_lea.vmem %s3119_s27, 256 }
  0x2e   : > { %p2637_p2 = scmp.ne.s32.totalorder %s3119_s27, %s2636_s14  ;;  %p2644_p9 = scmp.lt.s32.totalorder %s3119_s27, %s3119_s27 }
  0x2f   : > { %p2645_p10 = scmp.lt.s32.totalorder %s2636_s14, %s2636_s14 }
  0x30   : > { %p2639_p5 = pnand %p2637_p2, %p3125_p7 }
  0x31   : > { %p2646_p11 = por %p2645_p10, %p2644_p9 }
  0x32   : > { %p2640_p8 = pneg %p2639_p5 }
  0x33   : > { %2456 = dma.hbm_to_vmem [thread:$0]  (!%p3115_p6), %s3709_s3, 256, %s412_s23, [#allocation10], %s3675_s22, %s3675_s22, %s3677_s26  }
  0x34   : > { %p2647_p12 = pnand %p2646_p11, %p2640_p8 }
  0x36   : > { %2650 = shalt.err (!%p2647_p12)
}
  0x37   : > { %s3710_s5 = sld [smem:[#allocation37_spill]]  ;;  %s2662_s23 = scalar_lea.vmem %s3121_s30, 256 }
  0x38   : > { %p2663_p13 = scmp.ne.s32.totalorder %s3121_s30, %s2662_s23  ;;  %p2670_p5 = scmp.lt.s32.totalorder %s3121_s30, %s3121_s30 }
  0x39   : > { %p2671_p8 = scmp.lt.s32.totalorder %s2662_s23, %s2662_s23 }
  0x3a   : > { %p2665_p0 = pnand %p2663_p13, %p3125_p7 }
  0x3b   : > { %p2672_p9 = por %p2671_p8, %p2670_p5 }
  0x3c   : > { %p2666_p2 = pneg %p2665_p0 }
  0x3d   : > { %2462 = dma.hbm_to_vmem [thread:$0]  (!%p3115_p6), %s3710_s5, 256, %s3119_s27, [#allocation13], %s3675_s22, %s3675_s22, %s3677_s26  }
  0x3e   : > { %p2673_p10 = pnand %p2672_p9, %p2666_p2 }
  0x40   : > { %2676 = shalt.err (!%p2673_p10)
}
  0x41   : > { %s3711_s7 = sld [smem:[#allocation38_spill]]  ;;  %s2982_s27 = smov [#allocation18]  }
  0x42   : > { %s486_s17 = sshll.u32 %s2982_s27, 4  ;;  %s487_s17 = int_to_ptr.vmem [resolvable:$true] %s486_s17 }
  0x43   : > { %s2688_s15 = scalar_lea.vmem %s487_s17, 256  ;;  %p2696_p0 = scmp.lt.s32.totalorder %s487_s17, %s487_s17 }
  0x44   : > { %p2689_p11 = scmp.ne.s32.totalorder %s487_s17, %s2688_s15  ;;  %p2697_p2 = scmp.lt.s32.totalorder %s2688_s15, %s2688_s15 }
  0x46   : > { %p2691_p12 = pnand %p2689_p11, %p3125_p7  ;;  %p2698_p5 = por %p2697_p2, %p2696_p0 }
  0x47   : > { %2468 = dma.hbm_to_vmem [thread:$0]  (!%p3115_p6), %s3711_s7, 256, %s3121_s30, [#allocation16], %s3675_s22, %s3675_s22, %s3677_s26  }
  0x48   : > { %p2692_p13 = pneg %p2691_p12 }
  0x4a   : > { %p2699_p8 = pnand %p2698_p5, %p2692_p13 }
  0x4c   : > { %2702 = shalt.err (!%p2699_p8)
}
  0x4d   : > { %s3712_s10 = sld [smem:[#allocation39_spill]]  ;;  %s2139_s14 = sadd.s32 4294967294, %s2975_s21  }
  0x4e   : > { %s3181_s29 = sadd.s32 1, %s2975_s21   ;;  %s45_s15 = sadd.s32 1, %s2971_s20 }
  0x4f   : > { %3713 = sst [smem:[#allocation31_spill]] %s3181_s29  ;;  %s42_s27 = ssub.s32 %s2975_s21, %s3181_s29 }
  0x50   : > { %p43_p9 = scmp.eq.s32.totalorder %s42_s27, 0  ;;  %p52_p10 = scmp.ne.s32.totalorder %s2971_s20, %s2967_s19 }
  0x51   : > { %p53_p11 = scmp.eq.s32.totalorder %s2975_s21, 0  ;;  %p58_p12 = scmp.ne.s32.totalorder %s2967_s19, %s2963_s18 }
  0x52   : > { %s3192_s23 = scalar_select %p43_p9, %s2971_s20, %s45_s15  }
  0x53   : > { %2474 = dma.hbm_to_vmem [thread:$0]  (!%p3115_p6), %s3712_s10, 256, %s487_s17, [#allocation19], %s3675_s22, %s3675_s22, %s3677_s26  }
  0x54   : > { %3714 = sst [smem:[#allocation32_spill]] %s3192_s23  ;;  %p54_p13 = por %p53_p11, %p52_p10 }
  0x55   : > { %p3196_p0 = por %p3686_p1, %p58_p12  ;;  %p386_p2 = scmp.eq.s32.totalorder %s3101_s24, 1 }
  0x56   : > { %p392_p5 = scmp.eq.s32.totalorder %s2139_s14, 1  ;;  %p2500_p8 = scmp.lt.s32.totalorder %s2975_s21, 2 }
  0x57   : > { %s3715_s30 = scalar_select %p3196_p0, 1, 0 }
  0x58   : > { %s3678_s17 = sand.u32 1, %s2971_s20   ;;  %p3203_p4 = por %p386_p2, %p52_p10 }
  0x59   : > { %p3207_p3 = por %p392_p5, %p58_p12  ;;  %s3213_s15 = sshll.u32 %s3678_s17, 3 }
  0x5a   : > { %s3716_s22 = scalar_select %p3203_p4, 1, 0 }
  0x5b   : > { %s3718_s27 = scalar_select %p3207_p3, 1, 0 }
  0x5c   : > { %3717 = sst [smem:[#allocation33_spill]] %s3716_s22  ;;  %s3216_s26 = sshll.u32 %s2975_s21, 7 }
  0x5d   : > { %3719 = sst [smem:[#allocation34_spill]] %s3718_s27  ;;  %p3218_p9 = pnand %p2500_p8, %p54_p13 }
  0x5e   : > { %s540_s14 = sand.u32 1, %s2975_s21   ;;  %s3227_s10 = scalar_lea.hbm %s3659_s1, %s3216_s26 }
  0x5f   : > { %s3720_s3 = scalar_select %p3218_p9, 1, 0 }
  0x60   : > { %s544_s17 = scalar_lea.vmem [#allocation6], %s3213_s15  ;;  %s2983_s29 = smov [#allocation11]  }
  0x61   : > { %s551_s23 = sshll.u32 %s544_s17, 4  ;;  %s425_s27 = sshll.u32 %s2983_s29, 4  ;;  %s3230_s23 = int_to_ptr.vmem [resolvable:$true] %s551_s23  ;;  %s426_s27 = int_to_ptr.vmem [resolvable:$true] %s425_s27 }
  0x62   : > { %s3232_s18 = scalar_lea.sflag [#allocation7], %s540_s14  ;;  %s2703_s13 = scalar_lea.hbm %s3227_s10, 128 }
  0x63   : > { %p2704_p10 = scmp.ne.s32.totalorder %s3227_s10, %s2703_s13  ;;  %p3238_p11 = pneg %p3218_p9 }
  0x64   : > { %s2708_s17 = scalar_lea.hbm %s3659_s1, 256  ;;  %p2709_p2 = scmp.lt.s32.totalorder %s3227_s10, %s3659_s1 }
  0x65   : > { %p2706_p12 = pnand %p3238_p11, %p2704_p10  ;;  %p2710_p5 = scmp.lt.s32.totalorder %s2708_s17, %s2703_s13 }
  0x67   : > { %p2707_p13 = pneg %p2706_p12  ;;  %p2711_p8 = por %p2710_p5, %p2709_p2 }
  0x69   : > { %p2712_p1 = pnand %p2711_p8, %p2707_p13 }
  0x6b   : > { %2715 = shalt.err (!%p2712_p1)
}
  0x6c   : > { %s2716_s29 = scalar_lea.vmem %s3230_s23, 128  ;;  %s2984_s14 = smov [#allocation6]  }
  0x6d   : > { %p2717_p3 = scmp.ne.s32.totalorder %s3230_s23, %s2716_s29  ;;  %s2721_s5 = sshll.u32 %s2984_s14, 4  ;;  %s2722_s5 = int_to_ptr.vmem [resolvable:$false] %s2721_s5 }
  0x6e   : > { %s2723_s7 = scalar_lea.vmem %s2722_s5, 256  ;;  %p2724_p4 = scmp.lt.s32.totalorder %s3230_s23, %s2722_s5 }
  0x6f   : > { %p2719_p10 = pnand %p2717_p3, %p3238_p11  ;;  %p2725_p0 = scmp.lt.s32.totalorder %s2723_s7, %s2716_s29 }
  0x71   : > { %p2720_p12 = pneg %p2719_p10  ;;  %p2726_p6 = por %p2725_p0, %p2724_p4 }
  0x73   : > { %p2727_p7 = pnand %p2726_p6, %p2720_p12 }
  0x75   : > { %2730 = shalt.err (!%p2727_p7)
}
  0x76   : > { %2484 = dma.hbm_to_vmem [thread:$0]  (!%p3218_p9), %s3227_s10, 128, %s3230_s23, %s3232_s18  }
  0x77   : > { %s2742_s12 = scalar_lea.vmem %s426_s27, 16  ;;  %p3722_p3 = scmp.ne.s32.totalorder %s3708_s16, 0 }
  0x78   : > { %p2743_p1 = scmp.ne.s32.totalorder %s426_s27, %s2742_s12  ;;  %s2749_s13 = scalar_lea.vmem %s426_s27, 32 }
  0x79   : > { %p2750_p5 = scmp.lt.s32.totalorder %s426_s27, %s426_s27  ;;  %p2751_p8 = scmp.lt.s32.totalorder %s2749_s13, %s2742_s12 }
  0x7a   : > { %p2745_p13 = pnand %p2743_p1, %p3722_p3 }
  0x7b   : > { %p2752_p10 = por %p2751_p8, %p2750_p5 }
  0x7c   : > { %p2746_p2 = pneg %p2745_p13 }
  0x7e   : > { %p2753_p4 = pnand %p2752_p10, %p2746_p2 }
  0x80   : > { %2756 = shalt.err (!%p2753_p4)
}
  0x81   : > { %p3723_p6 = scmp.ne.s32.totalorder %s3707_s28, 0  ;;  %s2985_s10 = smov [#allocation14]  }
  0x82   : > { %s449_s23 = sshll.u32 %s2985_s10, 4  ;;  %s2986_s29 = smov [#allocation17]   ;;  %s450_s23 = int_to_ptr.vmem [resolvable:$true] %s449_s23 }
  0x83   : > { %2459 = dma.hbm_to_vmem [thread:$0]  (!%p3723_p6), %s3662_s4, 16, %s426_s27, [#allocation10]  }
  0x84   : > { %s473_s14 = sshll.u32 %s2986_s29, 4  ;;  %s2768_s5 = scalar_lea.vmem %s450_s23, 16  ;;  %s474_s14 = int_to_ptr.vmem [resolvable:$true] %s473_s14 }
  0x85   : > { %p2769_p7 = scmp.ne.s32.totalorder %s450_s23, %s2768_s5  ;;  %s2775_s7 = scalar_lea.vmem %s450_s23, 32 }
  0x86   : > { %p2776_p1 = scmp.lt.s32.totalorder %s450_s23, %s450_s23  ;;  %p2777_p13 = scmp.lt.s32.totalorder %s2775_s7, %s2768_s5 }
  0x87   : > { %p2771_p0 = pnand %p2769_p7, %p3722_p3 }
  0x88   : > { %p2778_p2 = por %p2777_p13, %p2776_p1 }
  0x89   : > { %p2772_p12 = pneg %p2771_p0 }
  0x8b   : > { %p2779_p5 = pnand %p2778_p2, %p2772_p12 }
  0x8d   : > { %2782 = shalt.err (!%p2779_p5)
}
  0x8e   : > { %2465 = dma.hbm_to_vmem [thread:$0]  (!%p3723_p6), %s3664_s6, 16, %s450_s23, [#allocation13]  }
  0x8f   : > { %s2794_s13 = scalar_lea.vmem %s474_s14, 16  ;;  %s2801_s22 = scalar_lea.vmem %s474_s14, 32 }
  0x90   : > { %p2795_p8 = scmp.ne.s32.totalorder %s474_s14, %s2794_s13  ;;  %p2802_p7 = scmp.lt.s32.totalorder %s474_s14, %s474_s14 }
  0x91   : > { %p2803_p0 = scmp.lt.s32.totalorder %s2801_s22, %s2794_s13 }
  0x92   : > { %p2797_p10 = pnand %p2795_p8, %p3722_p3 }
  0x93   : > { %p2804_p9 = por %p2803_p0, %p2802_p7 }
  0x94   : > { %p2798_p4 = pneg %p2797_p10 }
  0x96   : > { %p2805_p1 = pnand %p2804_p9, %p2798_p4 }
  0x98   : > { %2808 = shalt.err (!%p2805_p1)
}
  0x99   : > { %2471 = dma.hbm_to_vmem [thread:$0]  (!%p3723_p6), %s3666_s8, 16, %s474_s14, [#allocation16]  }
  0x9a   : > { %s2987_s23 = smov [#allocation20]  }
  0x9b   : > { %s499_s29 = sshll.u32 %s2987_s23, 4  ;;  %s500_s29 = int_to_ptr.vmem [resolvable:$true] %s499_s29 }
  0x9c   : > { %s2820_s5 = scalar_lea.vmem %s500_s29, 256  ;;  %p2828_p5 = scmp.lt.s32.totalorder %s500_s29, %s500_s29 }
  0x9d   : > { %p2821_p12 = scmp.ne.s32.totalorder %s500_s29, %s2820_s5  ;;  %p2829_p8 = scmp.lt.s32.totalorder %s2820_s5, %s2820_s5 }
  0x9f   : > { %p2823_p13 = pnand %p2821_p12, %p3722_p3  ;;  %p2830_p10 = por %p2829_p8, %p2828_p5 }
  0xa1   : > { %p2824_p2 = pneg %p2823_p13 }
  0xa3   : > { %p2831_p9 = pnand %p2830_p10, %p2824_p2 }
  0xa5   : > { %2834 = shalt.err (!%p2831_p9)
}
  0xa6   : > { %s3724_s7 = smov 4   ;;  %s3725_s12 = smov 64  }
  0xa7   : > { %2477 = dma.hbm_to_vmem [thread:$0]  (!%p3723_p6), %s3669_s11, 256, %s500_s29, [#allocation19], %s3725_s12, %s3725_s12, %s3724_s7  }
  0xa8   : > { %s3726_s0 = sld [smem:[#allocation35_spill]]  ;;  %s526_s28 = scalar_lea.vmem [#allocation3], %s3213_s15 }
  0xa9   : > { %s533_s17 = sshll.u32 %s526_s28, 4  ;;  %s3727_s10 = sand.u32 1, %s2971_s20   ;;  %s534_s17 = int_to_ptr.vmem [resolvable:$true] %s533_s17 }
  0xaa   : > { %s523_s23 = scalar_lea.sflag [#allocation4], %s3727_s10 }
  0xae   : > { %s3296_s22 = scalar_lea.hbm %s3726_s0, %s3216_s26  ;;  %s2840_s7 = scalar_lea.hbm %s3726_s0, 256 }
  0xaf   : > { %s2835_s5 = scalar_lea.hbm %s3296_s22, 128  ;;  %p2841_p6 = scmp.lt.s32.totalorder %s3296_s22, %s3726_s0 }
  0xb0   : > { %p2836_p3 = scmp.ne.s32.totalorder %s3296_s22, %s2835_s5  ;;  %p2842_p0 = scmp.lt.s32.totalorder %s2840_s7, %s2835_s5 }
  0xb2   : > { %p2838_p4 = pnand %p2836_p3, %p3238_p11  ;;  %p2843_p1 = por %p2842_p0, %p2841_p6 }
  0xb4   : > { %p2839_p7 = pneg %p2838_p4 }
  0xb6   : > { %p2844_p12 = pnand %p2843_p1, %p2839_p7 }
  0xb8   : > { %2847 = shalt.err (!%p2844_p12)
}
  0xb9   : > { %s2848_s16 = scalar_lea.vmem %s534_s17, 128  ;;  %s2988_s13 = smov [#allocation3]  }
  0xba   : > { %p2849_p13 = scmp.ne.s32.totalorder %s534_s17, %s2848_s16  ;;  %s2853_s28 = sshll.u32 %s2988_s13, 4  ;;  %s2854_s28 = int_to_ptr.vmem [resolvable:$false] %s2853_s28 }
  0xbb   : > { %s2855_s10 = scalar_lea.vmem %s2854_s28, 256  ;;  %p2856_p8 = scmp.lt.s32.totalorder %s534_s17, %s2854_s28 }
  0xbc   : > { %p2851_p2 = pnand %p2849_p13, %p3238_p11  ;;  %p2857_p10 = scmp.lt.s32.totalorder %s2855_s10, %s2848_s16 }
  0xbe   : > { %p2852_p5 = pneg %p2851_p2  ;;  %p2858_p9 = por %p2857_p10, %p2856_p8 }
  0xc0   : > { %p2859_p3 = pnand %p2858_p9, %p2852_p5 }
  0xc2   : > { %2862 = shalt.err (!%p2859_p3)
}
  0xc3   : > { %p3728_p4 = scmp.ne.s32.totalorder %s3720_s3, 0  ;;  %s567_s29 = scalar_lea.hbm %s3660_s2, %s3216_s26 }
  0xc4   : > { %s562_s7 = scalar_lea.vmem [#allocation8], %s3213_s15  ;;  %s2863_s14 = scalar_lea.hbm %s567_s29, 128 }
  0xc5   : > { %2481 = dma.hbm_to_vmem [thread:$0]  (!%p3728_p4), %s3296_s22, 128, %s534_s17, %s523_s23  }
  0xc6   : > { %s569_s12 = sshll.u32 %s562_s7, 4  ;;  %p2864_p7 = scmp.ne.s32.totalorder %s567_s29, %s2863_s14  ;;  %s570_s12 = int_to_ptr.vmem [resolvable:$true] %s569_s12 }
  0xc7   : > { %s2868_s28 = scalar_lea.hbm %s3660_s2, 256  ;;  %p2869_p1 = scmp.lt.s32.totalorder %s567_s29, %s3660_s2 }
  0xc8   : > { %p2866_p6 = pnand %p2864_p7, %p3238_p11  ;;  %p2870_p12 = scmp.lt.s32.totalorder %s2868_s28, %s2863_s14 }
  0xca   : > { %p2867_p0 = pneg %p2866_p6  ;;  %p2871_p13 = por %p2870_p12, %p2869_p1 }
  0xcc   : > { %p2872_p2 = pnand %p2871_p13, %p2867_p0 }
  0xce   : > { %2875 = shalt.err (!%p2872_p2)
}
  0xcf   : > { %s2876_s26 = scalar_lea.vmem %s570_s12, 128  ;;  %s2989_s15 = smov [#allocation8]  }
  0xd0   : > { %p2877_p5 = scmp.ne.s32.totalorder %s570_s12, %s2876_s26  ;;  %s2881_s22 = sshll.u32 %s2989_s15, 4  ;;  %s2882_s22 = int_to_ptr.vmem [resolvable:$false] %s2881_s22 }
  0xd1   : > { %s2883_s17 = scalar_lea.vmem %s2882_s22, 256  ;;  %p2884_p9 = scmp.lt.s32.totalorder %s570_s12, %s2882_s22 }
  0xd2   : > { %p2879_p8 = pnand %p2877_p5, %p3238_p11  ;;  %p2885_p3 = scmp.lt.s32.totalorder %s2883_s17, %s2876_s26 }
  0xd4   : > { %p2880_p10 = pneg %p2879_p8  ;;  %p2886_p7 = por %p2885_p3, %p2884_p9 }
  0xd6   : > { %p2887_p6 = pnand %p2886_p7, %p2880_p10 }
  0xd8   : > { %2890 = shalt.err (!%p2887_p6)
}
  0xd9   : > { %2487 = dma.hbm_to_vmem [thread:$0]  (!%p3728_p4), %s567_s29, 128, %s570_s12, %s3232_s18  }
  0xda   : > { %p3729_p0 = scmp.ne.s32.totalorder %s3706_s25, 0 }
  0xdb   : > { %s3338_s0 = sand.u32 (!%p3729_p0), 1, %s2967_s19   ;;  %p3730_p11 = scmp.ne.s32.totalorder (!%p3729_p0), %s3715_s30, 0 }
  0xdc   : > { %578 = sbr.rel (%p3729_p0) target bundleno = 2804 (0xaf4), region = 80  ;;  %s3341_s21 = sshll.u32 (!%p3729_p0), %s3338_s0, 3 }
  0xdd   : > { %s581_s23 = scalar_lea.sflag (!%p3729_p0), [#allocation4], %s3338_s0  ;;  %s584_s5 = scalar_lea.vmem (!%p3729_p0), [#allocation3], %s3341_s21 }
  0xe1   : > { %2934 = dma.done.wait (%p3730_p11), %s581_s23, 128  }
  0xe2   : > { %2936 = vsyncadd (%p3730_p11), %s581_s23, 4294967168  ;;  %s589_s3 = sand.u32 1, %s3101_s24   ;;  %s593_s25 = scalar_lea.vmem [#allocation6], %s3341_s21 }
  0xe3   : > { %s590_s18 = scalar_lea.sflag [#allocation7], %s589_s3 }
  0xe4   : > { %2938 = dma.done.wait (%p3730_p11), %s590_s18, 256  }
  0xe5   : > { %2940 = vsyncadd (%p3730_p11), %s590_s18, 4294967040  ;;  %s602_s27 = scalar_lea.vmem [#allocation8], %s3341_s21  ;;  %p3731_p4 = scmp.eq.s32.totalorder %s3101_s24, 0 }
  0xe7   : > { %2942 = dma.done.wait (%p3731_p4), [#allocation10], 272   ;;  %p3732_p1 = pmov %p3731_p4 }
  0xe9   : > { %2944 = vsyncadd (%p3732_p1), [#allocation10], 4294967024  ;;  %p3733_p12 = pmov %p3732_p1 }
  0xea   : > { %p3734_p13 = pmov %p3732_p1 }
  0xeb   : > { %2946 = dma.done.wait (%p3733_p12), [#allocation13], 272  }
  0xec   : > { %2948 = vsyncadd (%p3734_p13), [#allocation13], 4294967024  ;;  %p3735_p2 = pmov %p3732_p1 }
  0xed   : > { %p3736_p5 = pmov %p3732_p1 }
  0xee   : > { %2950 = dma.done.wait (%p3735_p2), [#allocation16], 272  }
  0xef   : > { %2952 = vsyncadd (%p3736_p5), [#allocation16], 4294967024  ;;  %p3737_p8 = pmov %p3732_p1 }
  0xf0   : > { %p3738_p10 = pmov %p3732_p1 }
  0xf1   : > { %2954 = dma.done.wait (%p3737_p8), [#allocation19], 512  }
  0xf2   : > { %2956 = vsyncadd (%p3738_p10), [#allocation19], 4294966784  ;;  %v2990_v0 = vmov 0.0   ;;  %vm2991_vm0 = vmmov 0   ;;  %v2561_v1 = vld [vmem:[#allocation12 + $0x8] sm:$0xff]   ;;  %v2562_v2 = vld [vmem:[#allocation9 + $0x8] sm:$0xff]   ;;  %v908_v36 = vlaneseq }
  0xf3   : > { %2277 = vmatprep.subr.bf16.mxu1 %v2990_v0  ;;  %2269 = vmatprep.subr.bf16.mxu0 %v2990_v0  ;;  %v2563_v3 = vld [vmem:[#allocation12] sm:$0xff]   ;;  %v2564_v4 = vld [vmem:[#allocation9] sm:$0xff]   ;;  %vm719_vm1 = vcmask 261120   ;;  %vm912_vm2 = vcmask 64512   ;;  %s2992_s14 = smov 120   ;;  %vm1096_vm4 = vcmask 1043456  }
  0xf4   : > { %2281 = vmatprep.mubr.msk.bf16.mxu1 %vm2991_vm0, %v2990_v0  ;;  %2273 = vmatprep.mubr.msk.bf16.mxu0 %vm2991_vm0, %v2990_v0  ;;  %v693_v5 = vld [vmem:[%s593_s25] sm:$0xff]  ;;  %v3382_v6 = vld [vmem:[%s584_s5] sm:$0xff]  ;;  %v909_v37 = vand.u32 127, %v908_v36  ;;  %v2993_v41 = vmov -1e+30   ;;  %s2994_s16 = smov 112  }
  0xf5   : > { %2278 = vmatpush3.bf16.msra.mxu1 %v2561_v1  ;;  %2270 = vmatpush3.bf16.msra.mxu0 %v2562_v2  ;;  %v764_v7 = vpack.c.bf16 %v693_v5, %v693_v5  ;;  %v695_v8 = vpack.c.bf16 %v3382_v6, %v3382_v6  ;;  %v2565_v9 = vld [vmem:[#allocation15 + $0x8] sm:$0xff]   ;;  %v2566_v10 = vld [vmem:[#allocation15] sm:$0xff]   ;;  %v3400_v12 = vld [vmem:[%s3667_s9 + $0x8] sm:$0xff]   ;;  %s2995_s13 = smov 104   ;;  %s2996_s28 = smov 8   ;;  %vm1142_vm5 = vcmask 60416  }
  0xf6   : > { %2279 = vmatprep.subr.bf16.mxu1 %v2990_v0  ;;  %2271 = vmatprep.subr.bf16.mxu0 %v2990_v0  ;;  %v694_v11 = vld [vmem:[%s602_s27] sm:$0xff]  ;;  %v973_v14 = vsel %vm912_vm2, %v3400_v12, 0  ;;  %v2173_v17 = vld [vmem:[#allocation14] ss:$0 sm:$0xff]  ;;  %vm910_vm3 = vcmp.lt.s32.totalorder %v909_v37, 30  ;;  %s2997_s10 = smov 16  }
  0xf7   : > { %v832_v13 = vpack.c.bf16 %v694_v11, %v694_v11  ;;  %v3412_v15 = vld [vmem:[%s3667_s9] sm:$0xff]   ;;  %1198 = vrot.lane.b32.xlu1 %v3400_v12, %s2992_s14  ;;  %v3438_v42 = vsel %vm910_vm3, 0.0, %v2993_v41  ;;  %v3445_v51 = vld [vmem:[#allocation18 + $0x8] sm:$0xff]   ;;  %v3448_v52 = vld [vmem:[#allocation18] sm:$0xff]   ;;  %vm1375_vm6 = vcmask 126016   ;;  %vm1605_vm7 = vcmask 191616  }
  0xf8   : > { %v970_v16 = vsel %vm912_vm2, %v3412_v15, 0  ;;  %v2169_v18 = vld [vmem:[#allocation11] ss:$0 sm:$0xff]  ;;  %v2177_v2 = vld [vmem:[#allocation17] ss:$0 sm:$0xff]  ;;  %s2998_s26 = smov 24  }
  0xf9   : > { %2280 = vmatpush3.bf16.msra.mxu1 %v2563_v3  ;;  %2272 = vmatpush3.bf16.msra.mxu0 %v2564_v4  ;;  %vm1835_vm8 = vcmask 257216   ;;  %s3739_s17 = sld [smem:[#allocation40_spill]]  ;;  %s2211_s29 = sshll.u32 %s3101_s24, 7 }
  0xfa   : > { %2293 = vmatprep.subr.bf16.mxu1 %v2990_v0  ;;  %2285 = vmatprep.subr.bf16.mxu0 %v2990_v0  ;;  %s3740_s23 = sld [smem:[#allocation33_spill]]  ;;  %s690_s7 = scalar_lea.vmem [#allocation21], %s3341_s21 }
  0xfb   : > { %1196 = vrot.lane.b32.xlu1 %v3412_v15, %s2992_s14  ;;  %s3741_s18 = sld [smem:[#allocation41_spill]]  ;;  %s1950_s12 = sshll.u32 %s690_s7, 4  ;;  %s1951_s12 = int_to_ptr.vmem [resolvable:$true] %s1950_s12 }
  0xfc   : > { %2282 = vmatmul.mubr.msk.bf16.vlgmr.msra.gmra.mxu1 %vm719_vm1, %v764_v7  ;;  %2274 = vmatmul.mubr.msk.bf16.vlgmr.msra.gmra.mxu0 %vm719_vm1, %v695_v8  ;;  %s3742_s30 = sld [smem:[#allocation42_spill]]  ;;  %s2999_s15 = smov [#allocation21]  }
  0xfd   : > { %2295 = vmatprep.mubr.msk.bf16.mxu1 %vm2991_vm0, %v2990_v0  ;;  %2286 = vmatpush3.bf16.msra.mxu0 %v2565_v9  ;;  %s2895_s22 = sshll.u32 %s2999_s15, 4  ;;  %s2896_s22 = int_to_ptr.vmem [resolvable:$false] %s2895_s22 }
  0xfe   : > { %2289 = vmatprep.mubr.msk.bf16.mxu0 %vm2991_vm0, %v2990_v0  ;;  %2287 = vmatprep.subr.bf16.mxu0 %v2990_v0  ;;  %s2897_s24 = scalar_lea.vmem %s2896_s22, 256  ;;  %p2898_p0 = scmp.lt.s32.totalorder %s1951_s12, %s2896_s22 }
 0x100   : > { %p3744_p3 = scmp.ne.s32.totalorder %s3740_s23, 0 }
 0x101   : > { %2288 = vmatpush3.bf16.msra.mxu0 %v2566_v10 }
 0x102   : > { %2299 = vmatprep.subr.bf16.mxu0 %v2990_v0 }
 0x104   : > { %2290 = vmatmul.mubr.msk.bf16.vlgmr.msra.gmra.mxu0 %vm719_vm1, %v832_v13 }
 0x105   : > { %2300 = vmatpush3.bf16.xpose.msra.mxu0 %v973_v14  ;;  %2303 = vmatprep.mubr.msk.bf16.mxu0 %vm2991_vm0, %v2990_v0 }
 0x106   : > { %2301 = vmatprep.subr.bf16.mxu0 %v2990_v0 }
 0x10d   : > { %2302 = vmatpush3.bf16.xpose.msra.mxu0 %v970_v16 }
 0x10e   : > { %2321 = vmatprep.subr.bf16.mxu0 %v2990_v0 }
 0x169   : > { %v1199_v54 = vpop.permute.xlu1 %1198 }
 0x16a   : > { %v1204_v10 = vsel %vm912_vm2, %v1199_v54, 0 }
 0x16d   : > { %v1197_v61 = vpop.permute.xlu1 %1196 }
 0x16e   : > { %v1201_v13 = vsel %vm912_vm2, %v1197_v61, 0 }
 0x1bc   : > { %v825_v19 = vpop.f32.mrf.mxu1  ;;  %v757_v21 = vpop.f32.mrf.mxu0 }
 0x1bd   : > { %v826_v20 = vadd.f32 %v2173_v17, %v825_v19  ;;  %v758_v23 = vadd.f32 %v2169_v18, %v757_v21 }
 0x1be   : > { %v2283_v22 = vpop.f32.mrf.mxu1  ;;  %v2275_v25 = vpop.f32.mrf.mxu0 }
 0x1bf   : > { %v3421_v24 = vpack.c.bf16 %v826_v20, %v826_v20  ;;  %v3423_v26 = vpack.c.bf16 %v758_v23, %v758_v23 }
 0x1c0   : > { %v828_v27 = vpop.f32.mrf.mxu1  ;;  %v760_v29 = vpop.f32.mrf.mxu0 }
 0x1c1   : > { %v917_v28 = vsel %vm912_vm2, %v3421_v24, 0  ;;  %2304 = vmatmul.mubr.msk.bf16.vlgmr.msra.gmra.mxu0 %vm912_vm2, %v3423_v26  ;;  %1145 = vrot.lane.b32.xlu1 %v3423_v26, %s2992_s14 }
 0x1c2   : > { %v2284_v30 = vpop.f32.mrf.mxu1  ;;  %2294 = vmatpush3.bf16.xpose.msra.mxu1 %v917_v28  ;;  %v2276_v31 = vpop.f32.mrf.mxu0  ;;  %2323 = vmatprep.mubr.msk.bf16.mxu0 %vm2991_vm0, %v2990_v0 }
 0x1c3   : > { %2307 = vmatprep.subr.bf16.mxu1 %v2990_v0 }
 0x1c4   : > { %v893_v32 = vpop.f32.mrf.mxu0 }
 0x1c5   : > { %v894_v3 = vadd.f32 %v2177_v2, %v893_v32 }
 0x1c6   : > { %v2291_v33 = vpop.f32.mrf.mxu0 }
 0x1c7   : > { %v3458_v4 = vpack.c.bf16 %v894_v3, %v894_v3 }
 0x1c8   : > { %v896_v34 = vpop.f32.mrf.mxu0 }
 0x1c9   : > { %2296 = vmatmul.mubr.msk.bf16.vlgmr.msra.gmra.mxu1 %vm912_vm2, %v3423_v26  ;;  %v1098_v8 = vsel %vm1096_vm4, %v3458_v4, 0 }
 0x1ca   : > { %2311 = vmatprep.mubr.msk.bf16.mxu1 %vm2991_vm0, %v2990_v0  ;;  %v2292_v35 = vpop.f32.mrf.mxu0  ;;  %2308 = vmatpush3.bf16.msra.mxu1 %v3445_v51 }
 0x1cb   : > { %2309 = vmatprep.subr.bf16.mxu1 %v2990_v0 }
 0x1ce   : > { %2310 = vmatpush3.bf16.msra.mxu1 %v3448_v52 }
 0x1cf   : > { %2315 = vmatprep.subr.bf16.mxu1 %v2990_v0 }
 0x233   : > { %v1146_v1 = vpop.permute.xlu1 %1145 }
 0x281   : > { %v1009_v38 = vpop.f32.mrf.mxu0 }
 0x282   : > { %v1010_v45 = vadd.f32 %v1009_v38, %v3438_v42 }
 0x283   : > { %v2305_v39 = vpop.f32.mrf.mxu0 }
 0x284   : > { %v1018_v49 = vsel %vm719_vm1, %v1010_v45, -inf }
 0x285   : > { %v1012_v40 = vpop.f32.mrf.mxu0 }
 0x287   : > { %v2306_v43 = vpop.f32.mrf.mxu0 }
 0x289   : > { %v953_v44 = vpop.f32.mrf.mxu1 }
 0x28a   : > { %v1015_v46 = vsel %vm912_vm2, %v953_v44, -inf }
 0x28b   : > { %1016 = vmax.xlane.f32.xlu0 %v1015_v46  ;;  %v2297_v47 = vpop.f32.mrf.mxu1 }
 0x28d   : > { %v956_v48 = vpop.f32.mrf.mxu1 }
 0x28f   : > { %v2298_v50 = vpop.f32.mrf.mxu1  ;;  %1019 = vmax.xlane.f32.xlu0 %v1018_v49 }
 0x2a5   : > { %1148 = vrot.lane.b32.xlu0 %v3421_v24, %s2992_s14 }
 0x314   : > { %v1017_v53 = vpop.xlane.xlu0 %1016 }
 0x318   : > { %v1020_v55 = vpop.xlane.xlu0 %1019 }
 0x319   : > { %v1021_v56 = vmax.f32 %v1017_v53, %v1020_v55 }
 0x31b   : > { %v1025_v57 = vsub.f32 %v1010_v45, %v1021_v56  ;;  %v1022_v62 = vsub.f32 %v953_v44, %v1021_v56 }
 0x31c   : > { %v1149_v58 = vpop.permute.xlu0 %1148 }
 0x31d   : > { %v1026_v59 = vmul.f32 1.442695, %v1025_v57  ;;  %v1154_v60 = vsel %vm912_vm2, %v1149_v58, 0  ;;  %v1023_v63 = vmul.f32 1.442695, %v1022_v62 }
 0x31e   : > { %2322 = vmatpush3.bf16.xpose.msra.mxu0 %v1154_v60 }
 0x31f   : > { %2335 = vmatprep.subr.bf16.mxu0 %v2990_v0  ;;  %2573 = vpow2.f32 %v1026_v59 }
 0x320   : > { %2575 = vpow2.f32 %v1023_v63 }
 0x325   : > { %2324 = vmatmul.mubr.msk.bf16.vlgmr.msra.gmra.mxu0 %vm912_vm2, %v1146_v1 }
 0x326   : > { %2339 = vmatprep.mubr.msk.bf16.mxu0 %vm2991_vm0, %v2990_v0 }
 0x32c   : > { %v3460_v5 = vpop.eup %2573 }
 0x32d   : > { %v1037_v7 = vpack.c.bf16 %v3460_v5, %v3460_v5  ;;  %v3470_v9 = vpop.eup %2575 }
 0x32e   : > { %v1036_v11 = vpack.c.bf16 %v3470_v9, %v3470_v9 }
 0x32f   : > { %2312 = vmatmul.mubr.msk.bf16.vlgmr.msra.gmra.mxu1 %vm719_vm1, %v1037_v7 }
 0x330   : > { %2316 = vmatpush3.bf16.msra.mxu1 %v1098_v8  ;;  %2317 = vmatprep.mubr.msk.bf16.mxu1 %vm2991_vm0, %v2990_v0 }
 0x331   : > { %2327 = vmatprep.subr.bf16.mxu1 %v2990_v0 }
 0x337   : > { %2318 = vmatmul.mubr.msk.bf16.vlgmr.msra.gmra.mxu1 %vm912_vm2, %v1036_v11 }
 0x338   : > { %2328 = vmatpush3.bf16.xpose.msra.mxu1 %v1204_v10  ;;  %2331 = vmatprep.mubr.msk.bf16.mxu1 %vm2991_vm0, %v2990_v0 }
 0x339   : > { %2329 = vmatprep.subr.bf16.mxu1 %v2990_v0 }
 0x340   : > { %2330 = vmatpush3.bf16.xpose.msra.mxu1 %v1201_v13 }
 0x341   : > { %2349 = vmatprep.subr.bf16.mxu1 %v2990_v0 }
 0x347   : > { %2332 = vmatmul.mubr.msk.bf16.vlgmr.msra.gmra.mxu1 %vm912_vm2, %v1146_v1 }
 0x348   : > { %2351 = vmatprep.mubr.msk.bf16.mxu1 %vm2991_vm0, %v2990_v0 }
 0x3e5   : > { %v1190_v14 = vpop.f32.mrf.mxu0 }
 0x3e6   : > { %v1246_v16 = vsel %vm912_vm2, %v1190_v14, -inf }
 0x3e7   : > { %1247 = vmax.xlane.f32.xlu1 %v1246_v16  ;;  %v2325_v17 = vpop.f32.mrf.mxu0 }
 0x3e9   : > { %v1193_v18 = vpop.f32.mrf.mxu0 }
 0x3eb   : > { %v2326_v19 = vpop.f32.mrf.mxu0 }
 0x3ef   : > { %v1087_v20 = vpop.f32.mrf.mxu1 }
 0x3f1   : > { %v2313_v21 = vpop.f32.mrf.mxu1 }
 0x3f3   : > { %v1090_v22 = vpop.f32.mrf.mxu1 }
 0x3f5   : > { %v2314_v23 = vpop.f32.mrf.mxu1 }
 0x3f7   : > { %v1134_v25 = vpop.f32.mrf.mxu1 }
 0x3f8   : > { %1271 = vrot.lane.b32.xlu1 %v3445_v51, %s2992_s14  ;;  %v3487_v27 = vadd.f32 %v1134_v25, %v1087_v20 }
 0x3f9   : > { %v2319_v28 = vpop.f32.mrf.mxu1 }
 0x3fb   : > { %v1137_v29 = vpop.f32.mrf.mxu1 }
 0x3fc   : > { %1319 = vrot.lane.b32.xlu1 %v3458_v4, %s2992_s14 }
 0x3fd   : > { %v2320_v30 = vpop.f32.mrf.mxu1 }
 0x400   : > { %1429 = vrot.lane.b32.xlu1 %v3400_v12, %s2994_s16 }
 0x404   : > { %1427 = vrot.lane.b32.xlu1 %v3412_v15, %s2994_s16 }
 0x407   : > { %v1240_v31 = vpop.f32.mrf.mxu1 }
 0x408   : > { %1379 = vrot.lane.b32.xlu1 %v3421_v24, %s2994_s16  ;;  %v1241_v32 = vadd.f32 %v1240_v31, %v3438_v42 }
 0x409   : > { %v2333_v33 = vpop.f32.mrf.mxu1 }
 0x40a   : > { %v1249_v34 = vsel %vm719_vm1, %v1241_v32, -inf }
 0x40b   : > { %1250 = vmax.xlane.f32.xlu0 %v1249_v34  ;;  %v1243_v35 = vpop.f32.mrf.mxu1 }
 0x40c   : > { %1377 = vrot.lane.b32.xlu1 %v3423_v26, %s2994_s16 }
 0x40d   : > { %v2334_v36 = vpop.f32.mrf.mxu1 }
 0x421   : > { %1269 = vrot.lane.b32.xlu0 %v3448_v52, %s2992_s14 }
 0x470   : > { %v1248_v37 = vpop.xlane.xlu1 %1247 }
 0x474   : > { %v1272_v38 = vpop.permute.xlu1 %1271 }
 0x475   : > { %2336 = vmatpush3.bf16.msra.mxu0 %v1272_v38 }
 0x476   : > { %2337 = vmatprep.subr.bf16.mxu0 %v2990_v0 }
 0x478   : > { %v1320_v39 = vpop.permute.xlu1 %1319 }
 0x479   : > { %v1325_v57 = vsel %vm1096_vm4, %v1320_v39, 0 }
 0x47c   : > { %v1430_v40 = vpop.permute.xlu1 %1429 }
 0x47d   : > { %v1435_v59 = vsel %vm912_vm2, %v1430_v40, 0 }
 0x480   : > { %v1428_v41 = vpop.permute.xlu1 %1427 }
 0x481   : > { %v1432_v61 = vsel %vm912_vm2, %v1428_v41, 0 }
 0x484   : > { %v1380_v43 = vpop.permute.xlu1 %1379 }
 0x485   : > { %v1385_v44 = vsel %vm912_vm2, %v1380_v43, 0 }
 0x486   : > { %2350 = vmatpush3.bf16.xpose.msra.mxu1 %v1385_v44 }
 0x487   : > { %2363 = vmatprep.subr.bf16.mxu1 %v2990_v0 }
 0x488   : > { %v1378_v45 = vpop.permute.xlu1 %1377 }
 0x48d   : > { %2352 = vmatmul.mubr.msk.bf16.vlgmr.msra.gmra.mxu1 %vm912_vm2, %v1378_v45 }
 0x48e   : > { %2367 = vmatprep.mubr.msk.bf16.mxu1 %vm2991_vm0, %v2990_v0 }
 0x494   : > { %v1251_v46 = vpop.xlane.xlu0 %1250 }
 0x495   : > { %v1252_v47 = vmax.f32 %v1248_v37, %v1251_v46 }
 0x497   : > { %v1256_v48 = vsub.f32 %v1241_v32, %v1252_v47  ;;  %v1253_v53 = vsub.f32 %v1190_v14, %v1252_v47 }
 0x498   : > { %v1270_v49 = vpop.permute.xlu0 %1269 }
 0x499   : > { %v1257_v50 = vmul.f32 1.442695, %v1256_v48  ;;  %2338 = vmatpush3.bf16.msra.mxu0 %v1270_v49  ;;  %v1254_v54 = vmul.f32 1.442695, %v1253_v53 }
 0x49a   : > { %2343 = vmatprep.subr.bf16.mxu0 %v2990_v0 }
 0x49b   : > { %2577 = vpow2.f32 %v1257_v50 }
 0x49c   : > { %2579 = vpow2.f32 %v1254_v54 }
 0x4a8   : > { %v3510_v55 = vpop.eup %2577 }
 0x4a9   : > { %v1268_v56 = vpack.c.bf16 %v3510_v55, %v3510_v55  ;;  %v3519_v58 = vpop.eup %2579 }
 0x4aa   : > { %v1267_v60 = vpack.c.bf16 %v3519_v58, %v3519_v58 }
 0x4ab   : > { %2340 = vmatmul.mubr.msk.bf16.vlgmr.msra.gmra.mxu0 %vm719_vm1, %v1268_v56 }
 0x4ac   : > { %2344 = vmatpush3.bf16.msra.mxu0 %v1325_v57  ;;  %2345 = vmatprep.mubr.msk.bf16.mxu0 %vm2991_vm0, %v2990_v0 }
 0x4ad   : > { %2355 = vmatprep.subr.bf16.mxu0 %v2990_v0 }
 0x4b3   : > { %2346 = vmatmul.mubr.msk.bf16.vlgmr.msra.gmra.mxu0 %vm912_vm2, %v1267_v60 }
 0x4b4   : > { %2356 = vmatpush3.bf16.xpose.msra.mxu0 %v1435_v59  ;;  %2359 = vmatprep.mubr.msk.bf16.mxu0 %vm2991_vm0, %v2990_v0 }
 0x4b5   : > { %2357 = vmatprep.subr.bf16.mxu0 %v2990_v0 }
 0x4bc   : > { %2358 = vmatpush3.bf16.xpose.msra.mxu0 %v1432_v61 }
 0x4bd   : > { %2377 = vmatprep.subr.bf16.mxu0 %v2990_v0 }
 0x4c3   : > { %2360 = vmatmul.mubr.msk.bf16.vlgmr.msra.gmra.mxu0 %vm912_vm2, %v1378_v45 }
 0x4c4   : > { %2379 = vmatprep.mubr.msk.bf16.mxu0 %vm2991_vm0, %v2990_v0 }
 0x54d   : > { %v1421_v62 = vpop.f32.mrf.mxu1 }
 0x54e   : > { %v1477_v63 = vsel %vm912_vm2, %v1421_v62, -inf }
 0x54f   : > { %1478 = vmax.xlane.f32.xlu0 %v1477_v63  ;;  %v2353_v1 = vpop.f32.mrf.mxu1 }
 0x551   : > { %v1424_v2 = vpop.f32.mrf.mxu1 }
 0x553   : > { %v2354_v3 = vpop.f32.mrf.mxu1 }
 0x565   : > { %1502 = vrot.lane.b32.xlu0 %v3445_v51, %s2994_s16 }
 0x569   : > { %1549 = vrot.lane.b32.xlu0 %v3458_v4, %s2994_s16 }
 0x56b   : > { %v1312_v7 = vpop.f32.mrf.mxu0 }
 0x56d   : > { %1657 = vrot.lane.b32.xlu0 %v3412_v15, %s2995_s13  ;;  %v2341_v8 = vpop.f32.mrf.mxu0 }
 0x56f   : > { %v1315_v10 = vpop.f32.mrf.mxu0 }
 0x571   : > { %1607 = vrot.lane.b32.xlu0 %v3423_v26, %s2995_s13  ;;  %v2342_v11 = vpop.f32.mrf.mxu0 }
 0x573   : > { %v1361_v13 = vpop.f32.mrf.mxu0 }
 0x574   : > { %v3542_v14 = vadd.f32 %v1361_v13, %v1312_v7  ;;  %v1262_v13 = vsel %vm719_vm1, %v3510_v55, 0.0 }
 0x575   : > { %v2347_v16 = vpop.f32.mrf.mxu0 }
 0x577   : > { %v1364_v17 = vpop.f32.mrf.mxu0 }
 0x579   : > { %v2348_v18 = vpop.f32.mrf.mxu0 }
 0x583   : > { %v1471_v19 = vpop.f32.mrf.mxu0 }
 0x584   : > { %v1472_v20 = vadd.f32 %v1471_v19, %v3438_v42 }
 0x585   : > { %v2361_v21 = vpop.f32.mrf.mxu0 }
 0x586   : > { %v1480_v22 = vsel %vm719_vm1, %v1472_v20, -inf }
 0x587   : > { %1481 = vmax.xlane.f32.xlu1 %v1480_v22  ;;  %v1474_v15 = vpop.f32.mrf.mxu0 }
 0x589   : > { %v2362_v23 = vpop.f32.mrf.mxu0 }
 0x598   : > { %1500 = vrot.lane.b32.xlu1 %v3448_v52, %s2994_s16 }
 0x59c   : > { %1659 = vrot.lane.b32.xlu1 %v3400_v12, %s2995_s13 }
 0x5a0   : > { %1609 = vrot.lane.b32.xlu1 %v3421_v24, %s2995_s13 }
 0x5d8   : > { %v1479_v26 = vpop.xlane.xlu0 %1478 }
 0x5dc   : > { %v1503_v25 = vpop.permute.xlu0 %1502 }
 0x5dd   : > { %2364 = vmatpush3.bf16.msra.mxu1 %v1503_v25 }
 0x5de   : > { %2365 = vmatprep.subr.bf16.mxu1 %v2990_v0 }
 0x5e0   : > { %v1550_v34 = vpop.permute.xlu0 %1549 }
 0x5e1   : > { %v1555_v41 = vsel %vm1096_vm4, %v1550_v34, 0 }
 0x5e4   : > { %v1658_v37 = vpop.permute.xlu0 %1657 }
 0x5e5   : > { %v1662_v46 = vsel %vm912_vm2, %v1658_v37, 0 }
 0x5e8   : > { %v1608_v38 = vpop.permute.xlu0 %1607 }
 0x610   : > { %v1482_v28 = vpop.xlane.xlu1 %1481 }
 0x611   : > { %v1483_v29 = vmax.f32 %v1479_v26, %v1482_v28 }
 0x613   : > { %v1487_v30 = vsub.f32 %v1472_v20, %v1483_v29  ;;  %v1484_v33 = vsub.f32 %v1421_v62, %v1483_v29 }
 0x614   : > { %v1501_v31 = vpop.permute.xlu1 %1500 }
 0x615   : > { %v1488_v32 = vmul.f32 1.442695, %v1487_v30  ;;  %2366 = vmatpush3.bf16.msra.mxu1 %v1501_v31  ;;  %v1485_v35 = vmul.f32 1.442695, %v1484_v33  ;;  %v1028_v30 = vsel %vm912_vm2, %v3470_v9, 0.0  ;;  %v1031_v31 = vsel %vm719_vm1, %v3460_v5, 0.0 }
 0x616   : > { %2371 = vmatprep.subr.bf16.mxu1 %v2990_v0 }
 0x617   : > { %2581 = vpow2.f32 %v1488_v32 }
 0x618   : > { %v1660_v12 = vpop.permute.xlu1 %1659  ;;  %2583 = vpow2.f32 %v1485_v35 }
 0x619   : > { %v1665_v44 = vsel %vm912_vm2, %v1660_v12, 0 }
 0x61c   : > { %v1610_v36 = vpop.permute.xlu1 %1609 }
 0x61d   : > { %v1615_v24 = vsel %vm912_vm2, %v1610_v36, 0 }
 0x61e   : > { %2378 = vmatpush3.bf16.xpose.msra.mxu0 %v1615_v24 }
 0x61f   : > { %2391 = vmatprep.subr.bf16.mxu0 %v2990_v0 }
 0x624   : > { %v2582_v39 = vpop.eup %2581 }
 0x625   : > { %2380 = vmatmul.mubr.msk.bf16.vlgmr.msra.gmra.mxu0 %vm912_vm2, %v1608_v38  ;;  %v1499_v40 = vpack.c.bf16 %v2582_v39, %v2582_v39  ;;  %v2584_v43 = vpop.eup %2583 }
 0x626   : > { %2395 = vmatprep.mubr.msk.bf16.mxu0 %vm2991_vm0, %v2990_v0  ;;  %v1498_v45 = vpack.c.bf16 %v2584_v43, %v2584_v43 }
 0x627   : > { %2368 = vmatmul.mubr.msk.bf16.vlgmr.msra.gmra.mxu1 %vm719_vm1, %v1499_v40 }
 0x628   : > { %2372 = vmatpush3.bf16.msra.mxu1 %v1555_v41  ;;  %2373 = vmatprep.mubr.msk.bf16.mxu1 %vm2991_vm0, %v2990_v0 }
 0x629   : > { %2383 = vmatprep.subr.bf16.mxu1 %v2990_v0 }
 0x62f   : > { %2374 = vmatmul.mubr.msk.bf16.vlgmr.msra.gmra.mxu1 %vm912_vm2, %v1498_v45 }
 0x630   : > { %2384 = vmatpush3.bf16.xpose.msra.mxu1 %v1665_v44  ;;  %2387 = vmatprep.mubr.msk.bf16.mxu1 %vm2991_vm0, %v2990_v0 }
 0x631   : > { %2385 = vmatprep.subr.bf16.mxu1 %v2990_v0 }
 0x638   : > { %2386 = vmatpush3.bf16.xpose.msra.mxu1 %v1662_v46 }
 0x639   : > { %2405 = vmatprep.subr.bf16.mxu1 %v2990_v0 }
 0x63f   : > { %2388 = vmatmul.mubr.msk.bf16.vlgmr.msra.gmra.mxu1 %vm912_vm2, %v1608_v38 }
 0x640   : > { %2409 = vmatprep.mubr.msk.bf16.mxu1 %vm2991_vm0, %v2990_v0 }
 0x6e5   : > { %v1651_v47 = vpop.f32.mrf.mxu0 }
 0x6e6   : > { %v1707_v48 = vsel %vm912_vm2, %v1651_v47, -inf }
 0x6e7   : > { %1708 = vmax.xlane.f32.xlu1 %v1707_v48  ;;  %v2381_v49 = vpop.f32.mrf.mxu0  ;;  %v1543_v50 = vpop.f32.mrf.mxu1 }
 0x6e9   : > { %v1654_v53 = vpop.f32.mrf.mxu0  ;;  %v2369_v54 = vpop.f32.mrf.mxu1 }
 0x6eb   : > { %v2382_v56 = vpop.f32.mrf.mxu0  ;;  %v1546_v57 = vpop.f32.mrf.mxu1 }
 0x6ec   : > { %v2571_v57 = vld [vmem:[#allocation20 + $0x8] sm:$0xff]  }
 0x6ed   : > { %v2370_v59 = vpop.f32.mrf.mxu1  ;;  %2406 = vmatpush3.bf16.msra.mxu1 %v2571_v57 }
 0x6ee   : > { %2407 = vmatprep.subr.bf16.mxu1 %v2990_v0 }
 0x6ef   : > { %v1591_v60 = vpop.f32.mrf.mxu1 }
 0x6f0   : > { %v3575_v61 = vadd.f32 %v1591_v60, %v1543_v50  ;;  %v2572_v60 = vld [vmem:[#allocation20] sm:$0xff]  }
 0x6f1   : > { %v2375_v62 = vpop.f32.mrf.mxu1  ;;  %2408 = vmatpush3.bf16.msra.mxu1 %v2572_v60 }
 0x6f3   : > { %v1594_v63 = vpop.f32.mrf.mxu1 }
 0x6f5   : > { %v2376_v1 = vpop.f32.mrf.mxu1 }
 0x6f8   : > { %1730 = vrot.lane.b32.xlu1 %v3448_v52, %s2995_s13  ;;  %v1259_v52 = vsel %vm912_vm2, %v3519_v58, 0.0 }
 0x6fc   : > { %1779 = vrot.lane.b32.xlu1 %v3458_v4, %s2995_s13  ;;  %v1490_v4 = vsel %vm912_vm2, %v2584_v43, 0.0 }
 0x6ff   : > { %v1701_v2 = vpop.f32.mrf.mxu1 }
 0x700   : > { %v1702_v3 = vadd.f32 %v1701_v2, %v3438_v42  ;;  %v1493_v42 = vsel %vm719_vm1, %v2582_v39, 0.0 }
 0x701   : > { %v2389_v7 = vpop.f32.mrf.mxu1 }
 0x702   : > { %v1710_v8 = vsel %vm719_vm1, %v1702_v3, -inf }
 0x703   : > { %1711 = vmax.xlane.f32.xlu0 %v1710_v8  ;;  %v1704_v10 = vpop.f32.mrf.mxu1 }
 0x705   : > { %v2390_v11 = vpop.f32.mrf.mxu1 }
 0x719   : > { %1732 = vrot.lane.b32.xlu0 %v3445_v51, %s2995_s13  ;;  %s3743_s13 = sld [smem:[#allocation43_spill]] }
 0x720   : > { %1263 = vadd.xlane.f32.xlu1 %v1262_v13 }
 0x738   : > { %1260 = vadd.xlane.f32.xlu0 %v1259_v52 }
 0x73c   : > { %1491 = vadd.xlane.f32.xlu0 %v1490_v4 }
 0x740   : > { %1494 = vadd.xlane.f32.xlu0 %v1493_v42 }
 0x770   : > { %v1709_v16 = vpop.xlane.xlu1 %1708 }
 0x774   : > { %v1731_v55 = vpop.permute.xlu1 %1730 }
 0x778   : > { %v1780_v23 = vpop.permute.xlu1 %1779 }
 0x779   : > { %v1785_v29 = vsel %vm1096_vm4, %v1780_v23, 0  ;;  %v2208_v23 = vld [vmem:[%s3741_s18] ss:$0 sm:$0xff] }
 0x78c   : > { %v1712_v17 = vpop.xlane.xlu0 %1711 }
 0x78d   : > { %v1713_v18 = vmax.f32 %v1709_v16, %v1712_v17 }
 0x78f   : > { %v1714_v19 = vsub.f32 %v1651_v47, %v1713_v18  ;;  %v1717_v20 = vsub.f32 %v1702_v3, %v1713_v18 }
 0x790   : > { %v1733_v51 = vpop.permute.xlu0 %1732 }
 0x791   : > { %v1715_v21 = vmul.f32 1.442695, %v1714_v19  ;;  %v1718_v22 = vmul.f32 1.442695, %v1717_v20  ;;  %2392 = vmatpush3.bf16.msra.mxu0 %v1733_v51 }
 0x792   : > { %2393 = vmatprep.subr.bf16.mxu0 %v2990_v0 }
 0x793   : > { %2585 = vpow2.f32 %v1715_v21 }
 0x794   : > { %2587 = vpow2.f32 %v1718_v22 }
 0x795   : > { %2394 = vmatpush3.bf16.msra.mxu0 %v1731_v55 }
 0x796   : > { %2399 = vmatprep.subr.bf16.mxu0 %v2990_v0 }
 0x7a0   : > { %v2586_v58 = vpop.eup %2585 }
 0x7a1   : > { %v2588_v15 = vpop.eup %2587  ;;  %v1720_v26 = vsel %vm912_vm2, %v2586_v58, 0.0  ;;  %v1728_v32 = vpack.c.bf16 %v2586_v58, %v2586_v58 }
 0x7a2   : > { %v1723_v25 = vsel %vm719_vm1, %v2588_v15, 0.0  ;;  %1721 = vadd.xlane.f32.xlu1 %v1720_v26  ;;  %v1729_v28 = vpack.c.bf16 %v2588_v15, %v2588_v15 }
 0x7a3   : > { %1724 = vadd.xlane.f32.xlu0 %v1723_v25  ;;  %v2209_v25 = vld [vmem:[%s3742_s30] ss:$0 sm:$0xff] }
 0x7a4   : > { %2396 = vmatmul.mubr.msk.bf16.vlgmr.msra.gmra.mxu0 %vm719_vm1, %v1729_v28 }
 0x7a5   : > { %2400 = vmatpush3.bf16.msra.mxu0 %v1785_v29  ;;  %2401 = vmatprep.mubr.msk.bf16.mxu0 %vm2991_vm0, %v2990_v0  ;;  %v2204_v0 = vld [vmem:[%s3739_s17] ss:$0 sm:$0xff] }
 0x7a6   : > { %1029 = vadd.xlane.f32.xlu1 %v1028_v30 }
 0x7a7   : > { %1032 = vadd.xlane.f32.xlu0 %v1031_v31 }
 0x7a9   : > { %v1264_v33 = vpop.xlane.xlu1 %1263 }
 0x7ac   : > { %2402 = vmatmul.mubr.msk.bf16.vlgmr.msra.gmra.mxu0 %vm912_vm2, %v1728_v32 }
 0x7c1   : > { %v1261_v34 = vpop.xlane.xlu0 %1260 }
 0x7c2   : > { %v1265_v12 = vadd.f32 %v1264_v33, %v1261_v34 }
 0x7c4   : > { %2589 = vrcp.f32 %v1265_v12 }
 0x7c5   : > { %v1492_v35 = vpop.xlane.xlu0 %1491 }
 0x7c9   : > { %v1495_v36 = vpop.xlane.xlu0 %1494 }
 0x7ca   : > { %v1496_v24 = vadd.f32 %v1495_v36, %v1492_v35 }
 0x7cc   : > { %2591 = vrcp.f32 %v1496_v24 }
 0x7d1   : > { %v2590_v9 = vpop.eup %2589 }
 0x7d2   : > { %v1367_v37 = vmul.f32 %v2590_v9, %v3542_v14 }
 0x7d4   : > { %v2214_v38 = vpack.c.bf16 %v1367_v37, %v1367_v37 }
 0x7d6   : > { %1372 = vrot.lane.b32.xlu1 %v2214_v38, %s2996_s28  ;;  %s1948_s28 = scalar_lea.hbm %s3743_s13, %s2211_s29 }
 0x7d9   : > { %v2592_v5 = vpop.eup %2591 }
 0x7da   : > { %v1597_v39 = vmul.f32 %v2592_v5, %v3575_v61 }
 0x7dc   : > { %v2215_v40 = vpack.c.bf16 %v1597_v39, %v1597_v39 }
 0x7de   : > { %1602 = vrot.lane.b32.xlu0 %v2215_v40, %s2997_s10  ;;  %s1937_s10 = scalar_lea.sflag [#allocation5], %s3338_s0 }
 0x82b   : > { %v1722_v41 = vpop.xlane.xlu1 %1721 }
 0x82c   : > { %v1725_v43 = vpop.xlane.xlu0 %1724 }
 0x82d   : > { %v1726_v53 = vadd.f32 %v1725_v43, %v1722_v41 }
 0x82f   : > { %v1030_v44 = vpop.xlane.xlu1 %1029 }
 0x830   : > { %v1033_v45 = vpop.xlane.xlu0 %1032 }
 0x831   : > { %v1034_v46 = vadd.f32 %v1033_v45, %v1030_v44 }
 0x833   : > { %2593 = vrcp.f32 %v1034_v46 }
 0x834   : > { %2595 = vrcp.f32 %v1726_v53 }
 0x840   : > { %v2594_v47 = vpop.eup %2593 }
 0x841   : > { %v1140_v48 = vmul.f32 %v2594_v47, %v3487_v27  ;;  %v2596_v63 = vpop.eup %2595 }
 0x843   : > { %v1141_v14 = vpack.c.bf16 %v1140_v48, %v1140_v48 }
 0x845   : > { %1143 = vst.msk [vmem:[#allocation2] sm:$0xf] %vm1142_vm5, %v1141_v14 }
 0x848   : > { %v1373_v49 = vpop.permute.xlu1 %1372 }
 0x849   : > { %1376 = vst.msk [vmem:[#allocation2] sm:$0xf] %vm1375_vm6, %v1373_v49 }
 0x850   : > { %v1603_v50 = vpop.permute.xlu0 %1602 }
 0x851   : > { %1606 = vst.msk [vmem:[#allocation2] sm:$0xf] %vm1605_vm7, %v1603_v50 }
 0x864   : > { %v1773_v54 = vpop.f32.mrf.mxu0 }
 0x866   : > { %v2397_v56 = vpop.f32.mrf.mxu0 }
 0x868   : > { %v1776_v59 = vpop.f32.mrf.mxu0 }
 0x86a   : > { %v2398_v27 = vpop.f32.mrf.mxu0 }
 0x86c   : > { %v1821_v61 = vpop.f32.mrf.mxu0 }
 0x86d   : > { %v1822_v62 = vadd.f32 %v1821_v61, %v1773_v54 }
 0x86e   : > { %v2403_v1 = vpop.f32.mrf.mxu0 }
 0x86f   : > { %v1827_v2 = vmul.f32 %v2596_v63, %v1822_v62 }
 0x870   : > { %v1824_v3 = vpop.f32.mrf.mxu0 }
 0x871   : > { %v2216_v7 = vpack.c.bf16 %v1827_v2, %v1827_v2 }
 0x872   : > { %v2404_v8 = vpop.f32.mrf.mxu0 }
 0x873   : > { %1832 = vrot.lane.b32.xlu1 %v2216_v7, %s2998_s26  ;;  %s2891_s26 = scalar_lea.vmem %s1951_s12, 128 }
 0x874   : > { %p2892_p9 = scmp.ne.s32.totalorder %s1951_s12, %s2891_s26  ;;  %p2899_p11 = scmp.lt.s32.totalorder %s2897_s24, %s2891_s26 }
 0x876   : > { %p2893_p7 = pnand %p2892_p9, %p3744_p3  ;;  %p2900_p4 = por %p2899_p11, %p2898_p0 }
 0x878   : > { %p2894_p6 = pneg %p2893_p7 }
 0x87a   : > { %p2901_p1 = pnand %p2900_p4, %p2894_p6 }
 0x8e5   : > { %v1833_v10 = vpop.permute.xlu1 %1832 }
 0x8e6   : > { %1836 = vst.msk [vmem:[#allocation2] sm:$0xf] %vm1835_vm8, %v1833_v10 }
 0x8ed   : > { %v1837_v11 = vld [vmem:[#allocation2] sm:$0xf] }
 0x8ee   : > { %2410 = vmatmul.mubr.msk.bf16.vlgmr.msra.gmra.mxu1 %vm719_vm1, %v1837_v11 }
 0x9ae   : > { %v1898_v13 = vpop.f32.mrf.mxu1 }
 0x9af   : > { %v1899_v52 = vadd.f32 %v2204_v0, %v1898_v13 }
 0x9b0   : > { %v2411_v4 = vpop.f32.mrf.mxu1 }
 0x9b1   : > { %v1904_v42 = vadd.f32 %v1899_v52, %v3382_v6 }
 0x9b2   : > { %v1901_v16 = vpop.f32.mrf.mxu1 }
 0x9b3   : > { %v1905_v17 = vsel %vm719_vm1, %v1904_v42, 0.0 }
 0x9b4   : > { %1906 = vadd.xlane.f32.xlu1 %v1905_v17  ;;  %v2412_v18 = vpop.f32.mrf.mxu1 }
 0xa3d   : > { %v1907_v19 = vpop.xlane.xlu1 %1906 }
 0xa3e   : > { %v1909_v20 = vmul.f32 0.03125, %v1907_v19 }
 0xa40   : > { %v1910_v51 = vsub.f32 %v1904_v42, %v1909_v20 }
 0xa42   : > { %v1911_v21 = vmul.f32 %v1910_v51, %v1910_v51 }
 0xa44   : > { %v1912_v22 = vsel %vm719_vm1, %v1911_v21, 0.0 }
 0xa45   : > { %1913 = vadd.xlane.f32.xlu0 %v1912_v22 }
 0xace   : > { %v1914_v55 = vpop.xlane.xlu0 %1913 }
 0xacf   : > { %v1915_v58 = vmul.f32 0.03125, %v1914_v55 }
 0xad1   : > { %v1916_v15 = vadd.f32 1e-05, %v1915_v58 }
 0xad3   : > { %2597 = vrsqrt.f32 %v1916_v15 }
 0xae0   : > { %v2598_v6 = vpop.eup %2597 }
 0xae1   : > { %v1918_v26 = vmul.f32 %v2598_v6, %v1910_v51 }
 0xae3   : > { %v1926_v28 = vmul.f32 %v2208_v23, %v1918_v26 }
 0xae5   : > { %v1934_v29 = vadd.f32 %v2209_v25, %v1926_v28 }
 0xae7   : > { %1935 = vst.msk [vmem:[%s690_s7] sm:$0xff] %vm719_vm1, %v1934_v29 }
 0xae8   : > { %2904 = shalt.err (!%p2901_p1)
}
 0xae9   : > { %s2905_s21 = scalar_lea.hbm %s1948_s28, 128  ;;  %s2909_s5 = scalar_lea.hbm %s3743_s13, 256 }
 0xaea   : > { %p2906_p12 = scmp.ne.s32.totalorder %s1948_s28, %s2905_s21  ;;  %p2910_p5 = scmp.lt.s32.totalorder %s1948_s28, %s3743_s13 }
 0xaeb   : > { %p2911_p8 = scmp.lt.s32.totalorder %s2909_s5, %s2905_s21 }
 0xaec   : > { %p2907_p13 = pnand %p2906_p12, %p3744_p3 }
 0xaed   : > { %p2912_p10 = por %p2911_p8, %p2910_p5 }
 0xaee   : > { %p2908_p2 = pneg %p2907_p13 }
 0xaf0   : > { %p2913_p9 = pnand %p2912_p10, %p2908_p2 }
 0xaf2   : > { %2916 = shalt.err (!%p2913_p9)
}
 0xaf3   : > { %2451 = dma.vmem_to_hbm [thread:$0]  (%p3744_p3), %s1951_s12, 128, %s1948_s28, %s1937_s10  }
 0xaf4 PF: > { %s3745_s25 = sld [smem:[#allocation29_spill]] }
 0xaf5   : > { %s3746_s27 = sld [smem:[#allocation34_spill]] }
 0xaf6   : > { %s3747_s30 = sld [smem:[#allocation30_spill]] }
 0xafa   : > { %s1962_s29 = sand.u32 1, %s3745_s25  }
 0xafb   : > { %p3748_p7 = scmp.ne.s32.totalorder %s3746_s27, 0  ;;  %s1963_s7 = scalar_lea.sflag [#allocation5], %s1962_s29 }
 0xafc   : > { %p3749_p6 = scmp.ge.s32.totalorder %s3747_s30, 2 }
 0xafe   : > { %p2489_p0 = pnand %p3749_p6, %p3748_p7 }
 0xb00   : > { %p2490_p11 = pneg %p2489_p0 }
 0xb02   : > { %2958 = dma.done.wait (%p2490_p11), %s1963_s7, 128  }
 0xb03   : > { %2960 = vsyncadd (%p2490_p11), %s1963_s7, 4294967168  ;;  %s3750_s21 = sld [smem:[#allocation31_spill]]  ;;  %s3752_s18 = smov %s2967_s19 }
 0xb04   : > { %s3751_s14 = sld [smem:[#allocation32_spill]]  ;;  %s3753_s19 = smov %s2971_s20 }
 0xb09   : > { %p35_p4 = scmp.ge.s32.totalorder %s3750_s21, 4  }
 0xb0a   : > { %s3754_s20 = smov %s3751_s14 }
 0xb0b   :  { %37 = sbr.rel (!%p35_p4) target bundleno = 21 (0x15), region = 181 }
 0xb10   :  { %1968 = vsyncpa [#allocation4], 1 }
 0xb11   :  { %1970 = vsyncpa [#allocation4 + $0x1], 1 }
 0xb12   :  { %1971 = vsyncpa [#allocation7], 1 }
 0xb13   :  { %1973 = vsyncpa [#allocation7 + $0x1], 1 }
 0xb14   :  { %1974 = vsyncpa [#allocation10], 1 }
 0xb15   :  { %1975 = vsyncpa [#allocation13], 1 }
 0xb16   :  { %1976 = vsyncpa [#allocation16], 1 }
 0xb17   :  { %1977 = vsyncpa [#allocation19], 1 }
 0xb18   :  { %1978 = vsyncpa [#allocation5], 1 }
 0xb19   :  { %1980 = vsyncpa [#allocation5 + $0x1], 1 }

// kernel: tpu_custom_call.1
= control target key start
LH: loop header
LB: loop body
LE: loop exit
PB: predicated region body
PF: predicated region fallthrough
CT: control target
= control target key end

     0   :  { %s3658_s0 = inlined_call_operand.hbm [shape: f32[2,8,32], index: 0, kind: input, shape index: {}]   ;;  %s3659_s1 = inlined_call_operand.hbm [shape: f32[2,8,32], index: 1, kind: input, shape index: {}]   ;;  %s3660_s2 = inlined_call_operand.hbm [shape: f32[2,8,32], index: 2, kind: input, shape index: {}]   ;;  %s3661_s3 = inlined_call_operand.hbm [shape: bf16[32,32], index: 3, kind: input, shape index: {}]   ;;  %s3662_s4 = inlined_call_operand.hbm [shape: f32[1,32], index: 4, kind: input, shape index: {}]   ;;  %s3663_s5 = inlined_call_operand.hbm [shape: bf16[32,32], index: 5, kind: input, shape index: {}]   ;;  %s3664_s6 = inlined_call_operand.hbm [shape: f32[1,32], index: 6, kind: input, shape index: {}]   ;;  %s3665_s7 = inlined_call_operand.hbm [shape: bf16[32,32], index: 7, kind: input, shape index: {}]   ;;  %s3666_s8 = inlined_call_operand.hbm [shape: f32[1,32], index: 8, kind: input, shape index: {}]   ;;  %s3667_s9 = inlined_call_operand.vmem [shape: bf16[32,32], index: 9, kind: input, shape index: {}]   ;;  %s3668_s10 = inlined_call_operand.hbm [shape: bf16[32,32], index: 10, kind: input, shape index: {}]   ;;  %s3669_s11 = inlined_call_operand.hbm [shape: bf16[32,32], index: 11, kind: input, shape index: {}]   ;;  %s3670_s12 = inlined_call_operand.vmem [shape: f32[1,32], index: 12, kind: input, shape index: {}]   ;;  %s3671_s13 = inlined_call_operand.vmem [shape: f32[1,32], index: 13, kind: input, shape index: {}]   ;;  %s3672_s14 = inlined_call_operand.vmem [shape: f32[1,32], index: 14, kind: input, shape index: {}]   ;;  %s3673_s15 = inlined_call_operand.hbm [shape: f32[2,8,32], index: 15, kind: output, shape index: {}]  }
   0x1   :  { %3695 = sst [smem:[#allocation35_spill]] %s3658_s0 }
   0x2   :  { %3696 = sst [smem:[#allocation36_spill]] %s3661_s3 }
   0x3   :  { %3697 = sst [smem:[#allocation37_spill]] %s3663_s5 }
   0x4   :  { %3698 = sst [smem:[#allocation38_spill]] %s3665_s7 }
   0x5   :  { %3699 = sst [smem:[#allocation39_spill]] %s3668_s10 }
   0x6   :  { %3700 = sst [smem:[#allocation40_spill]] %s3670_s12 }
   0x7   :  { %3701 = sst [smem:[#allocation41_spill]] %s3671_s13 }
   0x8   :  { %3702 = sst [smem:[#allocation42_spill]] %s3672_s14 }
   0x9   :  { %3703 = sst [smem:[#allocation43_spill]] %s3673_s15 }
   0xa   :  { %20 = vsyncpa [#allocation4], 0 }
   0xb   :  { %22 = vsyncpa [#allocation4 + $0x1], 0 }
   0xc   :  { %23 = vsyncpa [#allocation7], 0 }
   0xd   :  { %25 = vsyncpa [#allocation7 + $0x1], 0 }
   0xe   :  { %26 = vsyncpa [#allocation10], 0 }
   0xf   :  { %27 = vsyncpa [#allocation13], 0 }
  0x10   :  { %28 = vsyncpa [#allocation16], 0 }
  0x11   :  { %29 = vsyncpa [#allocation19], 0 }
  0x12   :  { %30 = vsyncpa [#allocation5], 0 }
  0x13   :  { %32 = vsyncpa [#allocation5 + $0x1], 0  ;;  %s3080_s18 = smov 0   ;;  %s3082_s19 = smov 0  }
  0x14   :  { %s3084_s20 = smov 0   ;;  %s3086_s21 = smov 0  }
  0x15 LB: > { %3704 = sst [smem:[#allocation29_spill]] %s2963_s18  ;;  %s2977_s22 = smov [#allocation9]   ;;  %s2975_s21 = sphi %s3086_s21, %s3750_s21   ;;  %s2971_s20 = sphi %s3084_s20, %s3754_s20   ;;  %s2967_s19 = sphi %s3082_s19, %s3753_s19   ;;  %s2963_s18 = sphi %s3080_s18, %s3752_s18  }
  0x16   : > { %3705 = sst [smem:[#allocation30_spill]] %s2975_s21  ;;  %s411_s23 = sshll.u32 %s2977_s22, 4  ;;  %s412_s23 = int_to_ptr.vmem [resolvable:$true] %s411_s23 }
  0x17   : > { %s3101_s24 = sadd.s32 4294967295, %s2975_s21   ;;  %p2140_p0 = scmp.ge.s32.totalorder %s2975_s21, 1 }
  0x18   : > { %p3686_p1 = scmp.eq.s32.totalorder %s3101_s24, 0  ;;  %p399_p2 = scmp.lt.s32.totalorder %s2975_s21, 3 }
  0x19   : > { %s2978_s26 = smov [#allocation12]   ;;  %s2979_s29 = smov [#allocation15]  }
  0x1a   : > { %p3106_p3 = pnand %p2140_p0, %p399_p2  ;;  %s435_s27 = sshll.u32 %s2978_s26, 4  ;;  %s3119_s27 = int_to_ptr.vmem [resolvable:$true] %s435_s27 }
  0x1b   : > { %s459_s30 = sshll.u32 %s2979_s29, 4  ;;  %s2610_s17 = scalar_lea.vmem %s412_s23, 256  ;;  %s3121_s30 = int_to_ptr.vmem [resolvable:$true] %s459_s30 }
  0x1c   : > { %s3706_s25 = scalar_select %p3106_p3, 1, 0 }
  0x1d   : > { %p2453_p5 = pneg %p3106_p3  ;;  %p2611_p8 = scmp.ne.s32.totalorder %s412_s23, %s2610_s17 }
  0x1e   : > { %p2618_p11 = scmp.lt.s32.totalorder %s412_s23, %s412_s23  ;;  %p2619_p12 = scmp.lt.s32.totalorder %s2610_s17, %s2610_s17 }
  0x1f   : > { %p3115_p6 = pnand %p2453_p5, %p3686_p1 }
  0x20   : > { %p2620_p13 = por %p2619_p12, %p2618_p11 }
  0x21   : > { %s3707_s28 = scalar_select %p3115_p6, 1, 0 }
  0x22   : > { %p3125_p7 = pneg %p3115_p6 }
  0x24   : > { %s3708_s16 = scalar_select %p3125_p7, 1, 0 }
  0x25   : > { %p2613_p9 = pnand %p2611_p8, %p3125_p7 }
  0x27   : > { %p2614_p10 = pneg %p2613_p9 }
  0x29   : > { %p2621_p0 = pnand %p2620_p13, %p2614_p10 }
  0x2b   : > { %2624 = shalt.err (!%p2621_p0)
}
  0x2c   : > { %s3675_s22 = smov 64   ;;  %s3677_s26 = smov 4  }
  0x2d   : > { %s3709_s3 = sld [smem:[#allocation36_spill]]  ;;  %s2636_s14 = scalar_lea.vmem %s3119_s27, 256 }
  0x2e   : > { %p2637_p2 = scmp.ne.s32.totalorder %s3119_s27, %s2636_s14  ;;  %p2644_p9 = scmp.lt.s32.totalorder %s3119_s27, %s3119_s27 }
  0x2f   : > { %p2645_p10 = scmp.lt.s32.totalorder %s2636_s14, %s2636_s14 }
  0x30   : > { %p2639_p5 = pnand %p2637_p2, %p3125_p7 }
  0x31   : > { %p2646_p11 = por %p2645_p10, %p2644_p9 }
  0x32   : > { %p2640_p8 = pneg %p2639_p5 }
  0x33   : > { %2456 = dma.hbm_to_vmem [thread:$0]  (!%p3115_p6), %s3709_s3, 256, %s412_s23, [#allocation10], %s3675_s22, %s3675_s22, %s3677_s26  }
  0x34   : > { %p2647_p12 = pnand %p2646_p11, %p2640_p8 }
  0x36   : > { %2650 = shalt.err (!%p2647_p12)
}
  0x37   : > { %s3710_s5 = sld [smem:[#allocation37_spill]]  ;;  %s2662_s23 = scalar_lea.vmem %s3121_s30, 256 }
  0x38   : > { %p2663_p13 = scmp.ne.s32.totalorder %s3121_s30, %s2662_s23  ;;  %p2670_p5 = scmp.lt.s32.totalorder %s3121_s30, %s3121_s30 }
  0x39   : > { %p2671_p8 = scmp.lt.s32.totalorder %s2662_s23, %s2662_s23 }
  0x3a   : > { %p2665_p0 = pnand %p2663_p13, %p3125_p7 }
  0x3b   : > { %p2672_p9 = por %p2671_p8, %p2670_p5 }
  0x3c   : > { %p2666_p2 = pneg %p2665_p0 }
  0x3d   : > { %2462 = dma.hbm_to_vmem [thread:$0]  (!%p3115_p6), %s3710_s5, 256, %s3119_s27, [#allocation13], %s3675_s22, %s3675_s22, %s3677_s26  }
  0x3e   : > { %p2673_p10 = pnand %p2672_p9, %p2666_p2 }
  0x40   : > { %2676 = shalt.err (!%p2673_p10)
}
  0x41   : > { %s3711_s7 = sld [smem:[#allocation38_spill]]  ;;  %s2982_s27 = smov [#allocation18]  }
  0x42   : > { %s486_s17 = sshll.u32 %s2982_s27, 4  ;;  %s487_s17 = int_to_ptr.vmem [resolvable:$true] %s486_s17 }
  0x43   : > { %s2688_s15 = scalar_lea.vmem %s487_s17, 256  ;;  %p2696_p0 = scmp.lt.s32.totalorder %s487_s17, %s487_s17 }
  0x44   : > { %p2689_p11 = scmp.ne.s32.totalorder %s487_s17, %s2688_s15  ;;  %p2697_p2 = scmp.lt.s32.totalorder %s2688_s15, %s2688_s15 }
  0x46   : > { %p2691_p12 = pnand %p2689_p11, %p3125_p7  ;;  %p2698_p5 = por %p2697_p2, %p2696_p0 }
  0x47   : > { %2468 = dma.hbm_to_vmem [thread:$0]  (!%p3115_p6), %s3711_s7, 256, %s3121_s30, [#allocation16], %s3675_s22, %s3675_s22, %s3677_s26  }
  0x48   : > { %p2692_p13 = pneg %p2691_p12 }
  0x4a   : > { %p2699_p8 = pnand %p2698_p5, %p2692_p13 }
  0x4c   : > { %2702 = shalt.err (!%p2699_p8)
}
  0x4d   : > { %s3712_s10 = sld [smem:[#allocation39_spill]]  ;;  %s2139_s14 = sadd.s32 4294967294, %s2975_s21  }
  0x4e   : > { %s3181_s29 = sadd.s32 1, %s2975_s21   ;;  %s45_s15 = sadd.s32 1, %s2971_s20 }
  0x4f   : > { %3713 = sst [smem:[#allocation31_spill]] %s3181_s29  ;;  %s42_s27 = ssub.s32 %s2975_s21, %s3181_s29 }
  0x50   : > { %p43_p9 = scmp.eq.s32.totalorder %s42_s27, 0  ;;  %p52_p10 = scmp.ne.s32.totalorder %s2971_s20, %s2967_s19 }
  0x51   : > { %p53_p11 = scmp.eq.s32.totalorder %s2975_s21, 0  ;;  %p58_p12 = scmp.ne.s32.totalorder %s2967_s19, %s2963_s18 }
  0x52   : > { %s3192_s23 = scalar_select %p43_p9, %s2971_s20, %s45_s15  }
  0x53   : > { %2474 = dma.hbm_to_vmem [thread:$0]  (!%p3115_p6), %s3712_s10, 256, %s487_s17, [#allocation19], %s3675_s22, %s3675_s22, %s3677_s26  }
  0x54   : > { %3714 = sst [smem:[#allocation32_spill]] %s3192_s23  ;;  %p54_p13 = por %p53_p11, %p52_p10 }
  0x55   : > { %p3196_p0 = por %p3686_p1, %p58_p12  ;;  %p386_p2 = scmp.eq.s32.totalorder %s3101_s24, 1 }
  0x56   : > { %p392_p5 = scmp.eq.s32.totalorder %s2139_s14, 1  ;;  %p2500_p8 = scmp.lt.s32.totalorder %s2975_s21, 2 }
  0x57   : > { %s3715_s30 = scalar_select %p3196_p0, 1, 0 }
  0x58   : > { %s3678_s17 = sand.u32 1, %s2971_s20   ;;  %p3203_p4 = por %p386_p2, %p52_p10 }
  0x59   : > { %p3207_p3 = por %p392_p5, %p58_p12  ;;  %s3213_s15 = sshll.u32 %s3678_s17, 3 }
  0x5a   : > { %s3716_s22 = scalar_select %p3203_p4, 1, 0 }
  0x5b   : > { %s3718_s27 = scalar_select %p3207_p3, 1, 0 }
  0x5c   : > { %3717 = sst [smem:[#allocation33_spill]] %s3716_s22  ;;  %s3216_s26 = sshll.u32 %s2975_s21, 7 }
  0x5d   : > { %3719 = sst [smem:[#allocation34_spill]] %s3718_s27  ;;  %p3218_p9 = pnand %p2500_p8, %p54_p13 }
  0x5e   : > { %s540_s14 = sand.u32 1, %s2975_s21   ;;  %s3227_s10 = scalar_lea.hbm %s3659_s1, %s3216_s26 }
  0x5f   : > { %s3720_s3 = scalar_select %p3218_p9, 1, 0 }
  0x60   : > { %s544_s17 = scalar_lea.vmem [#allocation6], %s3213_s15  ;;  %s2983_s29 = smov [#allocation11]  }
  0x61   : > { %s551_s23 = sshll.u32 %s544_s17, 4  ;;  %s425_s27 = sshll.u32 %s2983_s29, 4  ;;  %s3230_s23 = int_to_ptr.vmem [resolvable:$true] %s551_s23  ;;  %s426_s27 = int_to_ptr.vmem [resolvable:$true] %s425_s27 }
  0x62   : > { %s3232_s18 = scalar_lea.sflag [#allocation7], %s540_s14  ;;  %s2703_s13 = scalar_lea.hbm %s3227_s10, 128 }
  0x63   : > { %p2704_p10 = scmp.ne.s32.totalorder %s3227_s10, %s2703_s13  ;;  %p3238_p11 = pneg %p3218_p9 }
  0x64   : > { %s2708_s17 = scalar_lea.hbm %s3659_s1, 256  ;;  %p2709_p2 = scmp.lt.s32.totalorder %s3227_s10, %s3659_s1 }
  0x65   : > { %p2706_p12 = pnand %p3238_p11, %p2704_p10  ;;  %p2710_p5 = scmp.lt.s32.totalorder %s2708_s17, %s2703_s13 }
  0x67   : > { %p2707_p13 = pneg %p2706_p12  ;;  %p2711_p8 = por %p2710_p5, %p2709_p2 }
  0x69   : > { %p2712_p1 = pnand %p2711_p8, %p2707_p13 }
  0x6b   : > { %2715 = shalt.err (!%p2712_p1)
}
  0x6c   : > { %s2716_s29 = scalar_lea.vmem %s3230_s23, 128  ;;  %s2984_s14 = smov [#allocation6]  }
  0x6d   : > { %p2717_p3 = scmp.ne.s32.totalorder %s3230_s23, %s2716_s29  ;;  %s2721_s5 = sshll.u32 %s2984_s14, 4  ;;  %s2722_s5 = int_to_ptr.vmem [resolvable:$false] %s2721_s5 }
  0x6e   : > { %s2723_s7 = scalar_lea.vmem %s2722_s5, 256  ;;  %p2724_p4 = scmp.lt.s32.totalorder %s3230_s23, %s2722_s5 }
  0x6f   : > { %p2719_p10 = pnand %p2717_p3, %p3238_p11  ;;  %p2725_p0 = scmp.lt.s32.totalorder %s2723_s7, %s2716_s29 }
  0x71   : > { %p2720_p12 = pneg %p2719_p10  ;;  %p2726_p6 = por %p2725_p0, %p2724_p4 }
  0x73   : > { %p2727_p7 = pnand %p2726_p6, %p2720_p12 }
  0x75   : > { %2730 = shalt.err (!%p2727_p7)
}
  0x76   : > { %2484 = dma.hbm_to_vmem [thread:$0]  (!%p3218_p9), %s3227_s10, 128, %s3230_s23, %s3232_s18  }
  0x77   : > { %s2742_s12 = scalar_lea.vmem %s426_s27, 16  ;;  %p3722_p3 = scmp.ne.s32.totalorder %s3708_s16, 0 }
  0x78   : > { %p2743_p1 = scmp.ne.s32.totalorder %s426_s27, %s2742_s12  ;;  %s2749_s13 = scalar_lea.vmem %s426_s27, 32 }
  0x79   : > { %p2750_p5 = scmp.lt.s32.totalorder %s426_s27, %s426_s27  ;;  %p2751_p8 = scmp.lt.s32.totalorder %s2749_s13, %s2742_s12 }
  0x7a   : > { %p2745_p13 = pnand %p2743_p1, %p3722_p3 }
  0x7b   : > { %p2752_p10 = por %p2751_p8, %p2750_p5 }
  0x7c   : > { %p2746_p2 = pneg %p2745_p13 }
  0x7e   : > { %p2753_p4 = pnand %p2752_p10, %p2746_p2 }
  0x80   : > { %2756 = shalt.err (!%p2753_p4)
}
  0x81   : > { %p3723_p6 = scmp.ne.s32.totalorder %s3707_s28, 0  ;;  %s2985_s10 = smov [#allocation14]  }
  0x82   : > { %s449_s23 = sshll.u32 %s2985_s10, 4  ;;  %s2986_s29 = smov [#allocation17]   ;;  %s450_s23 = int_to_ptr.vmem [resolvable:$true] %s449_s23 }
  0x83   : > { %2459 = dma.hbm_to_vmem [thread:$0]  (!%p3723_p6), %s3662_s4, 16, %s426_s27, [#allocation10]  }
  0x84   : > { %s473_s14 = sshll.u32 %s2986_s29, 4  ;;  %s2768_s5 = scalar_lea.vmem %s450_s23, 16  ;;  %s474_s14 = int_to_ptr.vmem [resolvable:$true] %s473_s14 }
  0x85   : > { %p2769_p7 = scmp.ne.s32.totalorder %s450_s23, %s2768_s5  ;;  %s2775_s7 = scalar_lea.vmem %s450_s23, 32 }
  0x86   : > { %p2776_p1 = scmp.lt.s32.totalorder %s450_s23, %s450_s23  ;;  %p2777_p13 = scmp.lt.s32.totalorder %s2775_s7, %s2768_s5 }
  0x87   : > { %p2771_p0 = pnand %p2769_p7, %p3722_p3 }
  0x88   : > { %p2778_p2 = por %p2777_p13, %p2776_p1 }
  0x89   : > { %p2772_p12 = pneg %p2771_p0 }
  0x8b   : > { %p2779_p5 = pnand %p2778_p2, %p2772_p12 }
  0x8d   : > { %2782 = shalt.err (!%p2779_p5)
}
  0x8e   : > { %2465 = dma.hbm_to_vmem [thread:$0]  (!%p3723_p6), %s3664_s6, 16, %s450_s23, [#allocation13]  }
  0x8f   : > { %s2794_s13 = scalar_lea.vmem %s474_s14, 16  ;;  %s2801_s22 = scalar_lea.vmem %s474_s14, 32 }
  0x90   : > { %p2795_p8 = scmp.ne.s32.totalorder %s474_s14, %s2794_s13  ;;  %p2802_p7 = scmp.lt.s32.totalorder %s474_s14, %s474_s14 }
  0x91   : > { %p2803_p0 = scmp.lt.s32.totalorder %s2801_s22, %s2794_s13 }
  0x92   : > { %p2797_p10 = pnand %p2795_p8, %p3722_p3 }
  0x93   : > { %p2804_p9 = por %p2803_p0, %p2802_p7 }
  0x94   : > { %p2798_p4 = pneg %p2797_p10 }
  0x96   : > { %p2805_p1 = pnand %p2804_p9, %p2798_p4 }
  0x98   : > { %2808 = shalt.err (!%p2805_p1)
}
  0x99   : > { %2471 = dma.hbm_to_vmem [thread:$0]  (!%p3723_p6), %s3666_s8, 16, %s474_s14, [#allocation16]  }
  0x9a   : > { %s2987_s23 = smov [#allocation20]  }
  0x9b   : > { %s499_s29 = sshll.u32 %s2987_s23, 4  ;;  %s500_s29 = int_to_ptr.vmem [resolvable:$true] %s499_s29 }
  0x9c   : > { %s2820_s5 = scalar_lea.vmem %s500_s29, 256  ;;  %p2828_p5 = scmp.lt.s32.totalorder %s500_s29, %s500_s29 }
  0x9d   : > { %p2821_p12 = scmp.ne.s32.totalorder %s500_s29, %s2820_s5  ;;  %p2829_p8 = scmp.lt.s32.totalorder %s2820_s5, %s2820_s5 }
  0x9f   : > { %p2823_p13 = pnand %p2821_p12, %p3722_p3  ;;  %p2830_p10 = por %p2829_p8, %p2828_p5 }
  0xa1   : > { %p2824_p2 = pneg %p2823_p13 }
  0xa3   : > { %p2831_p9 = pnand %p2830_p10, %p2824_p2 }
  0xa5   : > { %2834 = shalt.err (!%p2831_p9)
}
  0xa6   : > { %s3724_s7 = smov 4   ;;  %s3725_s12 = smov 64  }
  0xa7   : > { %2477 = dma.hbm_to_vmem [thread:$0]  (!%p3723_p6), %s3669_s11, 256, %s500_s29, [#allocation19], %s3725_s12, %s3725_s12, %s3724_s7  }
  0xa8   : > { %s3726_s0 = sld [smem:[#allocation35_spill]]  ;;  %s526_s28 = scalar_lea.vmem [#allocation3], %s3213_s15 }
  0xa9   : > { %s533_s17 = sshll.u32 %s526_s28, 4  ;;  %s3727_s10 = sand.u32 1, %s2971_s20   ;;  %s534_s17 = int_to_ptr.vmem [resolvable:$true] %s533_s17 }
  0xaa   : > { %s523_s23 = scalar_lea.sflag [#allocation4], %s3727_s10 }
  0xae   : > { %s3296_s22 = scalar_lea.hbm %s3726_s0, %s3216_s26  ;;  %s2840_s7 = scalar_lea.hbm %s3726_s0, 256 }
  0xaf   : > { %s2835_s5 = scalar_lea.hbm %s3296_s22, 128  ;;  %p2841_p6 = scmp.lt.s32.totalorder %s3296_s22, %s3726_s0 }
  0xb0   : > { %p2836_p3 = scmp.ne.s32.totalorder %s3296_s22, %s2835_s5  ;;  %p2842_p0 = scmp.lt.s32.totalorder %s2840_s7, %s2835_s5 }
  0xb2   : > { %p2838_p4 = pnand %p2836_p3, %p3238_p11  ;;  %p2843_p1 = por %p2842_p0, %p2841_p6 }
  0xb4   : > { %p2839_p7 = pneg %p2838_p4 }
  0xb6   : > { %p2844_p12 = pnand %p2843_p1, %p2839_p7 }
  0xb8   : > { %2847 = shalt.err (!%p2844_p12)
}
  0xb9   : > { %s2848_s16 = scalar_lea.vmem %s534_s17, 128  ;;  %s2988_s13 = smov [#allocation3]  }
  0xba   : > { %p2849_p13 = scmp.ne.s32.totalorder %s534_s17, %s2848_s16  ;;  %s2853_s28 = sshll.u32 %s2988_s13, 4  ;;  %s2854_s28 = int_to_ptr.vmem [resolvable:$false] %s2853_s28 }
  0xbb   : > { %s2855_s10 = scalar_lea.vmem %s2854_s28, 256  ;;  %p2856_p8 = scmp.lt.s32.totalorder %s534_s17, %s2854_s28 }
  0xbc   : > { %p2851_p2 = pnand %p2849_p13, %p3238_p11  ;;  %p2857_p10 = scmp.lt.s32.totalorder %s2855_s10, %s2848_s16 }
  0xbe   : > { %p2852_p5 = pneg %p2851_p2  ;;  %p2858_p9 = por %p2857_p10, %p2856_p8 }
  0xc0   : > { %p2859_p3 = pnand %p2858_p9, %p2852_p5 }
  0xc2   : > { %2862 = shalt.err (!%p2859_p3)
}
  0xc3   : > { %p3728_p4 = scmp.ne.s32.totalorder %s3720_s3, 0  ;;  %s567_s29 = scalar_lea.hbm %s3660_s2, %s3216_s26 }
  0xc4   : > { %s562_s7 = scalar_lea.vmem [#allocation8], %s3213_s15  ;;  %s2863_s14 = scalar_lea.hbm %s567_s29, 128 }
  0xc5   : > { %2481 = dma.hbm_to_vmem [thread:$0]  (!%p3728_p4), %s3296_s22, 128, %s534_s17, %s523_s23  }
  0xc6   : > { %s569_s12 = sshll.u32 %s562_s7, 4  ;;  %p2864_p7 = scmp.ne.s32.totalorder %s567_s29, %s2863_s14  ;;  %s570_s12 = int_to_ptr.vmem [resolvable:$true] %s569_s12 }
  0xc7   : > { %s2868_s28 = scalar_lea.hbm %s3660_s2, 256  ;;  %p2869_p1 = scmp.lt.s32.totalorder %s567_s29, %s3660_s2 }
  0xc8   : > { %p2866_p6 = pnand %p2864_p7, %p3238_p11  ;;  %p2870_p12 = scmp.lt.s32.totalorder %s2868_s28, %s2863_s14 }
  0xca   : > { %p2867_p0 = pneg %p2866_p6  ;;  %p2871_p13 = por %p2870_p12, %p2869_p1 }
  0xcc   : > { %p2872_p2 = pnand %p2871_p13, %p2867_p0 }
  0xce   : > { %2875 = shalt.err (!%p2872_p2)
}
  0xcf   : > { %s2876_s26 = scalar_lea.vmem %s570_s12, 128  ;;  %s2989_s15 = smov [#allocation8]  }
  0xd0   : > { %p2877_p5 = scmp.ne.s32.totalorder %s570_s12, %s2876_s26  ;;  %s2881_s22 = sshll.u32 %s2989_s15, 4  ;;  %s2882_s22 = int_to_ptr.vmem [resolvable:$false] %s2881_s22 }
  0xd1   : > { %s2883_s17 = scalar_lea.vmem %s2882_s22, 256  ;;  %p2884_p9 = scmp.lt.s32.totalorder %s570_s12, %s2882_s22 }
  0xd2   : > { %p2879_p8 = pnand %p2877_p5, %p3238_p11  ;;  %p2885_p3 = scmp.lt.s32.totalorder %s2883_s17, %s2876_s26 }
  0xd4   : > { %p2880_p10 = pneg %p2879_p8  ;;  %p2886_p7 = por %p2885_p3, %p2884_p9 }
  0xd6   : > { %p2887_p6 = pnand %p2886_p7, %p2880_p10 }
  0xd8   : > { %2890 = shalt.err (!%p2887_p6)
}
  0xd9   : > { %2487 = dma.hbm_to_vmem [thread:$0]  (!%p3728_p4), %s567_s29, 128, %s570_s12, %s3232_s18  }
  0xda   : > { %p3729_p0 = scmp.ne.s32.totalorder %s3706_s25, 0 }
  0xdb   : > { %s3338_s0 = sand.u32 (!%p3729_p0), 1, %s2967_s19   ;;  %p3730_p11 = scmp.ne.s32.totalorder (!%p3729_p0), %s3715_s30, 0 }
  0xdc   : > { %578 = sbr.rel (%p3729_p0) target bundleno = 2804 (0xaf4), region = 80  ;;  %s3341_s21 = sshll.u32 (!%p3729_p0), %s3338_s0, 3 }
  0xdd   : > { %s581_s23 = scalar_lea.sflag (!%p3729_p0), [#allocation4], %s3338_s0  ;;  %s584_s5 = scalar_lea.vmem (!%p3729_p0), [#allocation3], %s3341_s21 }
  0xe1   : > { %2934 = dma.done.wait (%p3730_p11), %s581_s23, 128  }
  0xe2   : > { %2936 = vsyncadd (%p3730_p11), %s581_s23, 4294967168  ;;  %s589_s3 = sand.u32 1, %s3101_s24   ;;  %s593_s25 = scalar_lea.vmem [#allocation6], %s3341_s21 }
  0xe3   : > { %s590_s18 = scalar_lea.sflag [#allocation7], %s589_s3 }
  0xe4   : > { %2938 = dma.done.wait (%p3730_p11), %s590_s18, 256  }
  0xe5   : > { %2940 = vsyncadd (%p3730_p11), %s590_s18, 4294967040  ;;  %s602_s27 = scalar_lea.vmem [#allocation8], %s3341_s21  ;;  %p3731_p4 = scmp.eq.s32.totalorder %s3101_s24, 0 }
  0xe7   : > { %2942 = dma.done.wait (%p3731_p4), [#allocation10], 272   ;;  %p3732_p1 = pmov %p3731_p4 }
  0xe9   : > { %2944 = vsyncadd (%p3732_p1), [#allocation10], 4294967024  ;;  %p3733_p12 = pmov %p3732_p1 }
  0xea   : > { %p3734_p13 = pmov %p3732_p1 }
  0xeb   : > { %2946 = dma.done.wait (%p3733_p12), [#allocation13], 272  }
  0xec   : > { %2948 = vsyncadd (%p3734_p13), [#allocation13], 4294967024  ;;  %p3735_p2 = pmov %p3732_p1 }
  0xed   : > { %p3736_p5 = pmov %p3732_p1 }
  0xee   : > { %2950 = dma.done.wait (%p3735_p2), [#allocation16], 272  }
  0xef   : > { %2952 = vsyncadd (%p3736_p5), [#allocation16], 4294967024  ;;  %p3737_p8 = pmov %p3732_p1 }
  0xf0   : > { %p3738_p10 = pmov %p3732_p1 }
  0xf1   : > { %2954 = dma.done.wait (%p3737_p8), [#allocation19], 512  }
  0xf2   : > { %2956 = vsyncadd (%p3738_p10), [#allocation19], 4294966784  ;;  %v2990_v0 = vmov 0.0   ;;  %vm2991_vm0 = vmmov 0   ;;  %v2561_v1 = vld [vmem:[#allocation12 + $0x8] sm:$0xff]   ;;  %v2562_v2 = vld [vmem:[#allocation9 + $0x8] sm:$0xff]   ;;  %v908_v36 = vlaneseq }
  0xf3   : > { %2277 = vmatprep.subr.bf16.mxu1 %v2990_v0  ;;  %2269 = vmatprep.subr.bf16.mxu0 %v2990_v0  ;;  %v2563_v3 = vld [vmem:[#allocation12] sm:$0xff]   ;;  %v2564_v4 = vld [vmem:[#allocation9] sm:$0xff]   ;;  %vm719_vm1 = vcmask 261120   ;;  %vm912_vm2 = vcmask 64512   ;;  %s2992_s14 = smov 120   ;;  %vm1096_vm4 = vcmask 1043456  }
  0xf4   : > { %2281 = vmatprep.mubr.msk.bf16.mxu1 %vm2991_vm0, %v2990_v0  ;;  %2273 = vmatprep.mubr.msk.bf16.mxu0 %vm2991_vm0, %v2990_v0  ;;  %v693_v5 = vld [vmem:[%s593_s25] sm:$0xff]  ;;  %v3382_v6 = vld [vmem:[%s584_s5] sm:$0xff]  ;;  %v909_v37 = vand.u32 127, %v908_v36  ;;  %v2993_v41 = vmov -1e+30   ;;  %s2994_s16 = smov 112  }
  0xf5   : > { %2278 = vmatpush3.bf16.msra.mxu1 %v2561_v1  ;;  %2270 = vmatpush3.bf16.msra.mxu0 %v2562_v2  ;;  %v764_v7 = vpack.c.bf16 %v693_v5, %v693_v5  ;;  %v695_v8 = vpack.c.bf16 %v3382_v6, %v3382_v6  ;;  %v2565_v9 = vld [vmem:[#allocation15 + $0x8] sm:$0xff]   ;;  %v2566_v10 = vld [vmem:[#allocation15] sm:$0xff]   ;;  %v3400_v12 = vld [vmem:[%s3667_s9 + $0x8] sm:$0xff]   ;;  %s2995_s13 = smov 104   ;;  %s2996_s28 = smov 8   ;;  %vm1142_vm5 = vcmask 60416  }
  0xf6   : > { %2279 = vmatprep.subr.bf16.mxu1 %v2990_v0  ;;  %2271 = vmatprep.subr.bf16.mxu0 %v2990_v0  ;;  %v694_v11 = vld [vmem:[%s602_s27] sm:$0xff]  ;;  %v973_v14 = vsel %vm912_vm2, %v3400_v12, 0  ;;  %v2173_v17 = vld [vmem:[#allocation14] ss:$0 sm:$0xff]  ;;  %vm910_vm3 = vcmp.lt.s32.totalorder %v909_v37, 30  ;;  %s2997_s10 = smov 16  }
  0xf7   : > { %v832_v13 = vpack.c.bf16 %v694_v11, %v694_v11  ;;  %v3412_v15 = vld [vmem:[%s3667_s9] sm:$0xff]   ;;  %1198 = vrot.lane.b32.xlu1 %v3400_v12, %s2992_s14  ;;  %v3438_v42 = vsel %vm910_vm3, 0.0, %v2993_v41  ;;  %v3445_v51 = vld [vmem:[#allocation18 + $0x8] sm:$0xff]   ;;  %v3448_v52 = vld [vmem:[#allocation18] sm:$0xff]   ;;  %vm1375_vm6 = vcmask 126016   ;;  %vm1605_vm7 = vcmask 191616  }
  0xf8   : > { %v970_v16 = vsel %vm912_vm2, %v3412_v15, 0  ;;  %v2169_v18 = vld [vmem:[#allocation11] ss:$0 sm:$0xff]  ;;  %v2177_v2 = vld [vmem:[#allocation17] ss:$0 sm:$0xff]  ;;  %s2998_s26 = smov 24  }
  0xf9   : > { %2280 = vmatpush3.bf16.msra.mxu1 %v2563_v3  ;;  %2272 = vmatpush3.bf16.msra.mxu0 %v2564_v4  ;;  %vm1835_vm8 = vcmask 257216   ;;  %s3739_s17 = sld [smem:[#allocation40_spill]]  ;;  %s2211_s29 = sshll.u32 %s3101_s24, 7 }
  0xfa   : > { %2293 = vmatprep.subr.bf16.mxu1 %v2990_v0  ;;  %2285 = vmatprep.subr.bf16.mxu0 %v2990_v0  ;;  %s3740_s23 = sld [smem:[#allocation33_spill]]  ;;  %s690_s7 = scalar_lea.vmem [#allocation21], %s3341_s21 }
  0xfb   : > { %1196 = vrot.lane.b32.xlu1 %v3412_v15, %s2992_s14  ;;  %s3741_s18 = sld [smem:[#allocation41_spill]]  ;;  %s1950_s12 = sshll.u32 %s690_s7, 4  ;;  %s1951_s12 = int_to_ptr.vmem [resolvable:$true] %s1950_s12 }
  0xfc   : > { %2282 = vmatmul.mubr.msk.bf16.vlgmr.msra.gmra.mxu1 %vm719_vm1, %v764_v7  ;;  %2274 = vmatmul.mubr.msk.bf16.vlgmr.msra.gmra.mxu0 %vm719_vm1, %v695_v8  ;;  %s3742_s30 = sld [smem:[#allocation42_spill]]  ;;  %s2999_s15 = smov [#allocation21]  }
  0xfd   : > { %2295 = vmatprep.mubr.msk.bf16.mxu1 %vm2991_vm0, %v2990_v0  ;;  %2286 = vmatpush3.bf16.msra.mxu0 %v2565_v9  ;;  %s2895_s22 = sshll.u32 %s2999_s15, 4  ;;  %s2896_s22 = int_to_ptr.vmem [resolvable:$false] %s2895_s22 }
  0xfe   : > { %2289 = vmatprep.mubr.msk.bf16.mxu0 %vm2991_vm0, %v2990_v0  ;;  %2287 = vmatprep.subr.bf16.mxu0 %v2990_v0  ;;  %s2897_s24 = scalar_lea.vmem %s2896_s22, 256  ;;  %p2898_p0 = scmp.lt.s32.totalorder %s1951_s12, %s2896_s22 }
 0x100   : > { %p3744_p3 = scmp.ne.s32.totalorder %s3740_s23, 0 }
 0x101   : > { %2288 = vmatpush3.bf16.msra.mxu0 %v2566_v10 }
 0x102   : > { %2299 = vmatprep.subr.bf16.mxu0 %v2990_v0 }
 0x104   : > { %2290 = vmatmul.mubr.msk.bf16.vlgmr.msra.gmra.mxu0 %vm719_vm1, %v832_v13 }
 0x105   : > { %2300 = vmatpush3.bf16.xpose.msra.mxu0 %v973_v14  ;;  %2303 = vmatprep.mubr.msk.bf16.mxu0 %vm2991_vm0, %v2990_v0 }
 0x106   : > { %2301 = vmatprep.subr.bf16.mxu0 %v2990_v0 }
 0x10d   : > { %2302 = vmatpush3.bf16.xpose.msra.mxu0 %v970_v16 }
 0x10e   : > { %2321 = vmatprep.subr.bf16.mxu0 %v2990_v0 }
 0x169   : > { %v1199_v54 = vpop.permute.xlu1 %1198 }
 0x16a   : > { %v1204_v10 = vsel %vm912_vm2, %v1199_v54, 0 }
 0x16d   : > { %v1197_v61 = vpop.permute.xlu1 %1196 }
 0x16e   : > { %v1201_v13 = vsel %vm912_vm2, %v1197_v61, 0 }
 0x1bc   : > { %v825_v19 = vpop.f32.mrf.mxu1  ;;  %v757_v21 = vpop.f32.mrf.mxu0 }
 0x1bd   : > { %v826_v20 = vadd.f32 %v2173_v17, %v825_v19  ;;  %v758_v23 = vadd.f32 %v2169_v18, %v757_v21 }
 0x1be   : > { %v2283_v22 = vpop.f32.mrf.mxu1  ;;  %v2275_v25 = vpop.f32.mrf.mxu0 }
 0x1bf   : > { %v3421_v24 = vpack.c.bf16 %v826_v20, %v826_v20  ;;  %v3423_v26 = vpack.c.bf16 %v758_v23, %v758_v23 }
 0x1c0   : > { %v828_v27 = vpop.f32.mrf.mxu1  ;;  %v760_v29 = vpop.f32.mrf.mxu0 }
 0x1c1   : > { %v917_v28 = vsel %vm912_vm2, %v3421_v24, 0  ;;  %2304 = vmatmul.mubr.msk.bf16.vlgmr.msra.gmra.mxu0 %vm912_vm2, %v3423_v26  ;;  %1145 = vrot.lane.b32.xlu1 %v3423_v26, %s2992_s14 }
 0x1c2   : > { %v2284_v30 = vpop.f32.mrf.mxu1  ;;  %2294 = vmatpush3.bf16.xpose.msra.mxu1 %v917_v28  ;;  %v2276_v31 = vpop.f32.mrf.mxu0  ;;  %2323 = vmatprep.mubr.msk.bf16.mxu0 %vm2991_vm0, %v2990_v0 }
 0x1c3   : > { %2307 = vmatprep.subr.bf16.mxu1 %v2990_v0 }
 0x1c4   : > { %v893_v32 = vpop.f32.mrf.mxu0 }
 0x1c5   : > { %v894_v3 = vadd.f32 %v2177_v2, %v893_v32 }
 0x1c6   : > { %v2291_v33 = vpop.f32.mrf.mxu0 }
 0x1c7   : > { %v3458_v4 = vpack.c.bf16 %v894_v3, %v894_v3 }
 0x1c8   : > { %v896_v34 = vpop.f32.mrf.mxu0 }
 0x1c9   : > { %2296 = vmatmul.mubr.msk.bf16.vlgmr.msra.gmra.mxu1 %vm912_vm2, %v3423_v26  ;;  %v1098_v8 = vsel %vm1096_vm4, %v3458_v4, 0 }
 0x1ca   : > { %2311 = vmatprep.mubr.msk.bf16.mxu1 %vm2991_vm0, %v2990_v0  ;;  %v2292_v35 = vpop.f32.mrf.mxu0  ;;  %2308 = vmatpush3.bf16.msra.mxu1 %v3445_v51 }
 0x1cb   : > { %2309 = vmatprep.subr.bf16.mxu1 %v2990_v0 }
 0x1ce   : > { %2310 = vmatpush3.bf16.msra.mxu1 %v3448_v52 }
 0x1cf   : > { %2315 = vmatprep.subr.bf16.mxu1 %v2990_v0 }
 0x233   : > { %v1146_v1 = vpop.permute.xlu1 %1145 }
 0x281   : > { %v1009_v38 = vpop.f32.mrf.mxu0 }
 0x282   : > { %v1010_v45 = vadd.f32 %v1009_v38, %v3438_v42 }
 0x283   : > { %v2305_v39 = vpop.f32.mrf.mxu0 }
 0x284   : > { %v1018_v49 = vsel %vm719_vm1, %v1010_v45, -inf }
 0x285   : > { %v1012_v40 = vpop.f32.mrf.mxu0 }
 0x287   : > { %v2306_v43 = vpop.f32.mrf.mxu0 }
 0x289   : > { %v953_v44 = vpop.f32.mrf.mxu1 }
 0x28a   : > { %v1015_v46 = vsel %vm912_vm2, %v953_v44, -inf }
 0x28b   : > { %1016 = vmax.xlane.f32.xlu0 %v1015_v46  ;;  %v2297_v47 = vpop.f32.mrf.mxu1 }
 0x28d   : > { %v956_v48 = vpop.f32.mrf.mxu1 }
 0x28f   : > { %v2298_v50 = vpop.f32.mrf.mxu1  ;;  %1019 = vmax.xlane.f32.xlu0 %v1018_v49 }
 0x2a5   : > { %1148 = vrot.lane.b32.xlu0 %v3421_v24, %s2992_s14 }
 0x314   : > { %v1017_v53 = vpop.xlane.xlu0 %1016 }
 0x318   : > { %v1020_v55 = vpop.xlane.xlu0 %1019 }
 0x319   : > { %v1021_v56 = vmax.f32 %v1017_v53, %v1020_v55 }
 0x31b   : > { %v1025_v57 = vsub.f32 %v1010_v45, %v1021_v56  ;;  %v1022_v62 = vsub.f32 %v953_v44, %v1021_v56 }
 0x31c   : > { %v1149_v58 = vpop.permute.xlu0 %1148 }
 0x31d   : > { %v1026_v59 = vmul.f32 1.442695, %v1025_v57  ;;  %v1154_v60 = vsel %vm912_vm2, %v1149_v58, 0  ;;  %v1023_v63 = vmul.f32 1.442695, %v1022_v62 }
 0x31e   : > { %2322 = vmatpush3.bf16.xpose.msra.mxu0 %v1154_v60 }
 0x31f   : > { %2335 = vmatprep.subr.bf16.mxu0 %v2990_v0  ;;  %2573 = vpow2.f32 %v1026_v59 }
 0x320   : > { %2575 = vpow2.f32 %v1023_v63 }
 0x325   : > { %2324 = vmatmul.mubr.msk.bf16.vlgmr.msra.gmra.mxu0 %vm912_vm2, %v1146_v1 }
 0x326   : > { %2339 = vmatprep.mubr.msk.bf16.mxu0 %vm2991_vm0, %v2990_v0 }
 0x32c   : > { %v3460_v5 = vpop.eup %2573 }
 0x32d   : > { %v1037_v7 = vpack.c.bf16 %v3460_v5, %v3460_v5  ;;  %v3470_v9 = vpop.eup %2575 }
 0x32e   : > { %v1036_v11 = vpack.c.bf16 %v3470_v9, %v3470_v9 }
 0x32f   : > { %2312 = vmatmul.mubr.msk.bf16.vlgmr.msra.gmra.mxu1 %vm719_vm1, %v1037_v7 }
 0x330   : > { %2316 = vmatpush3.bf16.msra.mxu1 %v1098_v8  ;;  %2317 = vmatprep.mubr.msk.bf16.mxu1 %vm2991_vm0, %v2990_v0 }
 0x331   : > { %2327 = vmatprep.subr.bf16.mxu1 %v2990_v0 }
 0x337   : > { %2318 = vmatmul.mubr.msk.bf16.vlgmr.msra.gmra.mxu1 %vm912_vm2, %v1036_v11 }
 0x338   : > { %2328 = vmatpush3.bf16.xpose.msra.mxu1 %v1204_v10  ;;  %2331 = vmatprep.mubr.msk.bf16.mxu1 %vm2991_vm0, %v2990_v0 }
 0x339   : > { %2329 = vmatprep.subr.bf16.mxu1 %v2990_v0 }
 0x340   : > { %2330 = vmatpush3.bf16.xpose.msra.mxu1 %v1201_v13 }
 0x341   : > { %2349 = vmatprep.subr.bf16.mxu1 %v2990_v0 }
 0x347   : > { %2332 = vmatmul.mubr.msk.bf16.vlgmr.msra.gmra.mxu1 %vm912_vm2, %v1146_v1 }
 0x348   : > { %2351 = vmatprep.mubr.msk.bf16.mxu1 %vm2991_vm0, %v2990_v0 }
 0x3e5   : > { %v1190_v14 = vpop.f32.mrf.mxu0 }
 0x3e6   : > { %v1246_v16 = vsel %vm912_vm2, %v1190_v14, -inf }
 0x3e7   : > { %1247 = vmax.xlane.f32.xlu1 %v1246_v16  ;;  %v2325_v17 = vpop.f32.mrf.mxu0 }
 0x3e9   : > { %v1193_v18 = vpop.f32.mrf.mxu0 }
 0x3eb   : > { %v2326_v19 = vpop.f32.mrf.mxu0 }
 0x3ef   : > { %v1087_v20 = vpop.f32.mrf.mxu1 }
 0x3f1   : > { %v2313_v21 = vpop.f32.mrf.mxu1 }
 0x3f3   : > { %v1090_v22 = vpop.f32.mrf.mxu1 }
 0x3f5   : > { %v2314_v23 = vpop.f32.mrf.mxu1 }
 0x3f7   : > { %v1134_v25 = vpop.f32.mrf.mxu1 }
 0x3f8   : > { %1271 = vrot.lane.b32.xlu1 %v3445_v51, %s2992_s14  ;;  %v3487_v27 = vadd.f32 %v1134_v25, %v1087_v20 }
 0x3f9   : > { %v2319_v28 = vpop.f32.mrf.mxu1 }
 0x3fb   : > { %v1137_v29 = vpop.f32.mrf.mxu1 }
 0x3fc   : > { %1319 = vrot.lane.b32.xlu1 %v3458_v4, %s2992_s14 }
 0x3fd   : > { %v2320_v30 = vpop.f32.mrf.mxu1 }
 0x400   : > { %1429 = vrot.lane.b32.xlu1 %v3400_v12, %s2994_s16 }
 0x404   : > { %1427 = vrot.lane.b32.xlu1 %v3412_v15, %s2994_s16 }
 0x407   : > { %v1240_v31 = vpop.f32.mrf.mxu1 }
 0x408   : > { %1379 = vrot.lane.b32.xlu1 %v3421_v24, %s2994_s16  ;;  %v1241_v32 = vadd.f32 %v1240_v31, %v3438_v42 }
 0x409   : > { %v2333_v33 = vpop.f32.mrf.mxu1 }
 0x40a   : > { %v1249_v34 = vsel %vm719_vm1, %v1241_v32, -inf }
 0x40b   : > { %1250 = vmax.xlane.f32.xlu0 %v1249_v34  ;;  %v1243_v35 = vpop.f32.mrf.mxu1 }
 0x40c   : > { %1377 = vrot.lane.b32.xlu1 %v3423_v26, %s2994_s16 }
 0x40d   : > { %v2334_v36 = vpop.f32.mrf.mxu1 }
 0x421   : > { %1269 = vrot.lane.b32.xlu0 %v3448_v52, %s2992_s14 }
 0x470   : > { %v1248_v37 = vpop.xlane.xlu1 %1247 }
 0x474   : > { %v1272_v38 = vpop.permute.xlu1 %1271 }
 0x475   : > { %2336 = vmatpush3.bf16.msra.mxu0 %v1272_v38 }
 0x476   : > { %2337 = vmatprep.subr.bf16.mxu0 %v2990_v0 }
 0x478   : > { %v1320_v39 = vpop.permute.xlu1 %1319 }
 0x479   : > { %v1325_v57 = vsel %vm1096_vm4, %v1320_v39, 0 }
 0x47c   : > { %v1430_v40 = vpop.permute.xlu1 %1429 }
 0x47d   : > { %v1435_v59 = vsel %vm912_vm2, %v1430_v40, 0 }
 0x480   : > { %v1428_v41 = vpop.permute.xlu1 %1427 }
 0x481   : > { %v1432_v61 = vsel %vm912_vm2, %v1428_v41, 0 }
 0x484   : > { %v1380_v43 = vpop.permute.xlu1 %1379 }
 0x485   : > { %v1385_v44 = vsel %vm912_vm2, %v1380_v43, 0 }
 0x486   : > { %2350 = vmatpush3.bf16.xpose.msra.mxu1 %v1385_v44 }
 0x487   : > { %2363 = vmatprep.subr.bf16.mxu1 %v2990_v0 }
 0x488   : > { %v1378_v45 = vpop.permute.xlu1 %1377 }
 0x48d   : > { %2352 = vmatmul.mubr.msk.bf16.vlgmr.msra.gmra.mxu1 %vm912_vm2, %v1378_v45 }
 0x48e   : > { %2367 = vmatprep.mubr.msk.bf16.mxu1 %vm2991_vm0, %v2990_v0 }
 0x494   : > { %v1251_v46 = vpop.xlane.xlu0 %1250 }
 0x495   : > { %v1252_v47 = vmax.f32 %v1248_v37, %v1251_v46 }
 0x497   : > { %v1256_v48 = vsub.f32 %v1241_v32, %v1252_v47  ;;  %v1253_v53 = vsub.f32 %v1190_v14, %v1252_v47 }
 0x498   : > { %v1270_v49 = vpop.permute.xlu0 %1269 }
 0x499   : > { %v1257_v50 = vmul.f32 1.442695, %v1256_v48  ;;  %2338 = vmatpush3.bf16.msra.mxu0 %v1270_v49  ;;  %v1254_v54 = vmul.f32 1.442695, %v1253_v53 }
 0x49a   : > { %2343 = vmatprep.subr.bf16.mxu0 %v2990_v0 }
 0x49b   : > { %2577 = vpow2.f32 %v1257_v50 }
 0x49c   : > { %2579 = vpow2.f32 %v1254_v54 }
 0x4a8   : > { %v3510_v55 = vpop.eup %2577 }
 0x4a9   : > { %v1268_v56 = vpack.c.bf16 %v3510_v55, %v3510_v55  ;;  %v3519_v58 = vpop.eup %2579 }
 0x4aa   : > { %v1267_v60 = vpack.c.bf16 %v3519_v58, %v3519_v58 }
 0x4ab   : > { %2340 = vmatmul.mubr.msk.bf16.vlgmr.msra.gmra.mxu0 %vm719_vm1, %v1268_v56 }
 0x4ac   : > { %2344 = vmatpush3.bf16.msra.mxu0 %v1325_v57  ;;  %2345 = vmatprep.mubr.msk.bf16.mxu0 %vm2991_vm0, %v2990_v0 }
 0x4ad   : > { %2355 = vmatprep.subr.bf16.mxu0 %v2990_v0 }
 0x4b3   : > { %2346 = vmatmul.mubr.msk.bf16.vlgmr.msra.gmra.mxu0 %vm912_vm2, %v1267_v60 }
 0x4b4   : > { %2356 = vmatpush3.bf16.xpose.msra.mxu0 %v1435_v59  ;;  %2359 = vmatprep.mubr.msk.bf16.mxu0 %vm2991_vm0, %v2990_v0 }
 0x4b5   : > { %2357 = vmatprep.subr.bf16.mxu0 %v2990_v0 }
 0x4bc   : > { %2358 = vmatpush3.bf16.xpose.msra.mxu0 %v1432_v61 }
 0x4bd   : > { %2377 = vmatprep.subr.bf16.mxu0 %v2990_v0 }
 0x4c3   : > { %2360 = vmatmul.mubr.msk.bf16.vlgmr.msra.gmra.mxu0 %vm912_vm2, %v1378_v45 }
 0x4c4   : > { %2379 = vmatprep.mubr.msk.bf16.mxu0 %vm2991_vm0, %v2990_v0 }
 0x54d   : > { %v1421_v62 = vpop.f32.mrf.mxu1 }
 0x54e   : > { %v1477_v63 = vsel %vm912_vm2, %v1421_v62, -inf }
 0x54f   : > { %1478 = vmax.xlane.f32.xlu0 %v1477_v63  ;;  %v2353_v1 = vpop.f32.mrf.mxu1 }
 0x551   : > { %v1424_v2 = vpop.f32.mrf.mxu1 }
 0x553   : > { %v2354_v3 = vpop.f32.mrf.mxu1 }
 0x565   : > { %1502 = vrot.lane.b32.xlu0 %v3445_v51, %s2994_s16 }
 0x569   : > { %1549 = vrot.lane.b32.xlu0 %v3458_v4, %s2994_s16 }
 0x56b   : > { %v1312_v7 = vpop.f32.mrf.mxu0 }
 0x56d   : > { %1657 = vrot.lane.b32.xlu0 %v3412_v15, %s2995_s13  ;;  %v2341_v8 = vpop.f32.mrf.mxu0 }
 0x56f   : > { %v1315_v10 = vpop.f32.mrf.mxu0 }
 0x571   : > { %1607 = vrot.lane.b32.xlu0 %v3423_v26, %s2995_s13  ;;  %v2342_v11 = vpop.f32.mrf.mxu0 }
 0x573   : > { %v1361_v13 = vpop.f32.mrf.mxu0 }
 0x574   : > { %v3542_v14 = vadd.f32 %v1361_v13, %v1312_v7  ;;  %v1262_v13 = vsel %vm719_vm1, %v3510_v55, 0.0 }
 0x575   : > { %v2347_v16 = vpop.f32.mrf.mxu0 }
 0x577   : > { %v1364_v17 = vpop.f32.mrf.mxu0 }
 0x579   : > { %v2348_v18 = vpop.f32.mrf.mxu0 }
 0x583   : > { %v1471_v19 = vpop.f32.mrf.mxu0 }
 0x584   : > { %v1472_v20 = vadd.f32 %v1471_v19, %v3438_v42 }
 0x585   : > { %v2361_v21 = vpop.f32.mrf.mxu0 }
 0x586   : > { %v1480_v22 = vsel %vm719_vm1, %v1472_v20, -inf }
 0x587   : > { %1481 = vmax.xlane.f32.xlu1 %v1480_v22  ;;  %v1474_v15 = vpop.f32.mrf.mxu0 }
 0x589   : > { %v2362_v23 = vpop.f32.mrf.mxu0 }
 0x598   : > { %1500 = vrot.lane.b32.xlu1 %v3448_v52, %s2994_s16 }
 0x59c   : > { %1659 = vrot.lane.b32.xlu1 %v3400_v12, %s2995_s13 }
 0x5a0   : > { %1609 = vrot.lane.b32.xlu1 %v3421_v24, %s2995_s13 }
 0x5d8   : > { %v1479_v26 = vpop.xlane.xlu0 %1478 }
 0x5dc   : > { %v1503_v25 = vpop.permute.xlu0 %1502 }
 0x5dd   : > { %2364 = vmatpush3.bf16.msra.mxu1 %v1503_v25 }
 0x5de   : > { %2365 = vmatprep.subr.bf16.mxu1 %v2990_v0 }
 0x5e0   : > { %v1550_v34 = vpop.permute.xlu0 %1549 }
 0x5e1   : > { %v1555_v41 = vsel %vm1096_vm4, %v1550_v34, 0 }
 0x5e4   : > { %v1658_v37 = vpop.permute.xlu0 %1657 }
 0x5e5   : > { %v1662_v46 = vsel %vm912_vm2, %v1658_v37, 0 }
 0x5e8   : > { %v1608_v38 = vpop.permute.xlu0 %1607 }
 0x610   : > { %v1482_v28 = vpop.xlane.xlu1 %1481 }
 0x611   : > { %v1483_v29 = vmax.f32 %v1479_v26, %v1482_v28 }
 0x613   : > { %v1487_v30 = vsub.f32 %v1472_v20, %v1483_v29  ;;  %v1484_v33 = vsub.f32 %v1421_v62, %v1483_v29 }
 0x614   : > { %v1501_v31 = vpop.permute.xlu1 %1500 }
 0x615   : > { %v1488_v32 = vmul.f32 1.442695, %v1487_v30  ;;  %2366 = vmatpush3.bf16.msra.mxu1 %v1501_v31  ;;  %v1485_v35 = vmul.f32 1.442695, %v1484_v33  ;;  %v1028_v30 = vsel %vm912_vm2, %v3470_v9, 0.0  ;;  %v1031_v31 = vsel %vm719_vm1, %v3460_v5, 0.0 }
 0x616   : > { %2371 = vmatprep.subr.bf16.mxu1 %v2990_v0 }
 0x617   : > { %2581 = vpow2.f32 %v1488_v32 }
 0x618   : > { %v1660_v12 = vpop.permute.xlu1 %1659  ;;  %2583 = vpow2.f32 %v1485_v35 }
 0x619   : > { %v1665_v44 = vsel %vm912_vm2, %v1660_v12, 0 }
 0x61c   : > { %v1610_v36 = vpop.permute.xlu1 %1609 }
 0x61d   : > { %v1615_v24 = vsel %vm912_vm2, %v1610_v36, 0 }
 0x61e   : > { %2378 = vmatpush3.bf16.xpose.msra.mxu0 %v1615_v24 }
 0x61f   : > { %2391 = vmatprep.subr.bf16.mxu0 %v2990_v0 }
 0x624   : > { %v2582_v39 = vpop.eup %2581 }
 0x625   : > { %2380 = vmatmul.mubr.msk.bf16.vlgmr.msra.gmra.mxu0 %vm912_vm2, %v1608_v38  ;;  %v1499_v40 = vpack.c.bf16 %v2582_v39, %v2582_v39  ;;  %v2584_v43 = vpop.eup %2583 }
 0x626   : > { %2395 = vmatprep.mubr.msk.bf16.mxu0 %vm2991_vm0, %v2990_v0  ;;  %v1498_v45 = vpack.c.bf16 %v2584_v43, %v2584_v43 }
 0x627   : > { %2368 = vmatmul.mubr.msk.bf16.vlgmr.msra.gmra.mxu1 %vm719_vm1, %v1499_v40 }
 0x628   : > { %2372 = vmatpush3.bf16.msra.mxu1 %v1555_v41  ;;  %2373 = vmatprep.mubr.msk.bf16.mxu1 %vm2991_vm0, %v2990_v0 }
 0x629   : > { %2383 = vmatprep.subr.bf16.mxu1 %v2990_v0 }
 0x62f   : > { %2374 = vmatmul.mubr.msk.bf16.vlgmr.msra.gmra.mxu1 %vm912_vm2, %v1498_v45 }
 0x630   : > { %2384 = vmatpush3.bf16.xpose.msra.mxu1 %v1665_v44  ;;  %2387 = vmatprep.mubr.msk.bf16.mxu1 %vm2991_vm0, %v2990_v0 }
 0x631   : > { %2385 = vmatprep.subr.bf16.mxu1 %v2990_v0 }
 0x638   : > { %2386 = vmatpush3.bf16.xpose.msra.mxu1 %v1662_v46 }
 0x639   : > { %2405 = vmatprep.subr.bf16.mxu1 %v2990_v0 }
 0x63f   : > { %2388 = vmatmul.mubr.msk.bf16.vlgmr.msra.gmra.mxu1 %vm912_vm2, %v1608_v38 }
 0x640   : > { %2409 = vmatprep.mubr.msk.bf16.mxu1 %vm2991_vm0, %v2990_v0 }
 0x6e5   : > { %v1651_v47 = vpop.f32.mrf.mxu0 }
 0x6e6   : > { %v1707_v48 = vsel %vm912_vm2, %v1651_v47, -inf }
 0x6e7   : > { %1708 = vmax.xlane.f32.xlu1 %v1707_v48  ;;  %v2381_v49 = vpop.f32.mrf.mxu0  ;;  %v1543_v50 = vpop.f32.mrf.mxu1 }
 0x6e9   : > { %v1654_v53 = vpop.f32.mrf.mxu0  ;;  %v2369_v54 = vpop.f32.mrf.mxu1 }
 0x6eb   : > { %v2382_v56 = vpop.f32.mrf.mxu0  ;;  %v1546_v57 = vpop.f32.mrf.mxu1 }
 0x6ec   : > { %v2571_v57 = vld [vmem:[#allocation20 + $0x8] sm:$0xff]  }
 0x6ed   : > { %v2370_v59 = vpop.f32.mrf.mxu1  ;;  %2406 = vmatpush3.bf16.msra.mxu1 %v2571_v57 }
 0x6ee   : > { %2407 = vmatprep.subr.bf16.mxu1 %v2990_v0 }
 0x6ef   : > { %v1591_v60 = vpop.f32.mrf.mxu1 }
 0x6f0   : > { %v3575_v61 = vadd.f32 %v1591_v60, %v1543_v50  ;;  %v2572_v60 = vld [vmem:[#allocation20] sm:$0xff]  }
 0x6f1   : > { %v2375_v62 = vpop.f32.mrf.mxu1  ;;  %2408 = vmatpush3.bf16.msra.mxu1 %v2572_v60 }
 0x6f3   : > { %v1594_v63 = vpop.f32.mrf.mxu1 }
 0x6f5   : > { %v2376_v1 = vpop.f32.mrf.mxu1 }
 0x6f8   : > { %1730 = vrot.lane.b32.xlu1 %v3448_v52, %s2995_s13  ;;  %v1259_v52 = vsel %vm912_vm2, %v3519_v58, 0.0 }
 0x6fc   : > { %1779 = vrot.lane.b32.xlu1 %v3458_v4, %s2995_s13  ;;  %v1490_v4 = vsel %vm912_vm2, %v2584_v43, 0.0 }
 0x6ff   : > { %v1701_v2 = vpop.f32.mrf.mxu1 }
 0x700   : > { %v1702_v3 = vadd.f32 %v1701_v2, %v3438_v42  ;;  %v1493_v42 = vsel %vm719_vm1, %v2582_v39, 0.0 }
 0x701   : > { %v2389_v7 = vpop.f32.mrf.mxu1 }
 0x702   : > { %v1710_v8 = vsel %vm719_vm1, %v1702_v3, -inf }
 0x703   : > { %1711 = vmax.xlane.f32.xlu0 %v1710_v8  ;;  %v1704_v10 = vpop.f32.mrf.mxu1 }
 0x705   : > { %v2390_v11 = vpop.f32.mrf.mxu1 }
 0x719   : > { %1732 = vrot.lane.b32.xlu0 %v3445_v51, %s2995_s13  ;;  %s3743_s13 = sld [smem:[#allocation43_spill]] }
 0x720   : > { %1263 = vadd.xlane.f32.xlu1 %v1262_v13 }
 0x738   : > { %1260 = vadd.xlane.f32.xlu0 %v1259_v52 }
 0x73c   : > { %1491 = vadd.xlane.f32.xlu0 %v1490_v4 }
 0x740   : > { %1494 = vadd.xlane.f32.xlu0 %v1493_v42 }
 0x770   : > { %v1709_v16 = vpop.xlane.xlu1 %1708 }
 0x774   : > { %v1731_v55 = vpop.permute.xlu1 %1730 }
 0x778   : > { %v1780_v23 = vpop.permute.xlu1 %1779 }
 0x779   : > { %v1785_v29 = vsel %vm1096_vm4, %v1780_v23, 0  ;;  %v2208_v23 = vld [vmem:[%s3741_s18] ss:$0 sm:$0xff] }
 0x78c   : > { %v1712_v17 = vpop.xlane.xlu0 %1711 }
 0x78d   : > { %v1713_v18 = vmax.f32 %v1709_v16, %v1712_v17 }
 0x78f   : > { %v1714_v19 = vsub.f32 %v1651_v47, %v1713_v18  ;;  %v1717_v20 = vsub.f32 %v1702_v3, %v1713_v18 }
 0x790   : > { %v1733_v51 = vpop.permute.xlu0 %1732 }
 0x791   : > { %v1715_v21 = vmul.f32 1.442695, %v1714_v19  ;;  %v1718_v22 = vmul.f32 1.442695, %v1717_v20  ;;  %2392 = vmatpush3.bf16.msra.mxu0 %v1733_v51 }
 0x792   : > { %2393 = vmatprep.subr.bf16.mxu0 %v2990_v0 }
 0x793   : > { %2585 = vpow2.f32 %v1715_v21 }
 0x794   : > { %2587 = vpow2.f32 %v1718_v22 }
 0x795   : > { %2394 = vmatpush3.bf16.msra.mxu0 %v1731_v55 }
 0x796   : > { %2399 = vmatprep.subr.bf16.mxu0 %v2990_v0 }
 0x7a0   : > { %v2586_v58 = vpop.eup %2585 }
 0x7a1   : > { %v2588_v15 = vpop.eup %2587  ;;  %v1720_v26 = vsel %vm912_vm2, %v2586_v58, 0.0  ;;  %v1728_v32 = vpack.c.bf16 %v2586_v58, %v2586_v58 }
 0x7a2   : > { %v1723_v25 = vsel %vm719_vm1, %v2588_v15, 0.0  ;;  %1721 = vadd.xlane.f32.xlu1 %v1720_v26  ;;  %v1729_v28 = vpack.c.bf16 %v2588_v15, %v2588_v15 }
 0x7a3   : > { %1724 = vadd.xlane.f32.xlu0 %v1723_v25  ;;  %v2209_v25 = vld [vmem:[%s3742_s30] ss:$0 sm:$0xff] }
 0x7a4   : > { %2396 = vmatmul.mubr.msk.bf16.vlgmr.msra.gmra.mxu0 %vm719_vm1, %v1729_v28 }
 0x7a5   : > { %2400 = vmatpush3.bf16.msra.mxu0 %v1785_v29  ;;  %2401 = vmatprep.mubr.msk.bf16.mxu0 %vm2991_vm0, %v2990_v0  ;;  %v2204_v0 = vld [vmem:[%s3739_s17] ss:$0 sm:$0xff] }
 0x7a6   : > { %1029 = vadd.xlane.f32.xlu1 %v1028_v30 }
 0x7a7   : > { %1032 = vadd.xlane.f32.xlu0 %v1031_v31 }
 0x7a9   : > { %v1264_v33 = vpop.xlane.xlu1 %1263 }
 0x7ac   : > { %2402 = vmatmul.mubr.msk.bf16.vlgmr.msra.gmra.mxu0 %vm912_vm2, %v1728_v32 }
 0x7c1   : > { %v1261_v34 = vpop.xlane.xlu0 %1260 }
 0x7c2   : > { %v1265_v12 = vadd.f32 %v1264_v33, %v1261_v34 }
 0x7c4   : > { %2589 = vrcp.f32 %v1265_v12 }
 0x7c5   : > { %v1492_v35 = vpop.xlane.xlu0 %1491 }
 0x7c9   : > { %v1495_v36 = vpop.xlane.xlu0 %1494 }
 0x7ca   : > { %v1496_v24 = vadd.f32 %v1495_v36, %v1492_v35 }
 0x7cc   : > { %2591 = vrcp.f32 %v1496_v24 }
 0x7d1   : > { %v2590_v9 = vpop.eup %2589 }
 0x7d2   : > { %v1367_v37 = vmul.f32 %v2590_v9, %v3542_v14 }
 0x7d4   : > { %v2214_v38 = vpack.c.bf16 %v1367_v37, %v1367_v37 }
 0x7d6   : > { %1372 = vrot.lane.b32.xlu1 %v2214_v38, %s2996_s28  ;;  %s1948_s28 = scalar_lea.hbm %s3743_s13, %s2211_s29 }
 0x7d9   : > { %v2592_v5 = vpop.eup %2591 }
 0x7da   : > { %v1597_v39 = vmul.f32 %v2592_v5, %v3575_v61 }
 0x7dc   : > { %v2215_v40 = vpack.c.bf16 %v1597_v39, %v1597_v39 }
 0x7de   : > { %1602 = vrot.lane.b32.xlu0 %v2215_v40, %s2997_s10  ;;  %s1937_s10 = scalar_lea.sflag [#allocation5], %s3338_s0 }
 0x82b   : > { %v1722_v41 = vpop.xlane.xlu1 %1721 }
 0x82c   : > { %v1725_v43 = vpop.xlane.xlu0 %1724 }
 0x82d   : > { %v1726_v53 = vadd.f32 %v1725_v43, %v1722_v41 }
 0x82f   : > { %v1030_v44 = vpop.xlane.xlu1 %1029 }
 0x830   : > { %v1033_v45 = vpop.xlane.xlu0 %1032 }
 0x831   : > { %v1034_v46 = vadd.f32 %v1033_v45, %v1030_v44 }
 0x833   : > { %2593 = vrcp.f32 %v1034_v46 }
 0x834   : > { %2595 = vrcp.f32 %v1726_v53 }
 0x840   : > { %v2594_v47 = vpop.eup %2593 }
 0x841   : > { %v1140_v48 = vmul.f32 %v2594_v47, %v3487_v27  ;;  %v2596_v63 = vpop.eup %2595 }
 0x843   : > { %v1141_v14 = vpack.c.bf16 %v1140_v48, %v1140_v48 }
 0x845   : > { %1143 = vst.msk [vmem:[#allocation2] sm:$0xf] %vm1142_vm5, %v1141_v14 }
 0x848   : > { %v1373_v49 = vpop.permute.xlu1 %1372 }
 0x849   : > { %1376 = vst.msk [vmem:[#allocation2] sm:$0xf] %vm1375_vm6, %v1373_v49 }
 0x850   : > { %v1603_v50 = vpop.permute.xlu0 %1602 }
 0x851   : > { %1606 = vst.msk [vmem:[#allocation2] sm:$0xf] %vm1605_vm7, %v1603_v50 }
 0x864   : > { %v1773_v54 = vpop.f32.mrf.mxu0 }
 0x866   : > { %v2397_v56 = vpop.f32.mrf.mxu0 }
 0x868   : > { %v1776_v59 = vpop.f32.mrf.mxu0 }
 0x86a   : > { %v2398_v27 = vpop.f32.mrf.mxu0 }
 0x86c   : > { %v1821_v61 = vpop.f32.mrf.mxu0 }
 0x86d   : > { %v1822_v62 = vadd.f32 %v1821_v61, %v1773_v54 }
 0x86e   : > { %v2403_v1 = vpop.f32.mrf.mxu0 }
 0x86f   : > { %v1827_v2 = vmul.f32 %v2596_v63, %v1822_v62 }
 0x870   : > { %v1824_v3 = vpop.f32.mrf.mxu0 }
 0x871   : > { %v2216_v7 = vpack.c.bf16 %v1827_v2, %v1827_v2 }
 0x872   : > { %v2404_v8 = vpop.f32.mrf.mxu0 }
 0x873   : > { %1832 = vrot.lane.b32.xlu1 %v2216_v7, %s2998_s26  ;;  %s2891_s26 = scalar_lea.vmem %s1951_s12, 128 }
 0x874   : > { %p2892_p9 = scmp.ne.s32.totalorder %s1951_s12, %s2891_s26  ;;  %p2899_p11 = scmp.lt.s32.totalorder %s2897_s24, %s2891_s26 }
 0x876   : > { %p2893_p7 = pnand %p2892_p9, %p3744_p3  ;;  %p2900_p4 = por %p2899_p11, %p2898_p0 }
 0x878   : > { %p2894_p6 = pneg %p2893_p7 }
 0x87a   : > { %p2901_p1 = pnand %p2900_p4, %p2894_p6 }
 0x8e5   : > { %v1833_v10 = vpop.permute.xlu1 %1832 }
 0x8e6   : > { %1836 = vst.msk [vmem:[#allocation2] sm:$0xf] %vm1835_vm8, %v1833_v10 }
 0x8ed   : > { %v1837_v11 = vld [vmem:[#allocation2] sm:$0xf] }
 0x8ee   : > { %2410 = vmatmul.mubr.msk.bf16.vlgmr.msra.gmra.mxu1 %vm719_vm1, %v1837_v11 }
 0x9ae   : > { %v1898_v13 = vpop.f32.mrf.mxu1 }
 0x9af   : > { %v1899_v52 = vadd.f32 %v2204_v0, %v1898_v13 }
 0x9b0   : > { %v2411_v4 = vpop.f32.mrf.mxu1 }
 0x9b1   : > { %v1904_v42 = vadd.f32 %v1899_v52, %v3382_v6 }
 0x9b2   : > { %v1901_v16 = vpop.f32.mrf.mxu1 }
 0x9b3   : > { %v1905_v17 = vsel %vm719_vm1, %v1904_v42, 0.0 }
 0x9b4   : > { %1906 = vadd.xlane.f32.xlu1 %v1905_v17  ;;  %v2412_v18 = vpop.f32.mrf.mxu1 }
 0xa3d   : > { %v1907_v19 = vpop.xlane.xlu1 %1906 }
 0xa3e   : > { %v1909_v20 = vmul.f32 0.03125, %v1907_v19 }
 0xa40   : > { %v1910_v51 = vsub.f32 %v1904_v42, %v1909_v20 }
 0xa42   : > { %v1911_v21 = vmul.f32 %v1910_v51, %v1910_v51 }
 0xa44   : > { %v1912_v22 = vsel %vm719_vm1, %v1911_v21, 0.0 }
 0xa45   : > { %1913 = vadd.xlane.f32.xlu0 %v1912_v22 }
 0xace   : > { %v1914_v55 = vpop.xlane.xlu0 %1913 }
 0xacf   : > { %v1915_v58 = vmul.f32 0.03125, %v1914_v55 }
 0xad1   : > { %v1916_v15 = vadd.f32 1e-05, %v1915_v58 }
 0xad3   : > { %2597 = vrsqrt.f32 %v1916_v15 }
 0xae0   : > { %v2598_v6 = vpop.eup %2597 }
 0xae1   : > { %v1918_v26 = vmul.f32 %v2598_v6, %v1910_v51 }
 0xae3   : > { %v1926_v28 = vmul.f32 %v2208_v23, %v1918_v26 }
 0xae5   : > { %v1934_v29 = vadd.f32 %v2209_v25, %v1926_v28 }
 0xae7   : > { %1935 = vst.msk [vmem:[%s690_s7] sm:$0xff] %vm719_vm1, %v1934_v29 }
 0xae8   : > { %2904 = shalt.err (!%p2901_p1)
}
 0xae9   : > { %s2905_s21 = scalar_lea.hbm %s1948_s28, 128  ;;  %s2909_s5 = scalar_lea.hbm %s3743_s13, 256 }
 0xaea   : > { %p2906_p12 = scmp.ne.s32.totalorder %s1948_s28, %s2905_s21  ;;  %p2910_p5 = scmp.lt.s32.totalorder %s1948_s28, %s3743_s13 }
 0xaeb   : > { %p2911_p8 = scmp.lt.s32.totalorder %s2909_s5, %s2905_s21 }
 0xaec   : > { %p2907_p13 = pnand %p2906_p12, %p3744_p3 }
 0xaed   : > { %p2912_p10 = por %p2911_p8, %p2910_p5 }
 0xaee   : > { %p2908_p2 = pneg %p2907_p13 }
 0xaf0   : > { %p2913_p9 = pnand %p2912_p10, %p2908_p2 }
 0xaf2   : > { %2916 = shalt.err (!%p2913_p9)
}
 0xaf3   : > { %2451 = dma.vmem_to_hbm [thread:$0]  (%p3744_p3), %s1951_s12, 128, %s1948_s28, %s1937_s10  }
 0xaf4 PF: > { %s3745_s25 = sld [smem:[#allocation29_spill]] }
 0xaf5   : > { %s3746_s27 = sld [smem:[#allocation34_spill]] }
 0xaf6   : > { %s3747_s30 = sld [smem:[#allocation30_spill]] }
 0xafa   : > { %s1962_s29 = sand.u32 1, %s3745_s25  }
 0xafb   : > { %p3748_p7 = scmp.ne.s32.totalorder %s3746_s27, 0  ;;  %s1963_s7 = scalar_lea.sflag [#allocation5], %s1962_s29 }
 0xafc   : > { %p3749_p6 = scmp.ge.s32.totalorder %s3747_s30, 2 }
 0xafe   : > { %p2489_p0 = pnand %p3749_p6, %p3748_p7 }
 0xb00   : > { %p2490_p11 = pneg %p2489_p0 }
 0xb02   : > { %2958 = dma.done.wait (%p2490_p11), %s1963_s7, 128  }
 0xb03   : > { %2960 = vsyncadd (%p2490_p11), %s1963_s7, 4294967168  ;;  %s3750_s21 = sld [smem:[#allocation31_spill]]  ;;  %s3752_s18 = smov %s2967_s19 }
 0xb04   : > { %s3751_s14 = sld [smem:[#allocation32_spill]]  ;;  %s3753_s19 = smov %s2971_s20 }
 0xb09   : > { %p35_p4 = scmp.ge.s32.totalorder %s3750_s21, 4  }
 0xb0a   : > { %s3754_s20 = smov %s3751_s14 }
 0xb0b   :  { %37 = sbr.rel (!%p35_p4) target bundleno = 21 (0x15), region = 181 }
 0xb10   :  { %1968 = vsyncpa [#allocation4], 1 }
 0xb11   :  { %1970 = vsyncpa [#allocation4 + $0x1], 1 }
 0xb12   :  { %1971 = vsyncpa [#allocation7], 1 }
 0xb13   :  { %1973 = vsyncpa [#allocation7 + $0x1], 1 }
 0xb14   :  { %1974 = vsyncpa [#allocation10], 1 }
 0xb15   :  { %1975 = vsyncpa [#allocation13], 1 }
 0xb16   :  { %1976 = vsyncpa [#allocation16], 1 }
 0xb17   :  { %1977 = vsyncpa [#allocation19], 1 }
 0xb18   :  { %1978 = vsyncpa [#allocation5], 1 }
 0xb19   :  { %1980 = vsyncpa [#allocation5 + $0x1], 1 }

</bundles_post_ra>
